<compile_context>
chip_gen: v7x
topology: tpu7x:2x2x1
jax: 0.10.0
libtpu: 0.0.40
codegen_flags: <defaults>
</compile_context>

<pallas_src>
import jax
import jax.numpy as jnp
from jax import lax
from jax.experimental import pallas as pl
from jax.experimental.pallas import tpu as pltpu

# ---------------- small synthetic ViT config ----------------
IMG = 16          # input spatial size
PATCH = 4         # patch size
IN_CH = 3         # input channels (NCHW)
EMBED = 32        # hidden dim D
DEPTH = 2         # number of transformer blocks
HEADS = 4         # attention heads
HEAD_DIM = EMBED // HEADS
MLP_HIDDEN = EMBED * 4
EPS = 1e-6
NUM_PATCHES = (IMG // PATCH) ** 2          # 16
NUM_TOKENS = NUM_PATCHES + 1               # 17 (+CLS)
N_PAD = ((NUM_TOKENS + 7) // 8) * 8        # 24: tokens padded to a sublane multiple
PATCH_DIM = IN_CH * PATCH * PATCH          # 48


def _ln(x, g, b):
    """LayerNorm over the last dim; statistics kept in f32 (rsqrt -> EUP)."""
    mu = jnp.mean(x, axis=-1, keepdims=True)
    var = jnp.mean(jnp.square(x - mu), axis=-1, keepdims=True)
    return (x - mu) * lax.rsqrt(var + EPS) * g + b


# ---------------- single fused kernel: patch-embed -> blocks -> final LN ----
def _vit_fused_kernel(patches_ref, wp_ref, tok_ref,
                      ln1_g_ref, ln1_b_ref, wqkv_ref, bqkv_ref,
                      wo_ref, bo_ref, ln2_g_ref, ln2_b_ref,
                      w1_ref, b1_ref, w2_ref, b2_ref,
                      lnf_g_ref, lnf_b_ref, o_ref):
    D = EMBED
    HD = HEAD_DIM
    B = tok_ref.shape[0] // N_PAD
    scale = 1.0 / (HD ** 0.5)
    bf16 = jnp.bfloat16

    # ---- patch embedding (Conv2d k=P,s=P as matmul). tok_ref already holds
    #      cls + pos-embed + conv-bias per padded token row (host-side layout),
    #      so one matmul + add assembles the full padded token matrix.
    x = jnp.dot(patches_ref[...].astype(bf16), wp_ref[...],
                preferred_element_type=jnp.float32) + tok_ref[...]   # (B*N_PAD, D) f32

    # key-padding bias, hoisted out of the block loop: padded key columns -> -inf
    key_idx = lax.broadcasted_iota(jnp.int32, (1, 1, N_PAD), 2)
    key_bias = jnp.where(key_idx < NUM_TOKENS, 0.0, -1e30).astype(jnp.float32)

    for d in range(DEPTH):                                    # DEPTH=2, unrolled
        # ------------------- multi-head self-attention -------------------
        xn = _ln(x, ln1_g_ref[d], ln1_b_ref[d])
        qkv = jnp.dot(xn.astype(bf16), wqkv_ref[d],
                      preferred_element_type=jnp.float32) + bqkv_ref[d]  # (B*N_PAD, 3D)
        q = qkv[:, 0 * D:1 * D]
        k = qkv[:, 1 * D:2 * D]
        v = qkv[:, 2 * D:3 * D]

        attn_rows = []
        for b in range(B):                       # B=2, unrolled; still one grid step
            r0 = b * N_PAD
            qb = q[r0:r0 + N_PAD, :]             # (N, D) sublane-aligned slices
            kb = k[r0:r0 + N_PAD, :]
            vb = v[r0:r0 + N_PAD, :]
            # head-batched layouts built once (no per-head lane slicing / concat)
            qh = qb.T.reshape(HEADS, HD, N_PAD).transpose(0, 2, 1)   # (H, N, HD)
            kh = kb.T.reshape(HEADS, HD, N_PAD)                      # (H, HD, N)
            vh = vb.T.reshape(HEADS, HD, N_PAD)                      # (H, HD, N)

            # scores in f32; softmax stats in f32; matmuls in bf16 on the MXU
            s = jnp.einsum('hqd,hdk->hqk', qh.astype(bf16), kh.astype(bf16),
                           preferred_element_type=jnp.float32) * scale
            s = s + key_bias                                  # mask padded keys
            s = s - jnp.max(s, axis=-1, keepdims=True)        # stable softmax
            p = jnp.exp(s)
            p = p * pl.reciprocal(jnp.sum(p, axis=-1, keepdims=True), approx=True)

            ctx = jnp.einsum('hqk,hdk->hqd', p.astype(bf16), vh.astype(bf16),
                             preferred_element_type=jnp.float32)     # (H, N, HD)
            # output projection with per-head weight slabs, summed over heads:
            #   concat_h(ctx_h) @ W_o  ==  sum_h ctx_h @ W_o[h]
            proj = jnp.einsum('hqd,hde->hqe', ctx.astype(bf16), wo_ref[d],
                              preferred_element_type=jnp.float32)    # (H, N, D)
            attn_rows.append(jnp.sum(proj, axis=0) + bo_ref[d])
        x = x + jnp.concatenate(attn_rows, axis=0)            # aligned (24-row) pieces

        # ------------------------------ MLP ------------------------------
        xn2 = _ln(x, ln2_g_ref[d], ln2_b_ref[d])
        h1 = jnp.dot(xn2.astype(bf16), w1_ref[d],
                     preferred_element_type=jnp.float32) + b1_ref[d]
        # TODO(synk): timm default nn.GELU is exact erf; tanh approximation kept
        # for robust Mosaic lowering (small ~1e-3 relative deviation).
        h1 = jax.nn.gelu(h1, approximate=True)                # f32 elementwise
        h2 = jnp.dot(h1.astype(bf16), w2_ref[d],
                     preferred_element_type=jnp.float32) + b2_ref[d]
        x = x + h2

    # ---- final LayerNorm over the whole padded token matrix
    o_ref[...] = _ln(x, lnf_g_ref[...], lnf_b_ref[...])


def _full_spec(shape):
    n = len(shape)
    return pl.BlockSpec(shape, lambda i, _n=n: (0,) * _n)


# ---------------- forward_features (ViTBackbone.forward) ----------------
def vit_forward_features(x_nchw, params):
    B, C, H, W = x_nchw.shape
    P = PATCH
    nh, nw = H // P, W // P

    # --- host-side (XLA) data plumbing only: patchify + padded token-row layout
    patches = x_nchw.reshape(B, C, nh, P, nw, P).transpose(0, 2, 4, 1, 3, 5)
    patches = patches.reshape(B, nh * nw, C * P * P)
    # patches land on token rows 1..NUM_TOKENS-1; row 0 (CLS) and pad rows stay
    # zero, so the in-kernel patch matmul scatters straight into the token matrix.
    patches_padded = jnp.zeros((B, N_PAD, PATCH_DIM), jnp.float32)
    patches_padded = patches_padded.at[:, 1:NUM_TOKENS, :].set(patches)
    patches_padded = patches_padded.reshape(B * N_PAD, PATCH_DIM)

    # per-token additive base: cls token + pos embed + conv bias (pad rows = 0)
    base = params["pos_embed"][0]                              # (17, D)
    base = base.at[0].add(params["cls_token"][0, 0])
    base = base.at[1:].add(params["b_patch"][0])
    tok_base = jnp.zeros((N_PAD, EMBED), jnp.float32).at[:NUM_TOKENS].set(base)
    tok_base = jnp.tile(tok_base, (B, 1))                      # (B*N_PAD, D)

    blk = params["blocks"]
    args = (patches_padded, params["w_patch"], tok_base,
            blk["ln1_g"], blk["ln1_b"], blk["w_qkv"], blk["b_qkv"],
            blk["w_proj_h"], blk["b_proj"], blk["ln2_g"], blk["ln2_b"],
            blk["w_fc1"], blk["b_fc1"], blk["w_fc2"], blk["b_fc2"],
            params["ln_g"], params["ln_b"])

    out_flat = pl.pallas_call(
        _vit_fused_kernel,
        out_shape=jax.ShapeDtypeStruct((B * N_PAD, EMBED), jnp.float32),
        grid=(1,),                    # whole batch + all blocks in one grid step
        in_specs=[_full_spec(a.shape) for a in args],
        out_specs=_full_spec((B * N_PAD, EMBED)),
        compiler_params=pltpu.CompilerParams(
            dimension_semantics=("arbitrary",)),
    )(*args)

    # drop pad tokens; timm forward_features returns the normed token sequence
    return out_flat.reshape(B, N_PAD, EMBED)[:, :NUM_TOKENS, :]


# ---------------- parameter init (deterministic, synthetic) ----------------
def init_params(key):
    ks = jax.random.split(key, 3 + 4 * DEPTH)

    def nrm(k, shape, dtype=jnp.float32):
        return (0.02 * jax.random.normal(k, shape, jnp.float32)).astype(dtype)

    params = {
        # Conv2d(IN_CH, EMBED, kernel=P, stride=P) weight reshaped to (C*P*P, D)
        "w_patch": nrm(ks[0], (PATCH_DIM, EMBED), jnp.bfloat16),
        "b_patch": jnp.zeros((1, EMBED), jnp.float32),
        "cls_token": nrm(ks[1], (1, 1, EMBED)),
        "pos_embed": nrm(ks[2], (1, NUM_TOKENS, EMBED)),
        "ln_g": jnp.ones((1, EMBED), jnp.float32),
        "ln_b": jnp.zeros((1, EMBED), jnp.float32),
    }
    wqkv, wproj, wfc1, wfc2 = [], [], [], []
    for d in range(DEPTH):
        base = 3 + 4 * d
        wqkv.append(nrm(ks[base + 0], (EMBED, 3 * EMBED), jnp.bfloat16))
        wproj.append(nrm(ks[base + 1], (EMBED, EMBED), jnp.bfloat16))
        wfc1.append(nrm(ks[base + 2], (EMBED, MLP_HIDDEN), jnp.bfloat16))
        wfc2.append(nrm(ks[base + 3], (MLP_HIDDEN, EMBED), jnp.bfloat16))
    params["blocks"] = {
        # per-block weights stacked along a leading depth axis; matmul weights
        # in bf16 (MXU-native), LN params and biases in f32 (f32 VPU path).
        "ln1_g": jnp.ones((DEPTH, 1, EMBED), jnp.float32),
        "ln1_b": jnp.zeros((DEPTH, 1, EMBED), jnp.float32),
        "w_qkv": jnp.stack(wqkv, 0),
        "b_qkv": jnp.zeros((DEPTH, 1, 3 * EMBED), jnp.float32),
        # attention output projection pre-reshaped host-side into per-head slabs
        "w_proj_h": jnp.stack(wproj, 0).reshape(DEPTH, HEADS, HEAD_DIM, EMBED),
        "b_proj": jnp.zeros((DEPTH, 1, EMBED), jnp.float32),
        "ln2_g": jnp.ones((DEPTH, 1, EMBED), jnp.float32),
        "ln2_b": jnp.zeros((DEPTH, 1, EMBED), jnp.float32),
        "w_fc1": jnp.stack(wfc1, 0),
        "b_fc1": jnp.zeros((DEPTH, 1, MLP_HIDDEN), jnp.float32),
        "w_fc2": jnp.stack(wfc2, 0),
        "b_fc2": jnp.zeros((DEPTH, 1, EMBED), jnp.float32),
    }
    return params


if __name__ == "__main__":
    key = jax.random.PRNGKey(0)
    k_x, k_p = jax.random.split(key)
    x = jax.random.normal(k_x, (2, IN_CH, IMG, IMG), jnp.float32)   # NCHW input
    params = init_params(k_p)

    fwd = jax.jit(vit_forward_features)
    out = jax.block_until_ready(fwd(x, params))
    assert out.shape == (2, NUM_TOKENS, EMBED), out.shape
    assert bool(jnp.all(jnp.isfinite(out)))
    print("KERNEL_OK")
</pallas_src>

<mosaic_0001>
module attributes {stable_mosaic.version = 11 : i64} {
  func.func @_vit_fused_kernel(%arg0: i32, %arg1: memref<48x48xf32, #tpu.memory_space<vmem>>, %arg2: memref<48x32xbf16, #tpu.memory_space<vmem>>, %arg3: memref<48x32xf32, #tpu.memory_space<vmem>>, %arg4: memref<2x1x32xf32, #tpu.memory_space<vmem>>, %arg5: memref<2x1x32xf32, #tpu.memory_space<vmem>>, %arg6: memref<2x32x96xbf16, #tpu.memory_space<vmem>>, %arg7: memref<2x1x96xf32, #tpu.memory_space<vmem>>, %arg8: memref<2x4x8x32xbf16, #tpu.memory_space<vmem>>, %arg9: memref<2x1x32xf32, #tpu.memory_space<vmem>>, %arg10: memref<2x1x32xf32, #tpu.memory_space<vmem>>, %arg11: memref<2x1x32xf32, #tpu.memory_space<vmem>>, %arg12: memref<2x32x128xbf16, #tpu.memory_space<vmem>>, %arg13: memref<2x1x128xf32, #tpu.memory_space<vmem>>, %arg14: memref<2x128x32xbf16, #tpu.memory_space<vmem>>, %arg15: memref<2x1x32xf32, #tpu.memory_space<vmem>>, %arg16: memref<1x32xf32, #tpu.memory_space<vmem>>, %arg17: memref<1x32xf32, #tpu.memory_space<vmem>>, %arg18: memref<48x32xf32, #tpu.memory_space<vmem>>) attributes {dimension_semantics = [#tpu.dimension_semantics<arbitrary>], iteration_bounds = array<i64: 1>, scalar_prefetch = 0 : i64, scratch_operands = 0 : i64, tpu.core_type = #tpu.core_type<tc>, window_params = [{pipeline_mode = #tpu.pipeline_mode<synchronous>, transform_indices = @transform_0, window_bounds = array<i64: 48, 48>}, {pipeline_mode = #tpu.pipeline_mode<synchronous>, transform_indices = @transform_1, window_bounds = array<i64: 48, 32>}, {pipeline_mode = #tpu.pipeline_mode<synchronous>, transform_indices = @transform_2, window_bounds = array<i64: 48, 32>}, {pipeline_mode = #tpu.pipeline_mode<synchronous>, transform_indices = @transform_3, window_bounds = array<i64: 2, 1, 32>}, {pipeline_mode = #tpu.pipeline_mode<synchronous>, transform_indices = @transform_4, window_bounds = array<i64: 2, 1, 32>}, {pipeline_mode = #tpu.pipeline_mode<synchronous>, transform_indices = @transform_5, window_bounds = array<i64: 2, 32, 96>}, {pipeline_mode = #tpu.pipeline_mode<synchronous>, transform_indices = @transform_6, window_bounds = array<i64: 2, 1, 96>}, {pipeline_mode = #tpu.pipeline_mode<synchronous>, transform_indices = @transform_7, window_bounds = array<i64: 2, 4, 8, 32>}, {pipeline_mode = #tpu.pipeline_mode<synchronous>, transform_indices = @transform_8, window_bounds = array<i64: 2, 1, 32>}, {pipeline_mode = #tpu.pipeline_mode<synchronous>, transform_indices = @transform_9, window_bounds = array<i64: 2, 1, 32>}, {pipeline_mode = #tpu.pipeline_mode<synchronous>, transform_indices = @transform_10, window_bounds = array<i64: 2, 1, 32>}, {pipeline_mode = #tpu.pipeline_mode<synchronous>, transform_indices = @transform_11, window_bounds = array<i64: 2, 32, 128>}, {pipeline_mode = #tpu.pipeline_mode<synchronous>, transform_indices = @transform_12, window_bounds = array<i64: 2, 1, 128>}, {pipeline_mode = #tpu.pipeline_mode<synchronous>, transform_indices = @transform_13, window_bounds = array<i64: 2, 128, 32>}, {pipeline_mode = #tpu.pipeline_mode<synchronous>, transform_indices = @transform_14, window_bounds = array<i64: 2, 1, 32>}, {pipeline_mode = #tpu.pipeline_mode<synchronous>, transform_indices = @transform_15, window_bounds = array<i64: 1, 32>}, {pipeline_mode = #tpu.pipeline_mode<synchronous>, transform_indices = @transform_16, window_bounds = array<i64: 1, 32>}, {pipeline_mode = #tpu.pipeline_mode<synchronous>, transform_indices = @transform_17, window_bounds = array<i64: 48, 32>}]} {
    %c0 = arith.constant 0 : index
    %c0_0 = arith.constant 0 : index
    %0 = vector.load %arg1[%c0, %c0_0] : memref<48x48xf32, #tpu.memory_space<vmem>>, vector<48x48xf32>
    %1 = arith.truncf %0 : vector<48x48xf32> to vector<48x48xbf16>
    %c0_1 = arith.constant 0 : index
    %c0_2 = arith.constant 0 : index
    %2 = vector.load %arg2[%c0_1, %c0_2] : memref<48x32xbf16, #tpu.memory_space<vmem>>, vector<48x32xbf16>
    %cst = arith.constant dense<0.000000e+00> : vector<48x32xf32>
    %3 = tpu.matmul %1, %2, %cst {dimension_numbers = #tpu.dot_dimension_numbers<[1], [0], [0], [1], [0, 0, 1, 1], [], []>} : vector<48x48xbf16>, vector<48x32xbf16>, vector<48x32xf32> -> vector<48x32xf32>
    %c0_3 = arith.constant 0 : index
    %c0_4 = arith.constant 0 : index
    %4 = vector.load %arg3[%c0_3, %c0_4] : memref<48x32xf32, #tpu.memory_space<vmem>>, vector<48x32xf32>
    %5 = arith.addf %3, %4 : vector<48x32xf32>
    %6 = tpu.iota {dimensions = array<i32: 2>} : vector<1x1x24xi32>
    %c17_i32 = arith.constant 17 : i32
    %7 = vector.broadcast %c17_i32 : i32 to vector<1x1x24xi32>
    %8 = arith.cmpi slt, %6, %7 : vector<1x1x24xi32>
    %cst_5 = arith.constant 0.000000e+00 : f32
    %cst_6 = arith.constant -1.000000e+30 : f32
    %9 = vector.broadcast %cst_5 : f32 to vector<1x1x24xf32>
    %10 = vector.broadcast %cst_6 : f32 to vector<1x1x24xf32>
    %11 = arith.select %8, %9, %10 : vector<1x1x24xi1>, vector<1x1x24xf32>
    %c0_7 = arith.constant 0 : index
    %c0_8 = arith.constant 0 : index
    %c0_9 = arith.constant 0 : index
    %12 = vector.load %arg4[%c0_7, %c0_8, %c0_9] : memref<2x1x32xf32, #tpu.memory_space<vmem>>, vector<1x1x32xf32>
    %13 = vector.shape_cast %12 : vector<1x1x32xf32> to vector<1x32xf32>
    %c0_10 = arith.constant 0 : index
    %c0_11 = arith.constant 0 : index
    %c0_12 = arith.constant 0 : index
    %14 = vector.load %arg5[%c0_10, %c0_11, %c0_12] : memref<2x1x32xf32, #tpu.memory_space<vmem>>, vector<1x1x32xf32>
    %15 = vector.shape_cast %14 : vector<1x1x32xf32> to vector<1x32xf32>
    %cst_13 = arith.constant dense<0.000000e+00> : vector<48xf32>
    %16 = vector.multi_reduction <add>, %5, %cst_13 [1] : vector<48x32xf32> to vector<48xf32>
    %17 = vector.shape_cast %16 : vector<48xf32> to vector<48x1xf32>
    %cst_14 = arith.constant 3.200000e+01 : f32
    %18 = vector.broadcast %cst_14 : f32 to vector<48x1xf32>
    %19 = arith.divf %17, %18 : vector<48x1xf32>
    %20 = vector.broadcast %19 : vector<48x1xf32> to vector<48x32xf32>
    %21 = arith.subf %5, %20 : vector<48x32xf32>
    %22 = arith.mulf %21, %21 : vector<48x32xf32>
    %cst_15 = arith.constant dense<0.000000e+00> : vector<48xf32>
    %23 = vector.multi_reduction <add>, %22, %cst_15 [1] : vector<48x32xf32> to vector<48xf32>
    %24 = vector.shape_cast %23 : vector<48xf32> to vector<48x1xf32>
    %cst_16 = arith.constant 3.200000e+01 : f32
    %25 = vector.broadcast %cst_16 : f32 to vector<48x1xf32>
    %26 = arith.divf %24, %25 : vector<48x1xf32>
    %27 = vector.broadcast %19 : vector<48x1xf32> to vector<48x32xf32>
    %28 = arith.subf %5, %27 : vector<48x32xf32>
    %cst_17 = arith.constant 9.99999997E-7 : f32
    %29 = vector.broadcast %cst_17 : f32 to vector<48x1xf32>
    %30 = arith.addf %26, %29 : vector<48x1xf32>
    %31 = math.rsqrt %30 : vector<48x1xf32>
    %32 = vector.broadcast %31 : vector<48x1xf32> to vector<48x32xf32>
    %33 = arith.mulf %28, %32 : vector<48x32xf32>
    %34 = vector.broadcast %13 : vector<1x32xf32> to vector<48x32xf32>
    %35 = arith.mulf %33, %34 : vector<48x32xf32>
    %36 = vector.broadcast %15 : vector<1x32xf32> to vector<48x32xf32>
    %37 = arith.addf %35, %36 : vector<48x32xf32>
    %38 = arith.truncf %37 : vector<48x32xf32> to vector<48x32xbf16>
    %c0_18 = arith.constant 0 : index
    %c0_19 = arith.constant 0 : index
    %c0_20 = arith.constant 0 : index
    %39 = vector.load %arg6[%c0_18, %c0_19, %c0_20] : memref<2x32x96xbf16, #tpu.memory_space<vmem>>, vector<1x32x96xbf16>
    %40 = vector.shape_cast %39 : vector<1x32x96xbf16> to vector<32x96xbf16>
    %cst_21 = arith.constant dense<0.000000e+00> : vector<48x96xf32>
    %41 = tpu.matmul %38, %40, %cst_21 {dimension_numbers = #tpu.dot_dimension_numbers<[1], [0], [0], [1], [0, 0, 1, 1], [], []>} : vector<48x32xbf16>, vector<32x96xbf16>, vector<48x96xf32> -> vector<48x96xf32>
    %c0_22 = arith.constant 0 : index
    %c0_23 = arith.constant 0 : index
    %c0_24 = arith.constant 0 : index
    %42 = vector.load %arg7[%c0_22, %c0_23, %c0_24] : memref<2x1x96xf32, #tpu.memory_space<vmem>>, vector<1x1x96xf32>
    %43 = vector.shape_cast %42 : vector<1x1x96xf32> to vector<1x96xf32>
    %44 = vector.broadcast %43 : vector<1x96xf32> to vector<48x96xf32>
    %45 = arith.addf %41, %44 : vector<48x96xf32>
    %46 = vector.extract_strided_slice %45 {offsets = [0, 0], sizes = [48, 32], strides = [1, 1]} : vector<48x96xf32> to vector<48x32xf32>
    %47 = vector.extract_strided_slice %45 {offsets = [0, 32], sizes = [48, 32], strides = [1, 1]} : vector<48x96xf32> to vector<48x32xf32>
    %48 = vector.extract_strided_slice %45 {offsets = [0, 64], sizes = [48, 32], strides = [1, 1]} : vector<48x96xf32> to vector<48x32xf32>
    %49 = vector.extract_strided_slice %46 {offsets = [0, 0], sizes = [24, 32], strides = [1, 1]} : vector<48x32xf32> to vector<24x32xf32>
    %50 = vector.extract_strided_slice %47 {offsets = [0, 0], sizes = [24, 32], strides = [1, 1]} : vector<48x32xf32> to vector<24x32xf32>
    %51 = vector.extract_strided_slice %48 {offsets = [0, 0], sizes = [24, 32], strides = [1, 1]} : vector<48x32xf32> to vector<24x32xf32>
    %52 = tpu.transpose %49, [1, 0] : vector<24x32xf32> -> vector<32x24xf32>
    %53 = vector.shape_cast %52 : vector<32x24xf32> to vector<4x8x24xf32>
    %54 = tpu.transpose %53, [0, 2, 1] : vector<4x8x24xf32> -> vector<4x24x8xf32>
    %55 = tpu.transpose %50, [1, 0] : vector<24x32xf32> -> vector<32x24xf32>
    %56 = vector.shape_cast %55 : vector<32x24xf32> to vector<4x8x24xf32>
    %57 = tpu.transpose %51, [1, 0] : vector<24x32xf32> -> vector<32x24xf32>
    %58 = vector.shape_cast %57 : vector<32x24xf32> to vector<4x8x24xf32>
    %59 = arith.truncf %54 : vector<4x24x8xf32> to vector<4x24x8xbf16>
    %60 = arith.truncf %56 : vector<4x8x24xf32> to vector<4x8x24xbf16>
    "tpu.trace_start"() <{level = 10 : i32, message = "hqd,hdk->hqk"}> : () -> ()
    %cst_25 = arith.constant dense<0.000000e+00> : vector<4x24x24xf32>
    %61 = tpu.matmul %59, %60, %cst_25 {dimension_numbers = #tpu.dot_dimension_numbers<[2], [1], [1], [2], [0, 0, 0, 1, 1, 2], [0], [0]>} : vector<4x24x8xbf16>, vector<4x8x24xbf16>, vector<4x24x24xf32> -> vector<4x24x24xf32>
    "tpu.trace_stop"() : () -> ()
    %cst_26 = arith.constant 0.353553385 : f32
    %62 = vector.broadcast %cst_26 : f32 to vector<4x24x24xf32>
    %63 = arith.mulf %61, %62 : vector<4x24x24xf32>
    %64 = vector.broadcast %11 : vector<1x1x24xf32> to vector<4x24x24xf32>
    %65 = arith.addf %63, %64 : vector<4x24x24xf32>
    %cst_27 = arith.constant dense<0xFF800000> : vector<4x24xf32>
    %66 = vector.multi_reduction <maximumf>, %65, %cst_27 [2] : vector<4x24x24xf32> to vector<4x24xf32>
    %67 = vector.shape_cast %66 : vector<4x24xf32> to vector<4x24x1xf32>
    %68 = vector.broadcast %67 : vector<4x24x1xf32> to vector<4x24x24xf32>
    %69 = arith.subf %65, %68 : vector<4x24x24xf32>
    %70 = math.exp %69 : vector<4x24x24xf32>
    %cst_28 = arith.constant dense<0.000000e+00> : vector<4x24xf32>
    %71 = vector.multi_reduction <add>, %70, %cst_28 [2] : vector<4x24x24xf32> to vector<4x24xf32>
    %72 = vector.shape_cast %71 : vector<4x24xf32> to vector<4x24x1xf32>
    %73 = tpu.reciprocal %72 {approx = true} : vector<4x24x1xf32> -> vector<4x24x1xf32>
    %74 = vector.broadcast %73 : vector<4x24x1xf32> to vector<4x24x24xf32>
    %75 = arith.mulf %70, %74 : vector<4x24x24xf32>
    %76 = arith.truncf %75 : vector<4x24x24xf32> to vector<4x24x24xbf16>
    %77 = arith.truncf %58 : vector<4x8x24xf32> to vector<4x8x24xbf16>
    "tpu.trace_start"() <{level = 10 : i32, message = "hqk,hdk->hqd"}> : () -> ()
    %cst_29 = arith.constant dense<0.000000e+00> : vector<4x24x8xf32>
    %78 = tpu.matmul %76, %77, %cst_29 {dimension_numbers = #tpu.dot_dimension_numbers<[2], [2], [1], [1], [0, 0, 0, 1, 1, 1], [0], [0]>} : vector<4x24x24xbf16>, vector<4x8x24xbf16>, vector<4x24x8xf32> -> vector<4x24x8xf32>
    "tpu.trace_stop"() : () -> ()
    %79 = arith.truncf %78 : vector<4x24x8xf32> to vector<4x24x8xbf16>
    %c0_30 = arith.constant 0 : index
    %c0_31 = arith.constant 0 : index
    %c0_32 = arith.constant 0 : index
    %c0_33 = arith.constant 0 : index
    %80 = vector.load %arg8[%c0_30, %c0_31, %c0_32, %c0_33] : memref<2x4x8x32xbf16, #tpu.memory_space<vmem>>, vector<1x4x8x32xbf16>
    %81 = vector.shape_cast %80 : vector<1x4x8x32xbf16> to vector<4x8x32xbf16>
    "tpu.trace_start"() <{level = 10 : i32, message = "hqd,hde->hqe"}> : () -> ()
    %cst_34 = arith.constant dense<0.000000e+00> : vector<4x24x32xf32>
    %82 = tpu.matmul %79, %81, %cst_34 {dimension_numbers = #tpu.dot_dimension_numbers<[2], [1], [1], [2], [0, 0, 0, 1, 1, 2], [0], [0]>} : vector<4x24x8xbf16>, vector<4x8x32xbf16>, vector<4x24x32xf32> -> vector<4x24x32xf32>
    "tpu.trace_stop"() : () -> ()
    %cst_35 = arith.constant dense<0.000000e+00> : vector<24x32xf32>
    %83 = vector.multi_reduction <add>, %82, %cst_35 [0] : vector<4x24x32xf32> to vector<24x32xf32>
    %c0_36 = arith.constant 0 : index
    %c0_37 = arith.constant 0 : index
    %c0_38 = arith.constant 0 : index
    %84 = vector.load %arg9[%c0_36, %c0_37, %c0_38] : memref<2x1x32xf32, #tpu.memory_space<vmem>>, vector<1x1x32xf32>
    %85 = vector.shape_cast %84 : vector<1x1x32xf32> to vector<1x32xf32>
    %86 = vector.broadcast %85 : vector<1x32xf32> to vector<24x32xf32>
    %87 = arith.addf %83, %86 : vector<24x32xf32>
    %88 = vector.extract_strided_slice %46 {offsets = [24, 0], sizes = [24, 32], strides = [1, 1]} : vector<48x32xf32> to vector<24x32xf32>
    %89 = vector.extract_strided_slice %47 {offsets = [24, 0], sizes = [24, 32], strides = [1, 1]} : vector<48x32xf32> to vector<24x32xf32>
    %90 = vector.extract_strided_slice %48 {offsets = [24, 0], sizes = [24, 32], strides = [1, 1]} : vector<48x32xf32> to vector<24x32xf32>
    %91 = tpu.transpose %88, [1, 0] : vector<24x32xf32> -> vector<32x24xf32>
    %92 = vector.shape_cast %91 : vector<32x24xf32> to vector<4x8x24xf32>
    %93 = tpu.transpose %92, [0, 2, 1] : vector<4x8x24xf32> -> vector<4x24x8xf32>
    %94 = tpu.transpose %89, [1, 0] : vector<24x32xf32> -> vector<32x24xf32>
    %95 = vector.shape_cast %94 : vector<32x24xf32> to vector<4x8x24xf32>
    %96 = tpu.transpose %90, [1, 0] : vector<24x32xf32> -> vector<32x24xf32>
    %97 = vector.shape_cast %96 : vector<32x24xf32> to vector<4x8x24xf32>
    %98 = arith.truncf %93 : vector<4x24x8xf32> to vector<4x24x8xbf16>
    %99 = arith.truncf %95 : vector<4x8x24xf32> to vector<4x8x24xbf16>
    "tpu.trace_start"() <{level = 10 : i32, message = "hqd,hdk->hqk"}> : () -> ()
    %cst_39 = arith.constant dense<0.000000e+00> : vector<4x24x24xf32>
    %100 = tpu.matmul %98, %99, %cst_39 {dimension_numbers = #tpu.dot_dimension_numbers<[2], [1], [1], [2], [0, 0, 0, 1, 1, 2], [0], [0]>} : vector<4x24x8xbf16>, vector<4x8x24xbf16>, vector<4x24x24xf32> -> vector<4x24x24xf32>
    "tpu.trace_stop"() : () -> ()
    %cst_40 = arith.constant 0.353553385 : f32
    %101 = vector.broadcast %cst_40 : f32 to vector<4x24x24xf32>
    %102 = arith.mulf %100, %101 : vector<4x24x24xf32>
    %103 = vector.broadcast %11 : vector<1x1x24xf32> to vector<4x24x24xf32>
    %104 = arith.addf %102, %103 : vector<4x24x24xf32>
    %cst_41 = arith.constant dense<0xFF800000> : vector<4x24xf32>
    %105 = vector.multi_reduction <maximumf>, %104, %cst_41 [2] : vector<4x24x24xf32> to vector<4x24xf32>
    %106 = vector.shape_cast %105 : vector<4x24xf32> to vector<4x24x1xf32>
    %107 = vector.broadcast %106 : vector<4x24x1xf32> to vector<4x24x24xf32>
    %108 = arith.subf %104, %107 : vector<4x24x24xf32>
    %109 = math.exp %108 : vector<4x24x24xf32>
    %cst_42 = arith.constant dense<0.000000e+00> : vector<4x24xf32>
    %110 = vector.multi_reduction <add>, %109, %cst_42 [2] : vector<4x24x24xf32> to vector<4x24xf32>
    %111 = vector.shape_cast %110 : vector<4x24xf32> to vector<4x24x1xf32>
    %112 = tpu.reciprocal %111 {approx = true} : vector<4x24x1xf32> -> vector<4x24x1xf32>
    %113 = vector.broadcast %112 : vector<4x24x1xf32> to vector<4x24x24xf32>
    %114 = arith.mulf %109, %113 : vector<4x24x24xf32>
    %115 = arith.truncf %114 : vector<4x24x24xf32> to vector<4x24x24xbf16>
    %116 = arith.truncf %97 : vector<4x8x24xf32> to vector<4x8x24xbf16>
    "tpu.trace_start"() <{level = 10 : i32, message = "hqk,hdk->hqd"}> : () -> ()
    %cst_43 = arith.constant dense<0.000000e+00> : vector<4x24x8xf32>
    %117 = tpu.matmul %115, %116, %cst_43 {dimension_numbers = #tpu.dot_dimension_numbers<[2], [2], [1], [1], [0, 0, 0, 1, 1, 1], [0], [0]>} : vector<4x24x24xbf16>, vector<4x8x24xbf16>, vector<4x24x8xf32> -> vector<4x24x8xf32>
    "tpu.trace_stop"() : () -> ()
    %118 = arith.truncf %117 : vector<4x24x8xf32> to vector<4x24x8xbf16>
    %c0_44 = arith.constant 0 : index
    %c0_45 = arith.constant 0 : index
    %c0_46 = arith.constant 0 : index
    %c0_47 = arith.constant 0 : index
    %119 = vector.load %arg8[%c0_44, %c0_45, %c0_46, %c0_47] : memref<2x4x8x32xbf16, #tpu.memory_space<vmem>>, vector<1x4x8x32xbf16>
    %120 = vector.shape_cast %119 : vector<1x4x8x32xbf16> to vector<4x8x32xbf16>
    "tpu.trace_start"() <{level = 10 : i32, message = "hqd,hde->hqe"}> : () -> ()
    %cst_48 = arith.constant dense<0.000000e+00> : vector<4x24x32xf32>
    %121 = tpu.matmul %118, %120, %cst_48 {dimension_numbers = #tpu.dot_dimension_numbers<[2], [1], [1], [2], [0, 0, 0, 1, 1, 2], [0], [0]>} : vector<4x24x8xbf16>, vector<4x8x32xbf16>, vector<4x24x32xf32> -> vector<4x24x32xf32>
    "tpu.trace_stop"() : () -> ()
    %cst_49 = arith.constant dense<0.000000e+00> : vector<24x32xf32>
    %122 = vector.multi_reduction <add>, %121, %cst_49 [0] : vector<4x24x32xf32> to vector<24x32xf32>
    %c0_50 = arith.constant 0 : index
    %c0_51 = arith.constant 0 : index
    %c0_52 = arith.constant 0 : index
    %123 = vector.load %arg9[%c0_50, %c0_51, %c0_52] : memref<2x1x32xf32, #tpu.memory_space<vmem>>, vector<1x1x32xf32>
    %124 = vector.shape_cast %123 : vector<1x1x32xf32> to vector<1x32xf32>
    %125 = vector.broadcast %124 : vector<1x32xf32> to vector<24x32xf32>
    %126 = arith.addf %122, %125 : vector<24x32xf32>
    %127 = tpu.concatenate %87, %126 in 0 : vector<24x32xf32>, vector<24x32xf32> -> vector<48x32xf32>
    %128 = arith.addf %5, %127 : vector<48x32xf32>
    %c0_53 = arith.constant 0 : index
    %c0_54 = arith.constant 0 : index
    %c0_55 = arith.constant 0 : index
    %129 = vector.load %arg10[%c0_53, %c0_54, %c0_55] : memref<2x1x32xf32, #tpu.memory_space<vmem>>, vector<1x1x32xf32>
    %130 = vector.shape_cast %129 : vector<1x1x32xf32> to vector<1x32xf32>
    %c0_56 = arith.constant 0 : index
    %c0_57 = arith.constant 0 : index
    %c0_58 = arith.constant 0 : index
    %131 = vector.load %arg11[%c0_56, %c0_57, %c0_58] : memref<2x1x32xf32, #tpu.memory_space<vmem>>, vector<1x1x32xf32>
    %132 = vector.shape_cast %131 : vector<1x1x32xf32> to vector<1x32xf32>
    %cst_59 = arith.constant dense<0.000000e+00> : vector<48xf32>
    %133 = vector.multi_reduction <add>, %128, %cst_59 [1] : vector<48x32xf32> to vector<48xf32>
    %134 = vector.shape_cast %133 : vector<48xf32> to vector<48x1xf32>
    %cst_60 = arith.constant 3.200000e+01 : f32
    %135 = vector.broadcast %cst_60 : f32 to vector<48x1xf32>
    %136 = arith.divf %134, %135 : vector<48x1xf32>
    %137 = vector.broadcast %136 : vector<48x1xf32> to vector<48x32xf32>
    %138 = arith.subf %128, %137 : vector<48x32xf32>
    %139 = arith.mulf %138, %138 : vector<48x32xf32>
    %cst_61 = arith.constant dense<0.000000e+00> : vector<48xf32>
    %140 = vector.multi_reduction <add>, %139, %cst_61 [1] : vector<48x32xf32> to vector<48xf32>
    %141 = vector.shape_cast %140 : vector<48xf32> to vector<48x1xf32>
    %cst_62 = arith.constant 3.200000e+01 : f32
    %142 = vector.broadcast %cst_62 : f32 to vector<48x1xf32>
    %143 = arith.divf %141, %142 : vector<48x1xf32>
    %144 = vector.broadcast %136 : vector<48x1xf32> to vector<48x32xf32>
    %145 = arith.subf %128, %144 : vector<48x32xf32>
    %cst_63 = arith.constant 9.99999997E-7 : f32
    %146 = vector.broadcast %cst_63 : f32 to vector<48x1xf32>
    %147 = arith.addf %143, %146 : vector<48x1xf32>
    %148 = math.rsqrt %147 : vector<48x1xf32>
    %149 = vector.broadcast %148 : vector<48x1xf32> to vector<48x32xf32>
    %150 = arith.mulf %145, %149 : vector<48x32xf32>
    %151 = vector.broadcast %130 : vector<1x32xf32> to vector<48x32xf32>
    %152 = arith.mulf %150, %151 : vector<48x32xf32>
    %153 = vector.broadcast %132 : vector<1x32xf32> to vector<48x32xf32>
    %154 = arith.addf %152, %153 : vector<48x32xf32>
    %155 = arith.truncf %154 : vector<48x32xf32> to vector<48x32xbf16>
    %c0_64 = arith.constant 0 : index
    %c0_65 = arith.constant 0 : index
    %c0_66 = arith.constant 0 : index
    %156 = vector.load %arg12[%c0_64, %c0_65, %c0_66] : memref<2x32x128xbf16, #tpu.memory_space<vmem>>, vector<1x32x128xbf16>
    %157 = vector.shape_cast %156 : vector<1x32x128xbf16> to vector<32x128xbf16>
    %cst_67 = arith.constant dense<0.000000e+00> : vector<48x128xf32>
    %158 = tpu.matmul %155, %157, %cst_67 {dimension_numbers = #tpu.dot_dimension_numbers<[1], [0], [0], [1], [0, 0, 1, 1], [], []>} : vector<48x32xbf16>, vector<32x128xbf16>, vector<48x128xf32> -> vector<48x128xf32>
    %c0_68 = arith.constant 0 : index
    %c0_69 = arith.constant 0 : index
    %c0_70 = arith.constant 0 : index
    %159 = vector.load %arg13[%c0_68, %c0_69, %c0_70] : memref<2x1x128xf32, #tpu.memory_space<vmem>>, vector<1x1x128xf32>
    %160 = vector.shape_cast %159 : vector<1x1x128xf32> to vector<1x128xf32>
    %161 = vector.broadcast %160 : vector<1x128xf32> to vector<48x128xf32>
    %162 = arith.addf %158, %161 : vector<48x128xf32>
    %163 = arith.mulf %162, %162 : vector<48x128xf32>
    %164 = arith.mulf %162, %163 : vector<48x128xf32>
    %cst_71 = arith.constant 4.471500e-02 : f32
    %165 = vector.broadcast %cst_71 : f32 to vector<48x128xf32>
    %166 = arith.mulf %165, %164 : vector<48x128xf32>
    %167 = arith.addf %162, %166 : vector<48x128xf32>
    %cst_72 = arith.constant 0.797884583 : f32
    %168 = vector.broadcast %cst_72 : f32 to vector<48x128xf32>
    %169 = arith.mulf %168, %167 : vector<48x128xf32>
    %170 = math.tanh %169 : vector<48x128xf32>
    %cst_73 = arith.constant 1.000000e+00 : f32
    %171 = vector.broadcast %cst_73 : f32 to vector<48x128xf32>
    %172 = arith.addf %171, %170 : vector<48x128xf32>
    %cst_74 = arith.constant 5.000000e-01 : f32
    %173 = vector.broadcast %cst_74 : f32 to vector<48x128xf32>
    %174 = arith.mulf %173, %172 : vector<48x128xf32>
    %175 = arith.mulf %162, %174 : vector<48x128xf32>
    %176 = arith.truncf %175 : vector<48x128xf32> to vector<48x128xbf16>
    %c0_75 = arith.constant 0 : index
    %c0_76 = arith.constant 0 : index
    %c0_77 = arith.constant 0 : index
    %177 = vector.load %arg14[%c0_75, %c0_76, %c0_77] : memref<2x128x32xbf16, #tpu.memory_space<vmem>>, vector<1x128x32xbf16>
    %178 = vector.shape_cast %177 : vector<1x128x32xbf16> to vector<128x32xbf16>
    %cst_78 = arith.constant dense<0.000000e+00> : vector<48x32xf32>
    %179 = tpu.matmul %176, %178, %cst_78 {dimension_numbers = #tpu.dot_dimension_numbers<[1], [0], [0], [1], [0, 0, 1, 1], [], []>} : vector<48x128xbf16>, vector<128x32xbf16>, vector<48x32xf32> -> vector<48x32xf32>
    %c0_79 = arith.constant 0 : index
    %c0_80 = arith.constant 0 : index
    %c0_81 = arith.constant 0 : index
    %180 = vector.load %arg15[%c0_79, %c0_80, %c0_81] : memref<2x1x32xf32, #tpu.memory_space<vmem>>, vector<1x1x32xf32>
    %181 = vector.shape_cast %180 : vector<1x1x32xf32> to vector<1x32xf32>
    %182 = vector.broadcast %181 : vector<1x32xf32> to vector<48x32xf32>
    %183 = arith.addf %179, %182 : vector<48x32xf32>
    %184 = arith.addf %128, %183 : vector<48x32xf32>
    %c1 = arith.constant 1 : index
    %c0_82 = arith.constant 0 : index
    %c0_83 = arith.constant 0 : index
    %185 = vector.load %arg4[%c1, %c0_82, %c0_83] : memref<2x1x32xf32, #tpu.memory_space<vmem>>, vector<1x1x32xf32>
    %186 = vector.shape_cast %185 : vector<1x1x32xf32> to vector<1x32xf32>
    %c1_84 = arith.constant 1 : index
    %c0_85 = arith.constant 0 : index
    %c0_86 = arith.constant 0 : index
    %187 = vector.load %arg5[%c1_84, %c0_85, %c0_86] : memref<2x1x32xf32, #tpu.memory_space<vmem>>, vector<1x1x32xf32>
    %188 = vector.shape_cast %187 : vector<1x1x32xf32> to vector<1x32xf32>
    %cst_87 = arith.constant dense<0.000000e+00> : vector<48xf32>
    %189 = vector.multi_reduction <add>, %184, %cst_87 [1] : vector<48x32xf32> to vector<48xf32>
    %190 = vector.shape_cast %189 : vector<48xf32> to vector<48x1xf32>
    %cst_88 = arith.constant 3.200000e+01 : f32
    %191 = vector.broadcast %cst_88 : f32 to vector<48x1xf32>
    %192 = arith.divf %190, %191 : vector<48x1xf32>
    %193 = vector.broadcast %192 : vector<48x1xf32> to vector<48x32xf32>
    %194 = arith.subf %184, %193 : vector<48x32xf32>
    %195 = arith.mulf %194, %194 : vector<48x32xf32>
    %cst_89 = arith.constant dense<0.000000e+00> : vector<48xf32>
    %196 = vector.multi_reduction <add>, %195, %cst_89 [1] : vector<48x32xf32> to vector<48xf32>
    %197 = vector.shape_cast %196 : vector<48xf32> to vector<48x1xf32>
    %cst_90 = arith.constant 3.200000e+01 : f32
    %198 = vector.broadcast %cst_90 : f32 to vector<48x1xf32>
    %199 = arith.divf %197, %198 : vector<48x1xf32>
    %200 = vector.broadcast %192 : vector<48x1xf32> to vector<48x32xf32>
    %201 = arith.subf %184, %200 : vector<48x32xf32>
    %cst_91 = arith.constant 9.99999997E-7 : f32
    %202 = vector.broadcast %cst_91 : f32 to vector<48x1xf32>
    %203 = arith.addf %199, %202 : vector<48x1xf32>
    %204 = math.rsqrt %203 : vector<48x1xf32>
    %205 = vector.broadcast %204 : vector<48x1xf32> to vector<48x32xf32>
    %206 = arith.mulf %201, %205 : vector<48x32xf32>
    %207 = vector.broadcast %186 : vector<1x32xf32> to vector<48x32xf32>
    %208 = arith.mulf %206, %207 : vector<48x32xf32>
    %209 = vector.broadcast %188 : vector<1x32xf32> to vector<48x32xf32>
    %210 = arith.addf %208, %209 : vector<48x32xf32>
    %211 = arith.truncf %210 : vector<48x32xf32> to vector<48x32xbf16>
    %c1_92 = arith.constant 1 : index
    %c0_93 = arith.constant 0 : index
    %c0_94 = arith.constant 0 : index
    %212 = vector.load %arg6[%c1_92, %c0_93, %c0_94] : memref<2x32x96xbf16, #tpu.memory_space<vmem>>, vector<1x32x96xbf16>
    %213 = vector.shape_cast %212 : vector<1x32x96xbf16> to vector<32x96xbf16>
    %cst_95 = arith.constant dense<0.000000e+00> : vector<48x96xf32>
    %214 = tpu.matmul %211, %213, %cst_95 {dimension_numbers = #tpu.dot_dimension_numbers<[1], [0], [0], [1], [0, 0, 1, 1], [], []>} : vector<48x32xbf16>, vector<32x96xbf16>, vector<48x96xf32> -> vector<48x96xf32>
    %c1_96 = arith.constant 1 : index
    %c0_97 = arith.constant 0 : index
    %c0_98 = arith.constant 0 : index
    %215 = vector.load %arg7[%c1_96, %c0_97, %c0_98] : memref<2x1x96xf32, #tpu.memory_space<vmem>>, vector<1x1x96xf32>
    %216 = vector.shape_cast %215 : vector<1x1x96xf32> to vector<1x96xf32>
    %217 = vector.broadcast %216 : vector<1x96xf32> to vector<48x96xf32>
    %218 = arith.addf %214, %217 : vector<48x96xf32>
    %219 = vector.extract_strided_slice %218 {offsets = [0, 0], sizes = [48, 32], strides = [1, 1]} : vector<48x96xf32> to vector<48x32xf32>
    %220 = vector.extract_strided_slice %218 {offsets = [0, 32], sizes = [48, 32], strides = [1, 1]} : vector<48x96xf32> to vector<48x32xf32>
    %221 = vector.extract_strided_slice %218 {offsets = [0, 64], sizes = [48, 32], strides = [1, 1]} : vector<48x96xf32> to vector<48x32xf32>
    %222 = vector.extract_strided_slice %219 {offsets = [0, 0], sizes = [24, 32], strides = [1, 1]} : vector<48x32xf32> to vector<24x32xf32>
    %223 = vector.extract_strided_slice %220 {offsets = [0, 0], sizes = [24, 32], strides = [1, 1]} : vector<48x32xf32> to vector<24x32xf32>
    %224 = vector.extract_strided_slice %221 {offsets = [0, 0], sizes = [24, 32], strides = [1, 1]} : vector<48x32xf32> to vector<24x32xf32>
    %225 = tpu.transpose %222, [1, 0] : vector<24x32xf32> -> vector<32x24xf32>
    %226 = vector.shape_cast %225 : vector<32x24xf32> to vector<4x8x24xf32>
    %227 = tpu.transpose %226, [0, 2, 1] : vector<4x8x24xf32> -> vector<4x24x8xf32>
    %228 = tpu.transpose %223, [1, 0] : vector<24x32xf32> -> vector<32x24xf32>
    %229 = vector.shape_cast %228 : vector<32x24xf32> to vector<4x8x24xf32>
    %230 = tpu.transpose %224, [1, 0] : vector<24x32xf32> -> vector<32x24xf32>
    %231 = vector.shape_cast %230 : vector<32x24xf32> to vector<4x8x24xf32>
    %232 = arith.truncf %227 : vector<4x24x8xf32> to vector<4x24x8xbf16>
    %233 = arith.truncf %229 : vector<4x8x24xf32> to vector<4x8x24xbf16>
    "tpu.trace_start"() <{level = 10 : i32, message = "hqd,hdk->hqk"}> : () -> ()
    %cst_99 = arith.constant dense<0.000000e+00> : vector<4x24x24xf32>
    %234 = tpu.matmul %232, %233, %cst_99 {dimension_numbers = #tpu.dot_dimension_numbers<[2], [1], [1], [2], [0, 0, 0, 1, 1, 2], [0], [0]>} : vector<4x24x8xbf16>, vector<4x8x24xbf16>, vector<4x24x24xf32> -> vector<4x24x24xf32>
    "tpu.trace_stop"() : () -> ()
    %cst_100 = arith.constant 0.353553385 : f32
    %235 = vector.broadcast %cst_100 : f32 to vector<4x24x24xf32>
    %236 = arith.mulf %234, %235 : vector<4x24x24xf32>
    %237 = vector.broadcast %11 : vector<1x1x24xf32> to vector<4x24x24xf32>
    %238 = arith.addf %236, %237 : vector<4x24x24xf32>
    %cst_101 = arith.constant dense<0xFF800000> : vector<4x24xf32>
    %239 = vector.multi_reduction <maximumf>, %238, %cst_101 [2] : vector<4x24x24xf32> to vector<4x24xf32>
    %240 = vector.shape_cast %239 : vector<4x24xf32> to vector<4x24x1xf32>
    %241 = vector.broadcast %240 : vector<4x24x1xf32> to vector<4x24x24xf32>
    %242 = arith.subf %238, %241 : vector<4x24x24xf32>
    %243 = math.exp %242 : vector<4x24x24xf32>
    %cst_102 = arith.constant dense<0.000000e+00> : vector<4x24xf32>
    %244 = vector.multi_reduction <add>, %243, %cst_102 [2] : vector<4x24x24xf32> to vector<4x24xf32>
    %245 = vector.shape_cast %244 : vector<4x24xf32> to vector<4x24x1xf32>
    %246 = tpu.reciprocal %245 {approx = true} : vector<4x24x1xf32> -> vector<4x24x1xf32>
    %247 = vector.broadcast %246 : vector<4x24x1xf32> to vector<4x24x24xf32>
    %248 = arith.mulf %243, %247 : vector<4x24x24xf32>
    %249 = arith.truncf %248 : vector<4x24x24xf32> to vector<4x24x24xbf16>
    %250 = arith.truncf %231 : vector<4x8x24xf32> to vector<4x8x24xbf16>
    "tpu.trace_start"() <{level = 10 : i32, message = "hqk,hdk->hqd"}> : () -> ()
    %cst_103 = arith.constant dense<0.000000e+00> : vector<4x24x8xf32>
    %251 = tpu.matmul %249, %250, %cst_103 {dimension_numbers = #tpu.dot_dimension_numbers<[2], [2], [1], [1], [0, 0, 0, 1, 1, 1], [0], [0]>} : vector<4x24x24xbf16>, vector<4x8x24xbf16>, vector<4x24x8xf32> -> vector<4x24x8xf32>
    "tpu.trace_stop"() : () -> ()
    %252 = arith.truncf %251 : vector<4x24x8xf32> to vector<4x24x8xbf16>
    %c1_104 = arith.constant 1 : index
    %c0_105 = arith.constant 0 : index
    %c0_106 = arith.constant 0 : index
    %c0_107 = arith.constant 0 : index
    %253 = vector.load %arg8[%c1_104, %c0_105, %c0_106, %c0_107] : memref<2x4x8x32xbf16, #tpu.memory_space<vmem>>, vector<1x4x8x32xbf16>
    %254 = vector.shape_cast %253 : vector<1x4x8x32xbf16> to vector<4x8x32xbf16>
    "tpu.trace_start"() <{level = 10 : i32, message = "hqd,hde->hqe"}> : () -> ()
    %cst_108 = arith.constant dense<0.000000e+00> : vector<4x24x32xf32>
    %255 = tpu.matmul %252, %254, %cst_108 {dimension_numbers = #tpu.dot_dimension_numbers<[2], [1], [1], [2], [0, 0, 0, 1, 1, 2], [0], [0]>} : vector<4x24x8xbf16>, vector<4x8x32xbf16>, vector<4x24x32xf32> -> vector<4x24x32xf32>
    "tpu.trace_stop"() : () -> ()
    %cst_109 = arith.constant dense<0.000000e+00> : vector<24x32xf32>
    %256 = vector.multi_reduction <add>, %255, %cst_109 [0] : vector<4x24x32xf32> to vector<24x32xf32>
    %c1_110 = arith.constant 1 : index
    %c0_111 = arith.constant 0 : index
    %c0_112 = arith.constant 0 : index
    %257 = vector.load %arg9[%c1_110, %c0_111, %c0_112] : memref<2x1x32xf32, #tpu.memory_space<vmem>>, vector<1x1x32xf32>
    %258 = vector.shape_cast %257 : vector<1x1x32xf32> to vector<1x32xf32>
    %259 = vector.broadcast %258 : vector<1x32xf32> to vector<24x32xf32>
    %260 = arith.addf %256, %259 : vector<24x32xf32>
    %261 = vector.extract_strided_slice %219 {offsets = [24, 0], sizes = [24, 32], strides = [1, 1]} : vector<48x32xf32> to vector<24x32xf32>
    %262 = vector.extract_strided_slice %220 {offsets = [24, 0], sizes = [24, 32], strides = [1, 1]} : vector<48x32xf32> to vector<24x32xf32>
    %263 = vector.extract_strided_slice %221 {offsets = [24, 0], sizes = [24, 32], strides = [1, 1]} : vector<48x32xf32> to vector<24x32xf32>
    %264 = tpu.transpose %261, [1, 0] : vector<24x32xf32> -> vector<32x24xf32>
    %265 = vector.shape_cast %264 : vector<32x24xf32> to vector<4x8x24xf32>
    %266 = tpu.transpose %265, [0, 2, 1] : vector<4x8x24xf32> -> vector<4x24x8xf32>
    %267 = tpu.transpose %262, [1, 0] : vector<24x32xf32> -> vector<32x24xf32>
    %268 = vector.shape_cast %267 : vector<32x24xf32> to vector<4x8x24xf32>
    %269 = tpu.transpose %263, [1, 0] : vector<24x32xf32> -> vector<32x24xf32>
    %270 = vector.shape_cast %269 : vector<32x24xf32> to vector<4x8x24xf32>
    %271 = arith.truncf %266 : vector<4x24x8xf32> to vector<4x24x8xbf16>
    %272 = arith.truncf %268 : vector<4x8x24xf32> to vector<4x8x24xbf16>
    "tpu.trace_start"() <{level = 10 : i32, message = "hqd,hdk->hqk"}> : () -> ()
    %cst_113 = arith.constant dense<0.000000e+00> : vector<4x24x24xf32>
    %273 = tpu.matmul %271, %272, %cst_113 {dimension_numbers = #tpu.dot_dimension_numbers<[2], [1], [1], [2], [0, 0, 0, 1, 1, 2], [0], [0]>} : vector<4x24x8xbf16>, vector<4x8x24xbf16>, vector<4x24x24xf32> -> vector<4x24x24xf32>
    "tpu.trace_stop"() : () -> ()
    %cst_114 = arith.constant 0.353553385 : f32
    %274 = vector.broadcast %cst_114 : f32 to vector<4x24x24xf32>
    %275 = arith.mulf %273, %274 : vector<4x24x24xf32>
    %276 = vector.broadcast %11 : vector<1x1x24xf32> to vector<4x24x24xf32>
    %277 = arith.addf %275, %276 : vector<4x24x24xf32>
    %cst_115 = arith.constant dense<0xFF800000> : vector<4x24xf32>
    %278 = vector.multi_reduction <maximumf>, %277, %cst_115 [2] : vector<4x24x24xf32> to vector<4x24xf32>
    %279 = vector.shape_cast %278 : vector<4x24xf32> to vector<4x24x1xf32>
    %280 = vector.broadcast %279 : vector<4x24x1xf32> to vector<4x24x24xf32>
    %281 = arith.subf %277, %280 : vector<4x24x24xf32>
    %282 = math.exp %281 : vector<4x24x24xf32>
    %cst_116 = arith.constant dense<0.000000e+00> : vector<4x24xf32>
    %283 = vector.multi_reduction <add>, %282, %cst_116 [2] : vector<4x24x24xf32> to vector<4x24xf32>
    %284 = vector.shape_cast %283 : vector<4x24xf32> to vector<4x24x1xf32>
    %285 = tpu.reciprocal %284 {approx = true} : vector<4x24x1xf32> -> vector<4x24x1xf32>
    %286 = vector.broadcast %285 : vector<4x24x1xf32> to vector<4x24x24xf32>
    %287 = arith.mulf %282, %286 : vector<4x24x24xf32>
    %288 = arith.truncf %287 : vector<4x24x24xf32> to vector<4x24x24xbf16>
    %289 = arith.truncf %270 : vector<4x8x24xf32> to vector<4x8x24xbf16>
    "tpu.trace_start"() <{level = 10 : i32, message = "hqk,hdk->hqd"}> : () -> ()
    %cst_117 = arith.constant dense<0.000000e+00> : vector<4x24x8xf32>
    %290 = tpu.matmul %288, %289, %cst_117 {dimension_numbers = #tpu.dot_dimension_numbers<[2], [2], [1], [1], [0, 0, 0, 1, 1, 1], [0], [0]>} : vector<4x24x24xbf16>, vector<4x8x24xbf16>, vector<4x24x8xf32> -> vector<4x24x8xf32>
    "tpu.trace_stop"() : () -> ()
    %291 = arith.truncf %290 : vector<4x24x8xf32> to vector<4x24x8xbf16>
    %c1_118 = arith.constant 1 : index
    %c0_119 = arith.constant 0 : index
    %c0_120 = arith.constant 0 : index
    %c0_121 = arith.constant 0 : index
    %292 = vector.load %arg8[%c1_118, %c0_119, %c0_120, %c0_121] : memref<2x4x8x32xbf16, #tpu.memory_space<vmem>>, vector<1x4x8x32xbf16>
    %293 = vector.shape_cast %292 : vector<1x4x8x32xbf16> to vector<4x8x32xbf16>
    "tpu.trace_start"() <{level = 10 : i32, message = "hqd,hde->hqe"}> : () -> ()
    %cst_122 = arith.constant dense<0.000000e+00> : vector<4x24x32xf32>
    %294 = tpu.matmul %291, %293, %cst_122 {dimension_numbers = #tpu.dot_dimension_numbers<[2], [1], [1], [2], [0, 0, 0, 1, 1, 2], [0], [0]>} : vector<4x24x8xbf16>, vector<4x8x32xbf16>, vector<4x24x32xf32> -> vector<4x24x32xf32>
    "tpu.trace_stop"() : () -> ()
    %cst_123 = arith.constant dense<0.000000e+00> : vector<24x32xf32>
    %295 = vector.multi_reduction <add>, %294, %cst_123 [0] : vector<4x24x32xf32> to vector<24x32xf32>
    %c1_124 = arith.constant 1 : index
    %c0_125 = arith.constant 0 : index
    %c0_126 = arith.constant 0 : index
    %296 = vector.load %arg9[%c1_124, %c0_125, %c0_126] : memref<2x1x32xf32, #tpu.memory_space<vmem>>, vector<1x1x32xf32>
    %297 = vector.shape_cast %296 : vector<1x1x32xf32> to vector<1x32xf32>
    %298 = vector.broadcast %297 : vector<1x32xf32> to vector<24x32xf32>
    %299 = arith.addf %295, %298 : vector<24x32xf32>
    %300 = tpu.concatenate %260, %299 in 0 : vector<24x32xf32>, vector<24x32xf32> -> vector<48x32xf32>
    %301 = arith.addf %184, %300 : vector<48x32xf32>
    %c1_127 = arith.constant 1 : index
    %c0_128 = arith.constant 0 : index
    %c0_129 = arith.constant 0 : index
    %302 = vector.load %arg10[%c1_127, %c0_128, %c0_129] : memref<2x1x32xf32, #tpu.memory_space<vmem>>, vector<1x1x32xf32>
    %303 = vector.shape_cast %302 : vector<1x1x32xf32> to vector<1x32xf32>
    %c1_130 = arith.constant 1 : index
    %c0_131 = arith.constant 0 : index
    %c0_132 = arith.constant 0 : index
    %304 = vector.load %arg11[%c1_130, %c0_131, %c0_132] : memref<2x1x32xf32, #tpu.memory_space<vmem>>, vector<1x1x32xf32>
    %305 = vector.shape_cast %304 : vector<1x1x32xf32> to vector<1x32xf32>
    %cst_133 = arith.constant dense<0.000000e+00> : vector<48xf32>
    %306 = vector.multi_reduction <add>, %301, %cst_133 [1] : vector<48x32xf32> to vector<48xf32>
    %307 = vector.shape_cast %306 : vector<48xf32> to vector<48x1xf32>
    %cst_134 = arith.constant 3.200000e+01 : f32
    %308 = vector.broadcast %cst_134 : f32 to vector<48x1xf32>
    %309 = arith.divf %307, %308 : vector<48x1xf32>
    %310 = vector.broadcast %309 : vector<48x1xf32> to vector<48x32xf32>
    %311 = arith.subf %301, %310 : vector<48x32xf32>
    %312 = arith.mulf %311, %311 : vector<48x32xf32>
    %cst_135 = arith.constant dense<0.000000e+00> : vector<48xf32>
    %313 = vector.multi_reduction <add>, %312, %cst_135 [1] : vector<48x32xf32> to vector<48xf32>
    %314 = vector.shape_cast %313 : vector<48xf32> to vector<48x1xf32>
    %cst_136 = arith.constant 3.200000e+01 : f32
    %315 = vector.broadcast %cst_136 : f32 to vector<48x1xf32>
    %316 = arith.divf %314, %315 : vector<48x1xf32>
    %317 = vector.broadcast %309 : vector<48x1xf32> to vector<48x32xf32>
    %318 = arith.subf %301, %317 : vector<48x32xf32>
    %cst_137 = arith.constant 9.99999997E-7 : f32
    %319 = vector.broadcast %cst_137 : f32 to vector<48x1xf32>
    %320 = arith.addf %316, %319 : vector<48x1xf32>
    %321 = math.rsqrt %320 : vector<48x1xf32>
    %322 = vector.broadcast %321 : vector<48x1xf32> to vector<48x32xf32>
    %323 = arith.mulf %318, %322 : vector<48x32xf32>
    %324 = vector.broadcast %303 : vector<1x32xf32> to vector<48x32xf32>
    %325 = arith.mulf %323, %324 : vector<48x32xf32>
    %326 = vector.broadcast %305 : vector<1x32xf32> to vector<48x32xf32>
    %327 = arith.addf %325, %326 : vector<48x32xf32>
    %328 = arith.truncf %327 : vector<48x32xf32> to vector<48x32xbf16>
    %c1_138 = arith.constant 1 : index
    %c0_139 = arith.constant 0 : index
    %c0_140 = arith.constant 0 : index
    %329 = vector.load %arg12[%c1_138, %c0_139, %c0_140] : memref<2x32x128xbf16, #tpu.memory_space<vmem>>, vector<1x32x128xbf16>
    %330 = vector.shape_cast %329 : vector<1x32x128xbf16> to vector<32x128xbf16>
    %cst_141 = arith.constant dense<0.000000e+00> : vector<48x128xf32>
    %331 = tpu.matmul %328, %330, %cst_141 {dimension_numbers = #tpu.dot_dimension_numbers<[1], [0], [0], [1], [0, 0, 1, 1], [], []>} : vector<48x32xbf16>, vector<32x128xbf16>, vector<48x128xf32> -> vector<48x128xf32>
    %c1_142 = arith.constant 1 : index
    %c0_143 = arith.constant 0 : index
    %c0_144 = arith.constant 0 : index
    %332 = vector.load %arg13[%c1_142, %c0_143, %c0_144] : memref<2x1x128xf32, #tpu.memory_space<vmem>>, vector<1x1x128xf32>
    %333 = vector.shape_cast %332 : vector<1x1x128xf32> to vector<1x128xf32>
    %334 = vector.broadcast %333 : vector<1x128xf32> to vector<48x128xf32>
    %335 = arith.addf %331, %334 : vector<48x128xf32>
    %336 = arith.mulf %335, %335 : vector<48x128xf32>
    %337 = arith.mulf %335, %336 : vector<48x128xf32>
    %cst_145 = arith.constant 4.471500e-02 : f32
    %338 = vector.broadcast %cst_145 : f32 to vector<48x128xf32>
    %339 = arith.mulf %338, %337 : vector<48x128xf32>
    %340 = arith.addf %335, %339 : vector<48x128xf32>
    %cst_146 = arith.constant 0.797884583 : f32
    %341 = vector.broadcast %cst_146 : f32 to vector<48x128xf32>
    %342 = arith.mulf %341, %340 : vector<48x128xf32>
    %343 = math.tanh %342 : vector<48x128xf32>
    %cst_147 = arith.constant 1.000000e+00 : f32
    %344 = vector.broadcast %cst_147 : f32 to vector<48x128xf32>
    %345 = arith.addf %344, %343 : vector<48x128xf32>
    %cst_148 = arith.constant 5.000000e-01 : f32
    %346 = vector.broadcast %cst_148 : f32 to vector<48x128xf32>
    %347 = arith.mulf %346, %345 : vector<48x128xf32>
    %348 = arith.mulf %335, %347 : vector<48x128xf32>
    %349 = arith.truncf %348 : vector<48x128xf32> to vector<48x128xbf16>
    %c1_149 = arith.constant 1 : index
    %c0_150 = arith.constant 0 : index
    %c0_151 = arith.constant 0 : index
    %350 = vector.load %arg14[%c1_149, %c0_150, %c0_151] : memref<2x128x32xbf16, #tpu.memory_space<vmem>>, vector<1x128x32xbf16>
    %351 = vector.shape_cast %350 : vector<1x128x32xbf16> to vector<128x32xbf16>
    %cst_152 = arith.constant dense<0.000000e+00> : vector<48x32xf32>
    %352 = tpu.matmul %349, %351, %cst_152 {dimension_numbers = #tpu.dot_dimension_numbers<[1], [0], [0], [1], [0, 0, 1, 1], [], []>} : vector<48x128xbf16>, vector<128x32xbf16>, vector<48x32xf32> -> vector<48x32xf32>
    %c1_153 = arith.constant 1 : index
    %c0_154 = arith.constant 0 : index
    %c0_155 = arith.constant 0 : index
    %353 = vector.load %arg15[%c1_153, %c0_154, %c0_155] : memref<2x1x32xf32, #tpu.memory_space<vmem>>, vector<1x1x32xf32>
    %354 = vector.shape_cast %353 : vector<1x1x32xf32> to vector<1x32xf32>
    %355 = vector.broadcast %354 : vector<1x32xf32> to vector<48x32xf32>
    %356 = arith.addf %352, %355 : vector<48x32xf32>
    %357 = arith.addf %301, %356 : vector<48x32xf32>
    %c0_156 = arith.constant 0 : index
    %c0_157 = arith.constant 0 : index
    %358 = vector.load %arg16[%c0_156, %c0_157] : memref<1x32xf32, #tpu.memory_space<vmem>>, vector<1x32xf32>
    %c0_158 = arith.constant 0 : index
    %c0_159 = arith.constant 0 : index
    %359 = vector.load %arg17[%c0_158, %c0_159] : memref<1x32xf32, #tpu.memory_space<vmem>>, vector<1x32xf32>
    %cst_160 = arith.constant dense<0.000000e+00> : vector<48xf32>
    %360 = vector.multi_reduction <add>, %357, %cst_160 [1] : vector<48x32xf32> to vector<48xf32>
    %361 = vector.shape_cast %360 : vector<48xf32> to vector<48x1xf32>
    %cst_161 = arith.constant 3.200000e+01 : f32
    %362 = vector.broadcast %cst_161 : f32 to vector<48x1xf32>
    %363 = arith.divf %361, %362 : vector<48x1xf32>
    %364 = vector.broadcast %363 : vector<48x1xf32> to vector<48x32xf32>
    %365 = arith.subf %357, %364 : vector<48x32xf32>
    %366 = arith.mulf %365, %365 : vector<48x32xf32>
    %cst_162 = arith.constant dense<0.000000e+00> : vector<48xf32>
    %367 = vector.multi_reduction <add>, %366, %cst_162 [1] : vector<48x32xf32> to vector<48xf32>
    %368 = vector.shape_cast %367 : vector<48xf32> to vector<48x1xf32>
    %cst_163 = arith.constant 3.200000e+01 : f32
    %369 = vector.broadcast %cst_163 : f32 to vector<48x1xf32>
    %370 = arith.divf %368, %369 : vector<48x1xf32>
    %371 = vector.broadcast %363 : vector<48x1xf32> to vector<48x32xf32>
    %372 = arith.subf %357, %371 : vector<48x32xf32>
    %cst_164 = arith.constant 9.99999997E-7 : f32
    %373 = vector.broadcast %cst_164 : f32 to vector<48x1xf32>
    %374 = arith.addf %370, %373 : vector<48x1xf32>
    %375 = math.rsqrt %374 : vector<48x1xf32>
    %376 = vector.broadcast %375 : vector<48x1xf32> to vector<48x32xf32>
    %377 = arith.mulf %372, %376 : vector<48x32xf32>
    %378 = vector.broadcast %358 : vector<1x32xf32> to vector<48x32xf32>
    %379 = arith.mulf %377, %378 : vector<48x32xf32>
    %380 = vector.broadcast %359 : vector<1x32xf32> to vector<48x32xf32>
    %381 = arith.addf %379, %380 : vector<48x32xf32>
    %c0_165 = arith.constant 0 : index
    %c0_166 = arith.constant 0 : index
    %382 = vector.load %arg18[%c0_165, %c0_166] : memref<48x32xf32, #tpu.memory_space<vmem>>, vector<48x32xf32>
    tpu.vector_store %arg18[%c0_165, %c0_166], %381 {strides = array<i32>} : memref<48x32xf32, #tpu.memory_space<vmem>>, vector<48x32xf32>,
    return
  }
  func.func @transform_0(%arg0: i32) -> (i32, i32) {
    %c0_i32 = arith.constant 0 : i32
    %c0_i32_0 = arith.constant 0 : i32
    %c0_i32_1 = arith.constant 0 : i32
    return %c0_i32, %c0_i32_0 : i32, i32
  }
  func.func @transform_1(%arg0: i32) -> (i32, i32) {
    %c0_i32 = arith.constant 0 : i32
    %c0_i32_0 = arith.constant 0 : i32
    %c0_i32_1 = arith.constant 0 : i32
    return %c0_i32, %c0_i32_0 : i32, i32
  }
  func.func @transform_2(%arg0: i32) -> (i32, i32) {
    %c0_i32 = arith.constant 0 : i32
    %c0_i32_0 = arith.constant 0 : i32
    %c0_i32_1 = arith.constant 0 : i32
    return %c0_i32, %c0_i32_0 : i32, i32
  }
  func.func @transform_3(%arg0: i32) -> (i32, i32, i32) {
    %c0_i32 = arith.constant 0 : i32
    %c0_i32_0 = arith.constant 0 : i32
    %c0_i32_1 = arith.constant 0 : i32
    %c0_i32_2 = arith.constant 0 : i32
    return %c0_i32, %c0_i32_0, %c0_i32_1 : i32, i32, i32
  }
  func.func @transform_4(%arg0: i32) -> (i32, i32, i32) {
    %c0_i32 = arith.constant 0 : i32
    %c0_i32_0 = arith.constant 0 : i32
    %c0_i32_1 = arith.constant 0 : i32
    %c0_i32_2 = arith.constant 0 : i32
    return %c0_i32, %c0_i32_0, %c0_i32_1 : i32, i32, i32
  }
  func.func @transform_5(%arg0: i32) -> (i32, i32, i32) {
    %c0_i32 = arith.constant 0 : i32
    %c0_i32_0 = arith.constant 0 : i32
    %c0_i32_1 = arith.constant 0 : i32
    %c0_i32_2 = arith.constant 0 : i32
    return %c0_i32, %c0_i32_0, %c0_i32_1 : i32, i32, i32
  }
  func.func @transform_6(%arg0: i32) -> (i32, i32, i32) {
    %c0_i32 = arith.constant 0 : i32
    %c0_i32_0 = arith.constant 0 : i32
    %c0_i32_1 = arith.constant 0 : i32
    %c0_i32_2 = arith.constant 0 : i32
    return %c0_i32, %c0_i32_0, %c0_i32_1 : i32, i32, i32
  }
  func.func @transform_7(%arg0: i32) -> (i32, i32, i32, i32) {
    %c0_i32 = arith.constant 0 : i32
    %c0_i32_0 = arith.constant 0 : i32
    %c0_i32_1 = arith.constant 0 : i32
    %c0_i32_2 = arith.constant 0 : i32
    %c0_i32_3 = arith.constant 0 : i32
    return %c0_i32, %c0_i32_0, %c0_i32_1, %c0_i32_2 : i32, i32, i32, i32
  }
  func.func @transform_8(%arg0: i32) -> (i32, i32, i32) {
    %c0_i32 = arith.constant 0 : i32
    %c0_i32_0 = arith.constant 0 : i32
    %c0_i32_1 = arith.constant 0 : i32
    %c0_i32_2 = arith.constant 0 : i32
    return %c0_i32, %c0_i32_0, %c0_i32_1 : i32, i32, i32
  }
  func.func @transform_9(%arg0: i32) -> (i32, i32, i32) {
    %c0_i32 = arith.constant 0 : i32
    %c0_i32_0 = arith.constant 0 : i32
    %c0_i32_1 = arith.constant 0 : i32
    %c0_i32_2 = arith.constant 0 : i32
    return %c0_i32, %c0_i32_0, %c0_i32_1 : i32, i32, i32
  }
  func.func @transform_10(%arg0: i32) -> (i32, i32, i32) {
    %c0_i32 = arith.constant 0 : i32
    %c0_i32_0 = arith.constant 0 : i32
    %c0_i32_1 = arith.constant 0 : i32
    %c0_i32_2 = arith.constant 0 : i32
    return %c0_i32, %c0_i32_0, %c0_i32_1 : i32, i32, i32
  }
  func.func @transform_11(%arg0: i32) -> (i32, i32, i32) {
    %c0_i32 = arith.constant 0 : i32
    %c0_i32_0 = arith.constant 0 : i32
    %c0_i32_1 = arith.constant 0 : i32
    %c0_i32_2 = arith.constant 0 : i32
    return %c0_i32, %c0_i32_0, %c0_i32_1 : i32, i32, i32
  }
  func.func @transform_12(%arg0: i32) -> (i32, i32, i32) {
    %c0_i32 = arith.constant 0 : i32
    %c0_i32_0 = arith.constant 0 : i32
    %c0_i32_1 = arith.constant 0 : i32
    %c0_i32_2 = arith.constant 0 : i32
    return %c0_i32, %c0_i32_0, %c0_i32_1 : i32, i32, i32
  }
  func.func @transform_13(%arg0: i32) -> (i32, i32, i32) {
    %c0_i32 = arith.constant 0 : i32
    %c0_i32_0 = arith.constant 0 : i32
    %c0_i32_1 = arith.constant 0 : i32
    %c0_i32_2 = arith.constant 0 : i32
    return %c0_i32, %c0_i32_0, %c0_i32_1 : i32, i32, i32
  }
  func.func @transform_14(%arg0: i32) -> (i32, i32, i32) {
    %c0_i32 = arith.constant 0 : i32
    %c0_i32_0 = arith.constant 0 : i32
    %c0_i32_1 = arith.constant 0 : i32
    %c0_i32_2 = arith.constant 0 : i32
    return %c0_i32, %c0_i32_0, %c0_i32_1 : i32, i32, i32
  }
  func.func @transform_15(%arg0: i32) -> (i32, i32) {
    %c0_i32 = arith.constant 0 : i32
    %c0_i32_0 = arith.constant 0 : i32
    %c0_i32_1 = arith.constant 0 : i32
    return %c0_i32, %c0_i32_0 : i32, i32
  }
  func.func @transform_16(%arg0: i32) -> (i32, i32) {
    %c0_i32 = arith.constant 0 : i32
    %c0_i32_0 = arith.constant 0 : i32
    %c0_i32_1 = arith.constant 0 : i32
    return %c0_i32, %c0_i32_0 : i32, i32
  }
  func.func @transform_17(%arg0: i32) -> (i32, i32) {
    %c0_i32 = arith.constant 0 : i32
    %c0_i32_0 = arith.constant 0 : i32
    %c0_i32_1 = arith.constant 0 : i32
    return %c0_i32, %c0_i32_0 : i32, i32
  }
}

</mosaic_0001>

<bundles_post_ra>
// kernel: vit_forward_features.1
= control target key start
LH: loop header
LB: loop body
LE: loop exit
PB: predicated region body
PF: predicated region fallthrough
CT: control target
= control target key end

     0   :  { %v7419_v0 = vmov 0.0   ;;  %vm7420_vm0 = vmmov 0   ;;  %vm96_vm1 = vcmask 392192   ;;  %vm169_vm2 = vcmask 261120   ;;  %s7423_s21 = smov 64   ;;  %s9000_s1 = inlined_call_operand.vmem [shape: bf16[48,32], index: 1, kind: input, shape index: {}]   ;;  %s9001_s0 = inlined_call_operand.vmem [shape: f32[48,48], index: 0, kind: input, shape index: {}]   ;;  %s9002_s2 = inlined_call_operand.vmem [shape: f32[48,32], index: 2, kind: input, shape index: {}]   ;;  %s9003_s5 = inlined_call_operand.vmem [shape: bf16[2,32,96], index: 5, kind: input, shape index: {}]   ;;  %s9004_s3 = inlined_call_operand.vmem [shape: f32[2,1,32], index: 3, kind: input, shape index: {}]   ;;  %s9005_s4 = inlined_call_operand.vmem [shape: f32[2,1,32], index: 4, kind: input, shape index: {}]   ;;  %s9006_s6 = inlined_call_operand.vmem [shape: f32[2,1,96], index: 6, kind: input, shape index: {}]   ;;  %s9007_s7 = inlined_call_operand.vmem [shape: bf16[2,4,8,32], index: 7, kind: input, shape index: {}]   ;;  %s9008_s8 = inlined_call_operand.vmem [shape: f32[2,1,32], index: 8, kind: input, shape index: {}]   ;;  %s9009_s11 = inlined_call_operand.vmem [shape: bf16[2,32,128], index: 11, kind: input, shape index: {}]   ;;  %s9010_s9 = inlined_call_operand.vmem [shape: f32[2,1,32], index: 9, kind: input, shape index: {}]   ;;  %s9011_s10 = inlined_call_operand.vmem [shape: f32[2,1,32], index: 10, kind: input, shape index: {}]   ;;  %s9012_s13 = inlined_call_operand.vmem [shape: bf16[2,128,32], index: 13, kind: input, shape index: {}]   ;;  %s9013_s12 = inlined_call_operand.vmem [shape: f32[2,1,128], index: 12, kind: input, shape index: {}]   ;;  %s9014_s14 = inlined_call_operand.vmem [shape: f32[2,1,32], index: 14, kind: input, shape index: {}]   ;;  %s9015_s15 = inlined_call_operand.vmem [shape: f32[1,32], index: 15, kind: input, shape index: {}]   ;;  %s9016_s16 = inlined_call_operand.vmem [shape: f32[1,32], index: 16, kind: input, shape index: {}]   ;;  %s9017_s17 = inlined_call_operand.vmem [shape: f32[48,32], index: 17, kind: output, shape index: {}]  }
   0x1   :  { %9020 = sst [smem:[#allocation2_spill]] %s9000_s1  ;;  %6475 = vmatprep.subr.bf16.mxu0 %v7419_v0  ;;  %6901 = vmatprep.subr.bf16.mxu1 %v7419_v0  ;;  %v72_v13 = vld [vmem:[%s9002_s2] sm:$0xff]  ;;  %v74_v14 = vld [vmem:[%s9002_s2 + $0x10] sm:$0xff]  ;;  %v73_v17 = vld [vmem:[%s9002_s2 + $0x8] sm:$0xff]  ;;  %vm622_vm3 = vcmask 64512   ;;  %vm629_vm4 = vcmask 1043456  }
   0x2   :  { %9021 = sst [smem:[#allocation3_spill]] %s9001_s0  ;;  %s9022_s26 = sld [smem:[#allocation2_spill]]  ;;  %6481 = vmatprep.mubr.msk.bf16.mxu0 %vm7420_vm0, %v7419_v0  ;;  %6485 = vmatprep.mubr.msk.bf16.mxu1 %vm7420_vm0, %v7419_v0  ;;  %v75_v18 = vld [vmem:[%s9002_s2 + $0x18] sm:$0xff]  ;;  %v76_v48 = vld [vmem:[%s9002_s2 + $0x20] sm:$0xff]  ;;  %v77_v55 = vld [vmem:[%s9002_s2 + $0x28] sm:$0xff]  ;;  %vm876_vm6 = vcmask 195584  }
   0x3   :  { %s9023_s19 = sld [smem:[#allocation3_spill]]  ;;  %v7119_v63 = vld [vmem:[%s9003_s5] sm:$0xff]  }
   0x8   :  { %v7116_v1 = vld [vmem:[%s9022_s26] sm:$0xff]   ;;  %v7117_v2 = vld [vmem:[%s9022_s26 + $0x8] sm:$0xff]   ;;  %v7118_v3 = vld [vmem:[%s9022_s26 + $0x10] sm:$0xff]  }
   0x9   :  { %6476 = vmatpush3.bf16.msra.mxu0 %v7116_v1  ;;  %6904 = vmatpush3.bf16.msra.mxu1 %v7116_v1  ;;  %v57_v4 = vld [vmem:[%s9023_s19] sm:$0xff]  ;;  %v58_v5 = vld [vmem:[%s9023_s19 + $0x8] sm:$0xff]  ;;  %v59_v6 = vld [vmem:[%s9023_s19 + $0x10] sm:$0xff] }
   0xa   :  { %6477 = vmatprep.subr.bf16.mxu0 %v7419_v0  ;;  %6902 = vmatprep.subr.bf16.mxu1 %v7419_v0  ;;  %v60_v7 = vld [vmem:[%s9023_s19 + $0x18] sm:$0xff]  ;;  %v63_v8 = vpack.c.bf16 %v58_v5, %v57_v4  ;;  %v61_v10 = vld [vmem:[%s9023_s19 + $0x20] sm:$0xff]  ;;  %v62_v11 = vld [vmem:[%s9023_s19 + $0x28] sm:$0xff]  ;;  %s7421_s19 = smov 96  }
   0xb   :  { %v64_v9 = vpack.c.bf16 %v60_v7, %v59_v6  ;;  %v65_v12 = vpack.c.bf16 %v62_v11, %v61_v10  ;;  %v7120_v1 = vld [vmem:[%s9003_s5 + $0x8] sm:$0xff]  }
   0xd   :  { %6478 = vmatpush3.bf16.msra.mxu0 %v7117_v2  ;;  %6905 = vmatpush3.bf16.msra.mxu1 %v7117_v2 }
   0xe   :  { %6479 = vmatprep.subr.bf16.mxu0 %v7419_v0  ;;  %6903 = vmatprep.subr.bf16.mxu1 %v7419_v0 }
  0x11   :  { %6480 = vmatpush3.bf16.msra.mxu0 %v7118_v3  ;;  %6906 = vmatpush3.bf16.msra.mxu1 %v7118_v3 }
  0x12   :  { %6493 = vmatprep.subr.bf16.mxu1 %v7419_v0 }
  0x14   :  { %6482 = vmatmul.mubr.msk.bf16.vlgmr.msra.gmra.mrb[0].mxu0 %vm96_vm1, %v63_v8  ;;  %6486 = vmatmul.mubr.msk.bf16.vlgmr.msra.gmra.mrb[0].mxu1 %vm96_vm1, %v64_v9 }
  0x15   :  { %6489 = vmatprep.mubr.msk.bf16.mxu1 %vm7420_vm0, %v7419_v0  ;;  %6494 = vmatpush3.bf16.msra.mxu1 %v7119_v63 }
  0x16   :  { %6495 = vmatprep.subr.bf16.mxu1 %v7419_v0 }
  0x19   :  { %6496 = vmatpush3.bf16.msra.mxu1 %v7120_v1 }
  0x1c   :  { %6490 = vmatmul.mubr.msk.bf16.gmra.mrb[4].mxu1 %vm96_vm1, %v65_v12 }
  0x1d   :  { %6497 = vmatprep.mubr.msk.bf16.mxu1 %vm7420_vm0, %v7419_v0 }
  0xe7   :  { %v140_v15 = vpop.f32.mrb[0].mxu0  ;;  %v148_v16 = vpop.f32.mrb[0].mxu1 }
  0xe8   :  { %v7568_v19 = vadd.f32 %v140_v15, %v72_v13  ;;  %v7570_v20 = vadd.f32 %v148_v16, %v74_v14  ;;  %v6483_v21 = vpop.f32.mrb[1].mxu0  ;;  %v6487_v22 = vpop.f32.mrb[1].mxu1 }
  0xe9   :  { %v143_v23 = vpop.f32.mrb[2].mxu0  ;;  %v151_v24 = vpop.f32.mrb[2].mxu1 }
  0xea   :  { %v7572_v25 = vadd.f32 %v143_v23, %v73_v17  ;;  %v6484_v26 = vpop.f32.mrb[3].mxu0  ;;  %v176_v27 = vsel %vm169_vm2, %v7570_v20, 0.0  ;;  %v7576_v28 = vadd.f32 %v151_v24, %v75_v18  ;;  %v170_v29 = vsel %vm169_vm2, %v7568_v19, 0.0  ;;  %v6488_v30 = vpop.f32.mrb[3].mxu1 }
  0xeb   :  { %177 = vadd.xlane.f32.xlu1 %v176_v27  ;;  %171 = vadd.xlane.f32.xlu0 %v170_v29  ;;  %v6090_v27 = vld [vmem:[%s9004_s3] ss:$0 sm:$0xff] }
  0xec   :  { %v179_v31 = vsel %vm169_vm2, %v7576_v28, 0.0  ;;  %v173_v32 = vsel %vm169_vm2, %v7572_v25, 0.0 }
  0xef   :  { %180 = vadd.xlane.f32.xlu1 %v179_v31  ;;  %174 = vadd.xlane.f32.xlu0 %v173_v32  ;;  %v156_v33 = vpop.f32.mrb[4].mxu1 }
  0xf0   :  { %v6491_v34 = vpop.f32.mrb[5].mxu1  ;;  %v7598_v53 = vadd.f32 %v156_v33, %v76_v48 }
  0xf1   :  { %v159_v35 = vpop.f32.mrb[6].mxu1 }
  0xf2   :  { %v6492_v36 = vpop.f32.mrb[7].mxu1  ;;  %v7607_v59 = vadd.f32 %v159_v35, %v77_v55  ;;  %v182_v60 = vsel %vm169_vm2, %v7598_v53, 0.0  ;;  %v6091_v35 = vld [vmem:[%s9005_s4] ss:$0 sm:$0xff] }
  0xf4   :  { %v185_v62 = vsel %vm169_vm2, %v7607_v59, 0.0 }
 0x178   :  { %v178_v37 = vpop.xlane.xlu1 %177  ;;  %v172_v38 = vpop.xlane.xlu0 %171 }
 0x179   :  { %v191_v39 = vmul.f32 0.03125, %v178_v37  ;;  %v189_v40 = vmul.f32 0.03125, %v172_v38 }
 0x17b   :  { %v7585_v41 = vsub.f32 %v7570_v20, %v191_v39  ;;  %v195_v42 = vsub.f32 %v7568_v19, %v189_v40 }
 0x17c   :  { %v181_v43 = vpop.xlane.xlu1 %180  ;;  %v175_v44 = vpop.xlane.xlu0 %174 }
 0x17d   :  { %v192_v45 = vmul.f32 0.03125, %v181_v43  ;;  %v190_v46 = vmul.f32 0.03125, %v175_v44  ;;  %v201_v47 = vmul.f32 %v195_v42, %v195_v42  ;;  %v203_v52 = vmul.f32 %v7585_v41, %v7585_v41 }
 0x17f   :  { %v7592_v49 = vsub.f32 %v7576_v28, %v192_v45  ;;  %v196_v50 = vsub.f32 %v7572_v25, %v190_v46  ;;  %v207_v51 = vsel %vm169_vm2, %v201_v47, 0.0  ;;  %v213_v56 = vsel %vm169_vm2, %v203_v52, 0.0 }
 0x180   :  { %208 = vadd.xlane.f32.xlu0 %v207_v51 }
 0x181   :  { %v202_v54 = vmul.f32 %v196_v50, %v196_v50  ;;  %v204_v58 = vmul.f32 %v7592_v49, %v7592_v49 }
 0x183   :  { %v210_v57 = vsel %vm169_vm2, %v202_v54, 0.0  ;;  %v216_v61 = vsel %vm169_vm2, %v204_v58, 0.0 }
 0x184   :  { %214 = vadd.xlane.f32.xlu0 %v213_v56  ;;  %211 = vadd.xlane.f32.xlu1 %v210_v57 }
 0x188   :  { %183 = vadd.xlane.f32.xlu0 %v182_v60  ;;  %217 = vadd.xlane.f32.xlu1 %v216_v61 }
 0x18c   :  { %186 = vadd.xlane.f32.xlu1 %v185_v62 }
 0x20d   :  { %v209_v2 = vpop.xlane.xlu0 %208 }
 0x20e   :  { %v225_v3 = vmul.f32 0.03125, %v209_v2  ;;  %v7643_v2 = vld [vmem:[%s9006_s6] ss:$0 sm:$0xff] }
 0x210   :  { %v231_v4 = vadd.f32 1e-06, %v225_v3 }
 0x211   :  { %v212_v5 = vpop.xlane.xlu1 %211  ;;  %v215_v6 = vpop.xlane.xlu0 %214 }
 0x212   :  { %7143 = vrsqrt.f32 %v231_v4  ;;  %v226_v7 = vmul.f32 0.03125, %v212_v5  ;;  %v227_v8 = vmul.f32 0.03125, %v215_v6 }
 0x214   :  { %v232_v9 = vadd.f32 1e-06, %v226_v7  ;;  %v233_v10 = vadd.f32 1e-06, %v227_v8 }
 0x215   :  { %v218_v11 = vpop.xlane.xlu1 %217  ;;  %v184_v12 = vpop.xlane.xlu0 %183 }
 0x216   :  { %7145 = vrsqrt.f32 %v232_v9  ;;  %v228_v13 = vmul.f32 0.03125, %v218_v11  ;;  %v193_v14 = vmul.f32 0.03125, %v184_v12 }
 0x217   :  { %7147 = vrsqrt.f32 %v233_v10 }
 0x218   :  { %v234_v15 = vadd.f32 1e-06, %v228_v13  ;;  %v199_v16 = vsub.f32 %v7598_v53, %v193_v14 }
 0x219   :  { %v187_v17 = vpop.xlane.xlu1 %186 }
 0x21a   :  { %7149 = vrsqrt.f32 %v234_v15  ;;  %v194_v18 = vmul.f32 0.03125, %v187_v17  ;;  %v205_v21 = vmul.f32 %v199_v16, %v199_v16 }
 0x21c   :  { %v7144_v22 = vpop.eup %7143  ;;  %v200_v23 = vsub.f32 %v7607_v59, %v194_v18  ;;  %v219_v24 = vsel %vm169_vm2, %v205_v21, 0.0 }
 0x21d   :  { %v243_v26 = vmul.f32 %v7144_v22, %v195_v42  ;;  %220 = vadd.xlane.f32.xlu0 %v219_v24 }
 0x21e   :  { %v206_v29 = vmul.f32 %v200_v23, %v200_v23 }
 0x21f   :  { %v255_v32 = vmul.f32 %v6090_v27, %v243_v26 }
 0x220   :  { %v7146_v30 = vpop.eup %7145  ;;  %v222_v31 = vsel %vm169_vm2, %v206_v29, 0.0 }
 0x221   :  { %v244_v33 = vmul.f32 %v7146_v30, %v196_v50  ;;  %223 = vadd.xlane.f32.xlu1 %v222_v31  ;;  %v7148_v34 = vpop.eup %7147  ;;  %v267_v38 = vadd.f32 %v6091_v35, %v255_v32 }
 0x222   :  { %v245_v40 = vmul.f32 %v7148_v34, %v7585_v41 }
 0x223   :  { %v256_v36 = vmul.f32 %v6090_v27, %v244_v33 }
 0x224   :  { %v7150_v37 = vpop.eup %7149  ;;  %v257_v45 = vmul.f32 %v6090_v27, %v245_v40 }
 0x225   :  { %v268_v39 = vadd.f32 %v6091_v35, %v256_v36  ;;  %v246_v42 = vmul.f32 %v7150_v37, %v7592_v49 }
 0x226   :  { %v269_v47 = vadd.f32 %v6091_v35, %v257_v45 }
 0x227   :  { %v273_v43 = vpack.c.bf16 %v268_v39, %v267_v38  ;;  %v258_v44 = vmul.f32 %v6090_v27, %v246_v42 }
 0x229   :  { %6498 = vmatmul.mubr.msk.bf16.vlgmr.msra.gmra.mrb[8].mxu1 %vm169_vm2, %v273_v43  ;;  %v270_v46 = vadd.f32 %v6091_v35, %v258_v44 }
 0x22a   :  { %6501 = vmatprep.mubr.msk.bf16.mxu1 %vm7420_vm0, %v7419_v0 }
 0x22b   :  { %v274_v48 = vpack.c.bf16 %v270_v46, %v269_v47 }
 0x231   :  { %6502 = vmatmul.mubr.msk.bf16.gmra.mrb[12].mxu1 %vm169_vm2, %v274_v48 }
 0x232   :  { %6505 = vmatprep.mubr.msk.bf16.mxu1 %vm7420_vm0, %v7419_v0 }
 0x2aa   :  { %v221_v50 = vpop.xlane.xlu0 %220 }
 0x2ab   :  { %v229_v41 = vmul.f32 0.03125, %v221_v50 }
 0x2ad   :  { %v235_v51 = vadd.f32 1e-06, %v229_v41 }
 0x2ae   :  { %v224_v49 = vpop.xlane.xlu1 %223 }
 0x2af   :  { %7151 = vrsqrt.f32 %v235_v51  ;;  %v230_v52 = vmul.f32 0.03125, %v224_v49 }
 0x2b1   :  { %v236_v54 = vadd.f32 1e-06, %v230_v52 }
 0x2b3   :  { %7153 = vrsqrt.f32 %v236_v54 }
 0x2b9   :  { %v7152_v55 = vpop.eup %7151 }
 0x2ba   :  { %v247_v56 = vmul.f32 %v7152_v55, %v199_v16 }
 0x2bc   :  { %v259_v60 = vmul.f32 %v6090_v27, %v247_v56 }
 0x2bd   :  { %v7154_v57 = vpop.eup %7153 }
 0x2be   :  { %v248_v58 = vmul.f32 %v7154_v57, %v200_v23  ;;  %v271_v62 = vadd.f32 %v6091_v35, %v259_v60 }
 0x2c0   :  { %v260_v61 = vmul.f32 %v6090_v27, %v248_v58 }
 0x2c2   :  { %v272_v63 = vadd.f32 %v6091_v35, %v260_v61 }
 0x2c4   :  { %v275_v1 = vpack.c.bf16 %v272_v63, %v271_v62 }
 0x2c6   :  { %6506 = vmatmul.mubr.msk.bf16.gmra.mrb[16].mxu1 %vm169_vm2, %v275_v1 }
 0x2fc   :  { %v342_v3 = vpop.f32.mrb[8].mxu1 }
 0x2fd   :  { %v7646_v4 = vadd.f32 %v7643_v2, %v342_v3  ;;  %v6499_v5 = vpop.f32.mrb[9].mxu1 }
 0x2fe   :  { %v345_v6 = vpop.f32.mrb[10].mxu1 }
 0x2ff   :  { %v7649_v7 = vadd.f32 %v7643_v2, %v345_v6  ;;  %v6500_v8 = vpop.f32.mrb[11].mxu1  ;;  %528 = vrot.lane.b32.xlu0 %v7646_v4, %s7421_s19 }
 0x301   :  { %530 = vrot.lane.b32.xlu1 %v7649_v7, %s7421_s19  ;;  %v6994_v9 = vpack.i.bf16 %v7649_v7, %v7646_v4 }
 0x304   :  { %v350_v10 = vpop.f32.mrb[12].mxu1 }
 0x305   :  { %v7658_v11 = vadd.f32 %v7643_v2, %v350_v10  ;;  %v6503_v12 = vpop.f32.mrb[13].mxu1 }
 0x306   :  { %v7660_v13 = vpop.f32.mrb[14].mxu1 }
 0x307   :  { %532 = vrot.lane.b32.xlu1 %v7658_v11, %s7421_s19  ;;  %v6504_v14 = vpop.f32.mrb[15].mxu1 }
 0x330   :  { %365 = vxpose.xlu1.b32.start [1/3] (short) (narrow) %v7646_v4, 32 }
 0x334   :  { %366 = vxpose.xlu1.b32.cont [2/3] (short) (narrow) %v7649_v7, 32 }
 0x338   :  { %367 = vxpose.xlu1.b32.end [3/3] (short) (narrow) %v7658_v11, 32 }
 0x371   :  { %v529_v27 = vpop.permute.xlu0 %528 }
 0x373   :  { %v531_v21 = vpop.permute.xlu1 %530 }
 0x379   :  { %v533_v22 = vpop.permute.xlu1 %532 }
 0x399   :  { %v7667_v15 = vpop.f32.mrb[16].mxu1 }
 0x39a   :  { %v6507_v16 = vpop.f32.mrb[17].mxu1 }
 0x39b   :  { %v7669_v17 = vpop.f32.mrb[18].mxu1  ;;  %v163_v16 = vlaneseq }
 0x39c   :  { %v6508_v18 = vpop.f32.mrb[19].mxu1 }
 0x39d   :  { %v164_v18 = vand.u32 127, %v163_v16 }
 0x39f   :  { %vm165_vm5 = vcmp.lt.s32.totalorder %v164_v18, 17 }
 0x3b0   :  { %v381_v23 = vpop.trf.xlu1 }
 0x3b4   :  { %v382_v24 = vpop.trf.xlu1 }
 0x3b5   :  { %v6960_v26 = vpack.i.bf16 %v382_v24, %v381_v23 }
 0x3b7   :  { %6961 = vxpose.xlu0.b32.start.end [1/1] (short) (narrow) %v6960_v26, 24 }
 0x3b8   :  { %v383_v29 = vpop.trf.xlu1 }
 0x3bc   :  { %v384_v30 = vpop.trf.xlu1 }
 0x3bd   :  { %v6977_v31 = vpack.i.bf16 %v384_v30, %v383_v29 }
 0x3c0   :  { %537 = vxpose.xlu0.b32.start [1/3] (short) (narrow) %v529_v27, 32 }
 0x3c4   :  { %538 = vxpose.xlu0.b32.cont [2/3] (short) (narrow) %v531_v21, 32 }
 0x3c8   :  { %539 = vxpose.xlu0.b32.end [3/3] (short) (narrow) %v533_v22, 32  ;;  %v7422_v22 = vmov -1e+30  }
 0x3c9   :  { %v7687_v23 = vsel %vm165_vm5, 0.0, %v7422_v22 }
 0x3cd   :  { %6978 = vxpose.xlu0.b32.start.end [1/1] (short) (narrow) %v6977_v31, 24 }
 0x437   :  { %v6962_v32 = vpop.trf.xlu0 }
 0x438   :  { %v6966_v33 = vunpack.i.h.bf16 %v6962_v32  ;;  %v6963_v34 = vunpack.i.l.bf16 %v6962_v32 }
 0x43b   :  { %v6967_v35 = vpop.trf.xlu0 }
 0x43c   :  { %v6971_v36 = vunpack.i.h.bf16 %v6967_v35  ;;  %v6968_v37 = vunpack.i.l.bf16 %v6967_v35 }
 0x43e   :  { %v610_v38 = vpack.c.bf16 %v6968_v37, %v6963_v34  ;;  %v612_v39 = vpack.c.bf16 %v6971_v36, %v6966_v33 }
 0x43f   :  { %v6972_v40 = vpop.trf.xlu0 }
 0x440   :  { %6511 = vmatprep.mubr.msk.bf16.mxu1 %vm622_vm3, %v610_v38  ;;  %6517 = vmatprep.mubr.msk.bf16.mxu0 %vm622_vm3, %v612_v39  ;;  %v6973_v43 = vunpack.i.l.bf16 %v6972_v40  ;;  %v6976_v47 = vunpack.i.h.bf16 %v6972_v40 }
 0x442   :  { %v611_v48 = vpack.c.bf16 %v6973_v43, %v6973_v43  ;;  %v613_v49 = vpack.c.bf16 %v6976_v47, %v6976_v47 }
 0x443   :  { %v553_v42 = vpop.trf.xlu0 }
 0x444   :  { %v618_v44 = vpack.c.bf16 %v553_v42, %v553_v42 }
 0x446   :  { %v631_v45 = vsel %vm629_vm4, %v618_v44, 0  ;;  %6907 = vmatprep.subr.msk.bf16.mxu1 %vm629_vm4, %v618_v44 }
 0x447   :  { %6510 = vmatpush3.bf16.msra.mxu1 %v631_v45  ;;  %v554_v46 = vpop.trf.xlu0 }
 0x448   :  { %v619_v50 = vpack.c.bf16 %v554_v46, %v554_v46 }
 0x44a   :  { %v688_v41 = vsel %vm629_vm4, %v619_v50, 0  ;;  %6512 = vmatmul.mubr.msk.bf16.vlgmr.msra.gmra.mrb[20].mxu1 %vm622_vm3, %v611_v48  ;;  %6908 = vmatprep.subr.msk.bf16.mxu0 %vm629_vm4, %v619_v50 }
 0x44b   :  { %6516 = vmatpush3.bf16.msra.mxu0 %v688_v41  ;;  %v555_v51 = vpop.trf.xlu0 }
 0x44c   :  { %v620_v52 = vpack.c.bf16 %v555_v51, %v555_v51 }
 0x44e   :  { %6518 = vmatmul.mubr.msk.bf16.vlgmr.msra.gmra.mrb[4].mxu0 %vm622_vm3, %v613_v49  ;;  %6909 = vmatprep.subr.msk.bf16.mxu1 %vm629_vm4, %v620_v52  ;;  %v745_v54 = vsel %vm629_vm4, %v620_v52, 0 }
 0x44f   :  { %v556_v55 = vpop.trf.xlu0  ;;  %6522 = vmatpush3.bf16.msra.mxu1 %v745_v54 }
 0x450   :  { %v621_v56 = vpack.c.bf16 %v556_v55, %v556_v55 }
 0x452   :  { %v802_v57 = vsel %vm629_vm4, %v621_v56, 0  ;;  %6910 = vmatprep.subr.msk.bf16.mxu0 %vm629_vm4, %v621_v56 }
 0x453   :  { %v6979_v58 = vpop.trf.xlu0  ;;  %6528 = vmatpush3.bf16.msra.mxu0 %v802_v57 }
 0x454   :  { %v6983_v60 = vunpack.i.h.bf16 %v6979_v58  ;;  %v6980_v61 = vunpack.i.l.bf16 %v6979_v58 }
 0x457   :  { %v6984_v62 = vpop.trf.xlu0 }
 0x458   :  { %v6988_v63 = vunpack.i.h.bf16 %v6984_v62  ;;  %v6985_v1 = vunpack.i.l.bf16 %v6984_v62 }
 0x45a   :  { %v614_v3 = vpack.c.bf16 %v6985_v1, %v6980_v61  ;;  %v616_v5 = vpack.c.bf16 %v6988_v63, %v6983_v60 }
 0x45b   :  { %v6989_v6 = vpop.trf.xlu0 }
 0x45c   :  { %v6993_v8 = vunpack.i.h.bf16 %v6989_v6  ;;  %v6990_v10 = vunpack.i.l.bf16 %v6989_v6  ;;  %6523 = vmatprep.mubr.msk.bf16.mxu1 %vm622_vm3, %v614_v3  ;;  %6529 = vmatprep.mubr.msk.bf16.mxu0 %vm622_vm3, %v616_v5 }
 0x45e   :  { %v617_v12 = vpack.c.bf16 %v6993_v8, %v6993_v8  ;;  %v615_v14 = vpack.c.bf16 %v6990_v10, %v6990_v10 }
 0x460   :  { %6524 = vmatmul.mubr.msk.bf16.vlgmr.msra.gmra.mrb[24].mxu1 %vm622_vm3, %v615_v14  ;;  %6530 = vmatmul.mubr.msk.bf16.vlgmr.msra.gmra.mrb[8].mxu0 %vm622_vm3, %v617_v12 }
 0x51d   :  { %v6513_v21 = vpop.f32.mrb[20].mxu1 }
 0x51e   :  { %v854_v24 = vmul.f32 0.35355338, %v6513_v21  ;;  %v667_v26 = vpop.f32.mrb[21].mxu1 }
 0x51f   :  { %v852_v27 = vmul.f32 0.35355338, %v667_v26  ;;  %v6514_v29 = vpop.f32.mrb[22].mxu1 }
 0x520   :  { %v670_v30 = vpop.f32.mrb[23].mxu1  ;;  %v7690_v31 = vadd.f32 %v854_v24, %v7687_v23 }
 0x521   :  { %v853_v32 = vmul.f32 0.35355338, %v670_v30  ;;  %v6519_v33 = vpop.f32.mrb[4].mxu0  ;;  %v7695_v37 = vadd.f32 %v852_v27, %v7687_v23 }
 0x522   :  { %v857_v34 = vmul.f32 0.35355338, %v6519_v33  ;;  %v724_v35 = vpop.f32.mrb[5].mxu0  ;;  %v883_v36 = vsel %vm876_vm6, %v7690_v31, -inf }
 0x523   :  { %884 = vmax.xlane.f32.xlu1 %v883_v36  ;;  %v6520_v38 = vpop.f32.mrb[6].mxu0  ;;  %v865_v39 = vadd.f32 %v853_v32, %v7687_v23  ;;  %v855_v43 = vmul.f32 0.35355338, %v724_v35  ;;  %v877_v44 = vsel %vm876_vm6, %v7695_v37, -inf }
 0x524   :  { %v727_v40 = vpop.f32.mrb[7].mxu0  ;;  %v869_v45 = vadd.f32 %v857_v34, %v7687_v23 }
 0x525   :  { %v880_v42 = vsel %vm876_vm6, %v865_v39, -inf  ;;  %v856_v46 = vmul.f32 0.35355338, %v727_v40  ;;  %v867_v48 = vadd.f32 %v855_v43, %v7687_v23 }
 0x526   :  { %881 = vmax.xlane.f32.xlu0 %v880_v42  ;;  %v892_v47 = vsel %vm876_vm6, %v869_v45, -inf }
 0x527   :  { %878 = vmax.xlane.f32.xlu1 %v877_v44  ;;  %v886_v50 = vsel %vm876_vm6, %v867_v48, -inf  ;;  %v7706_v41 = vadd.f32 %v856_v46, %v7687_v23 }
 0x529   :  { %v889_v51 = vsel %vm876_vm6, %v7706_v41, -inf }
 0x52b   :  { %893 = vmax.xlane.f32.xlu1 %v892_v47 }
 0x52f   :  { %887 = vmax.xlane.f32.xlu1 %v886_v50 }
 0x533   :  { %v6525_v49 = vpop.f32.mrb[24].mxu1  ;;  %890 = vmax.xlane.f32.xlu1 %v889_v51  ;;  %v6531_v52 = vpop.f32.mrb[8].mxu0 }
 0x534   :  { %v860_v54 = vmul.f32 0.35355338, %v6525_v49  ;;  %v781_v55 = vpop.f32.mrb[25].mxu1  ;;  %v838_v56 = vpop.f32.mrb[9].mxu0  ;;  %v863_v12 = vmul.f32 0.35355338, %v6531_v52 }
 0x535   :  { %v858_v57 = vmul.f32 0.35355338, %v781_v55  ;;  %v6526_v58 = vpop.f32.mrb[26].mxu1  ;;  %v6532_v60 = vpop.f32.mrb[10].mxu0  ;;  %v861_v1 = vmul.f32 0.35355338, %v838_v56 }
 0x536   :  { %v784_v61 = vpop.f32.mrb[27].mxu1  ;;  %v841_v62 = vpop.f32.mrb[11].mxu0  ;;  %v872_v63 = vadd.f32 %v860_v54, %v7687_v23  ;;  %v7731_v24 = vadd.f32 %v863_v12, %v7687_v23 }
 0x537   :  { %v859_v3 = vmul.f32 0.35355338, %v784_v61  ;;  %v862_v5 = vmul.f32 0.35355338, %v841_v62  ;;  %v7713_v8 = vadd.f32 %v858_v57, %v7687_v23  ;;  %v7721_v16 = vadd.f32 %v861_v1, %v7687_v23 }
 0x538   :  { %v901_v6 = vsel %vm876_vm6, %v872_v63, -inf  ;;  %v910_v27 = vsel %vm876_vm6, %v7731_v24, -inf }
 0x539   :  { %902 = vmax.xlane.f32.xlu0 %v901_v6  ;;  %v7716_v10 = vadd.f32 %v859_v3, %v7687_v23  ;;  %v895_v18 = vsel %vm876_vm6, %v7713_v8, -inf  ;;  %v7726_v21 = vadd.f32 %v862_v5, %v7687_v23  ;;  %v904_v22 = vsel %vm876_vm6, %v7721_v16, -inf }
 0x53b   :  { %v898_v14 = vsel %vm876_vm6, %v7716_v10, -inf  ;;  %v907_v26 = vsel %vm876_vm6, %v7726_v21, -inf }
 0x53c   :  { %899 = vmax.xlane.f32.xlu1 %v898_v14 }
 0x53d   :  { %896 = vmax.xlane.f32.xlu0 %v895_v18 }
 0x540   :  { %905 = vmax.xlane.f32.xlu1 %v904_v22 }
 0x541   :  { %908 = vmax.xlane.f32.xlu0 %v907_v26 }
 0x544   :  { %911 = vmax.xlane.f32.xlu1 %v910_v27 }
 0x555   :  { %573 = vrot.lane.b32.xlu1 %v7658_v11, %s7423_s21 }
 0x557   :  { %6995 = vrot.lane.b32.xlu0 %v6994_v9, %s7423_s21 }
 0x5b0   :  { %v885_v29 = vpop.xlane.xlu1 %884 }
 0x5b1   :  { %v915_v30 = vsub.f32 %v7690_v31, %v885_v29 }
 0x5b3   :  { %v929_v32 = vmul.f32 1.442695, %v915_v30  ;;  %v882_v33 = vpop.xlane.xlu0 %881 }
 0x5b4   :  { %v914_v34 = vsub.f32 %v865_v39, %v882_v33  ;;  %v879_v35 = vpop.xlane.xlu1 %878 }
 0x5b5   :  { %7155 = vpow2.f32 %v929_v32  ;;  %v913_v36 = vsub.f32 %v7695_v37, %v879_v35 }
 0x5b6   :  { %v927_v38 = vmul.f32 1.442695, %v914_v34 }
 0x5b7   :  { %v925_v40 = vmul.f32 1.442695, %v913_v36 }
 0x5b8   :  { %7157 = vpow2.f32 %v927_v38  ;;  %v894_v42 = vpop.xlane.xlu1 %893 }
 0x5b9   :  { %7159 = vpow2.f32 %v925_v40  ;;  %v918_v11 = vsub.f32 %v869_v45, %v894_v42  ;;  %v7801_v40 = vadd.f32 %v7643_v2, %v7660_v13  ;;  %v7807_v42 = vadd.f32 %v7643_v2, %v7667_v15 }
 0x5bb   :  { %v935_v43 = vmul.f32 1.442695, %v918_v11  ;;  %v7813_v11 = vadd.f32 %v7643_v2, %v7669_v17 }
 0x5bc   :  { %v888_v44 = vpop.xlane.xlu1 %887 }
 0x5bd   :  { %7161 = vpow2.f32 %v935_v43  ;;  %v916_v4 = vsub.f32 %v867_v48, %v888_v44 }
 0x5bf   :  { %v7745_v7 = vpop.eup %7155  ;;  %v931_v9 = vmul.f32 1.442695, %v916_v4 }
 0x5c0   :  { %v891_v31 = vpop.xlane.xlu1 %890  ;;  %v955_v39 = vsel %vm876_vm6, %v7745_v7, 0.0 }
 0x5c1   :  { %7163 = vpow2.f32 %v931_v9  ;;  %v917_v37 = vsub.f32 %v7706_v41, %v891_v31  ;;  %956 = vadd.xlane.f32.xlu0 %v955_v39 }
 0x5c2   :  { %v7750_v46 = vpop.eup %7157 }
 0x5c3   :  { %v7752_v47 = vpop.eup %7159  ;;  %v933_v45 = vmul.f32 1.442695, %v917_v37  ;;  %v952_v50 = vsel %vm876_vm6, %v7750_v46, 0.0 }
 0x5c4   :  { %v949_v48 = vsel %vm876_vm6, %v7752_v47, 0.0 }
 0x5c5   :  { %7165 = vpow2.f32 %v933_v45  ;;  %950 = vadd.xlane.f32.xlu1 %v949_v48  ;;  %953 = vadd.xlane.f32.xlu0 %v952_v50 }
 0x5c6   :  { %v903_v51 = vpop.xlane.xlu0 %902 }
 0x5c7   :  { %v7758_v49 = vpop.eup %7161  ;;  %v921_v52 = vsub.f32 %v872_v63, %v903_v51 }
 0x5c8   :  { %v964_v41 = vsel %vm876_vm6, %v7758_v49, 0.0 }
 0x5c9   :  { %v941_v54 = vmul.f32 1.442695, %v921_v52  ;;  %v900_v55 = vpop.xlane.xlu1 %899  ;;  %965 = vadd.xlane.f32.xlu1 %v964_v41 }
 0x5ca   :  { %v920_v56 = vsub.f32 %v7716_v10, %v900_v55  ;;  %v897_v57 = vpop.xlane.xlu0 %896 }
 0x5cb   :  { %v7763_v58 = vpop.eup %7163  ;;  %7167 = vpow2.f32 %v941_v54  ;;  %v919_v60 = vsub.f32 %v7713_v8, %v897_v57 }
 0x5cc   :  { %v939_v61 = vmul.f32 1.442695, %v920_v56  ;;  %v958_v62 = vsel %vm876_vm6, %v7763_v58, 0.0 }
 0x5cd   :  { %v937_v1 = vmul.f32 1.442695, %v919_v60  ;;  %959 = vadd.xlane.f32.xlu1 %v958_v62  ;;  %v906_v63 = vpop.xlane.xlu1 %905 }
 0x5ce   :  { %7169 = vpow2.f32 %v939_v61  ;;  %v922_v3 = vsub.f32 %v7721_v16, %v906_v63  ;;  %v909_v5 = vpop.xlane.xlu0 %908 }
 0x5cf   :  { %v7769_v6 = vpop.eup %7165  ;;  %7171 = vpow2.f32 %v937_v1  ;;  %v923_v10 = vsub.f32 %v7726_v21, %v909_v5 }
 0x5d0   :  { %v943_v12 = vmul.f32 1.442695, %v922_v3  ;;  %v961_v8 = vsel %vm876_vm6, %v7769_v6, 0.0 }
 0x5d1   :  { %v945_v14 = vmul.f32 1.442695, %v923_v10  ;;  %v912_v18 = vpop.xlane.xlu1 %911  ;;  %962 = vadd.xlane.f32.xlu0 %v961_v8 }
 0x5d2   :  { %7173 = vpow2.f32 %v943_v12  ;;  %v924_v22 = vsub.f32 %v7731_v24, %v912_v18  ;;  %v6996_v43 = vpop.permute.xlu0 %6995 }
 0x5d3   :  { %7175 = vpow2.f32 %v945_v14  ;;  %v6997_v13 = vunpack.i.l.bf16 %v6996_v43  ;;  %v6998_v44 = vunpack.i.h.bf16 %v6996_v43 }
 0x5d4   :  { %v947_v26 = vmul.f32 1.442695, %v924_v22 }
 0x5d5   :  { %v7775_v27 = vpop.eup %7167  ;;  %v574_v4 = vpop.permute.xlu1 %573 }
 0x5d6   :  { %7177 = vpow2.f32 %v947_v26  ;;  %v973_v16 = vsel %vm876_vm6, %v7775_v27, 0.0 }
 0x5d7   :  { %974 = vadd.xlane.f32.xlu0 %v973_v16 }
 0x5d8   :  { %v7779_v21 = vpop.eup %7169 }
 0x5d9   :  { %v7781_v29 = vpop.eup %7171  ;;  %v970_v30 = vsel %vm876_vm6, %v7779_v21, 0.0 }
 0x5da   :  { %971 = vadd.xlane.f32.xlu1 %v970_v30  ;;  %v967_v24 = vsel %vm876_vm6, %v7781_v29, 0.0 }
 0x5db   :  { %968 = vadd.xlane.f32.xlu0 %v967_v24 }
 0x5dc   :  { %v7787_v32 = vpop.eup %7173 }
 0x5dd   :  { %v7789_v33 = vpop.eup %7175  ;;  %v976_v34 = vsel %vm876_vm6, %v7787_v32, 0.0 }
 0x5de   :  { %977 = vadd.xlane.f32.xlu1 %v976_v34  ;;  %v979_v35 = vsel %vm876_vm6, %v7789_v33, 0.0 }
 0x5df   :  { %980 = vadd.xlane.f32.xlu0 %v979_v35 }
 0x5e0   :  { %v7795_v36 = vpop.eup %7177 }
 0x5e1   :  { %v982_v38 = vsel %vm876_vm6, %v7795_v36, 0.0 }
 0x5e2   :  { %983 = vadd.xlane.f32.xlu1 %v982_v38 }
 0x5f3   :  { %1683 = vrot.lane.b32.xlu1 %v7801_v40, %s7421_s19 }
 0x5f7   :  { %1685 = vrot.lane.b32.xlu1 %v7807_v42, %s7421_s19 }
 0x5fb   :  { %1687 = vrot.lane.b32.xlu1 %v7813_v11, %s7421_s19 }
 0x60c   :  { %578 = vxpose.xlu0.b32.start [1/3] (short) (narrow) %v6997_v13, 32 }
 0x610   :  { %579 = vxpose.xlu0.b32.cont [2/3] (short) (narrow) %v6998_v44, 32 }
 0x614   :  { %580 = vxpose.xlu0.b32.end [3/3] (short) (narrow) %v574_v4, 32 }
 0x624   :  { %1520 = vxpose.xlu1.b32.start [1/3] (short) (narrow) %v7801_v40, 32 }
 0x628   :  { %1521 = vxpose.xlu1.b32.cont [2/3] (short) (narrow) %v7807_v42, 32 }
 0x62c   :  { %1522 = vxpose.xlu1.b32.end [3/3] (short) (narrow) %v7813_v11, 32 }
 0x64e   :  { %v957_v15 = vpop.xlane.xlu0 %956 }
 0x652   :  { %v951_v9 = vpop.xlane.xlu1 %950  ;;  %v954_v2 = vpop.xlane.xlu0 %953 }
 0x653   :  { %7179 = vrcp.f32 %v951_v9 }
 0x654   :  { %7181 = vrcp.f32 %v954_v2 }
 0x656   :  { %v966_v17 = vpop.xlane.xlu1 %965 }
 0x65a   :  { %v960_v31 = vpop.xlane.xlu1 %959 }
 0x65b   :  { %7183 = vrcp.f32 %v960_v31 }
 0x65d   :  { %v7180_v39 = vpop.eup %7179 }
 0x65e   :  { %v7182_v37 = vpop.eup %7181  ;;  %v963_v45 = vpop.xlane.xlu0 %962  ;;  %v997_v50 = vmul.f32 %v7180_v39, %v7752_v47 }
 0x65f   :  { %7185 = vrcp.f32 %v963_v45  ;;  %v998_v48 = vmul.f32 %v7182_v37, %v7750_v46 }
 0x660   :  { %7187 = vrcp.f32 %v957_v15 }
 0x661   :  { %v1009_v51 = vpack.c.bf16 %v998_v48, %v997_v50 }
 0x663   :  { %6535 = vmatprep.mubr.msk.bf16.mxu1 %vm876_vm6, %v1009_v51 }
 0x664   :  { %v975_v57 = vpop.xlane.xlu0 %974 }
 0x665   :  { %v7184_v52 = vpop.eup %7183 }
 0x666   :  { %v1000_v54 = vmul.f32 %v7184_v52, %v7763_v58 }
 0x667   :  { %v972_v60 = vpop.xlane.xlu1 %971 }
 0x668   :  { %v969_v61 = vpop.xlane.xlu0 %968  ;;  %7189 = vrcp.f32 %v972_v60  ;;  %v1260_v60 = vld [vmem:[%s9007_s7 + $0xc] sm:$0xf] }
 0x669   :  { %v7186_v41 = vpop.eup %7185  ;;  %7191 = vrcp.f32 %v969_v61 }
 0x66a   :  { %v1001_v55 = vmul.f32 %v7186_v41, %v7769_v6  ;;  %7193 = vrcp.f32 %v966_v17  ;;  %v7188_v1 = vpop.eup %7187 }
 0x66b   :  { %v978_v47 = vpop.xlane.xlu1 %977  ;;  %v999_v14 = vmul.f32 %v7188_v1, %v7745_v7 }
 0x66c   :  { %v1011_v56 = vpack.c.bf16 %v1001_v55, %v1000_v54  ;;  %v981_v46 = vpop.xlane.xlu0 %980  ;;  %7195 = vrcp.f32 %v978_v47  ;;  %v1258_v55 = vld [vmem:[%s9007_s7 + $0x4] sm:$0xf] }
 0x66d   :  { %7197 = vrcp.f32 %v981_v46  ;;  %v1010_v38 = vpack.c.bf16 %v999_v14, %v999_v14 }
 0x66e   :  { %6541 = vmatprep.mubr.msk.bf16.mxu0 %vm876_vm6, %v1011_v56  ;;  %7199 = vrcp.f32 %v975_v57  ;;  %v1325_v56 = vsel %vm629_vm4, %v1258_v55, 0  ;;  %v1259_v57 = vld [vmem:[%s9007_s7 + $0x8] sm:$0xf] }
 0x66f   :  { %v984_v58 = vpop.xlane.xlu1 %983 }
 0x670   :  { %7201 = vrcp.f32 %v984_v58 }
 0x672   :  { %v7190_v3 = vpop.eup %7189 }
 0x673   :  { %v7192_v5 = vpop.eup %7191  ;;  %v1004_v26 = vmul.f32 %v7190_v3, %v7779_v21  ;;  %v1684_v24 = vpop.permute.xlu1 %1683 }
 0x674   :  { %v7194_v12 = vpop.eup %7193  ;;  %v1003_v22 = vmul.f32 %v7192_v5, %v7781_v29 }
 0x675   :  { %v1002_v43 = vmul.f32 %v7194_v12, %v7758_v49 }
 0x676   :  { %v7196_v18 = vpop.eup %7195  ;;  %v1013_v44 = vpack.c.bf16 %v1004_v26, %v1003_v22 }
 0x677   :  { %v7198_v16 = vpop.eup %7197  ;;  %v1006_v7 = vmul.f32 %v7196_v18, %v7787_v32  ;;  %v1012_v9 = vpack.c.bf16 %v1002_v43, %v1002_v43  ;;  %v1686_v17 = vpop.permute.xlu1 %1685 }
 0x678   :  { %v7200_v13 = vpop.eup %7199  ;;  %v1007_v29 = vmul.f32 %v7198_v16, %v7789_v33 }
 0x679   :  { %v1005_v49 = vmul.f32 %v7200_v13, %v7775_v27 }
 0x67a   :  { %v7202_v2 = vpop.eup %7201  ;;  %v1015_v31 = vpack.c.bf16 %v1007_v29, %v1006_v7  ;;  %v1439_v29 = vsel %vm629_vm4, %v1260_v60, 0 }
 0x67b   :  { %v1008_v33 = vmul.f32 %v7202_v2, %v7795_v36  ;;  %v1014_v39 = vpack.c.bf16 %v1005_v49, %v1005_v49  ;;  %v1688_v37 = vpop.permute.xlu1 %1687  ;;  %v1257_v36 = vld [vmem:[%s9007_s7] sm:$0xf] }
 0x67c   :  { %v1268_v54 = vsel %vm629_vm4, %v1257_v36, 0 }
 0x67d   :  { %v1016_v45 = vpack.c.bf16 %v1008_v33, %v1008_v33 }
 0x68c   :  { %v594_v62 = vpop.trf.xlu0 }
 0x68d   :  { %v1017_v63 = vpack.c.bf16 %v594_v62, %v594_v62 }
 0x68f   :  { %6911 = vmatprep.subr.msk.bf16.mxu1 %vm876_vm6, %v1017_v63  ;;  %v1028_v6 = vsel %vm876_vm6, %v1017_v63, 0 }
 0x690   :  { %6534 = vmatpush3.bf16.xpose.msra.mxu1 %v1028_v6  ;;  %v595_v10 = vpop.trf.xlu0 }
 0x691   :  { %v1018_v8 = vpack.c.bf16 %v595_v10, %v595_v10 }
 0x693   :  { %6912 = vmatprep.subr.msk.bf16.mxu0 %vm876_vm6, %v1018_v8  ;;  %v1085_v30 = vsel %vm876_vm6, %v1018_v8, 0 }
 0x694   :  { %6540 = vmatpush3.bf16.xpose.msra.mxu0 %v1085_v30  ;;  %v596_v34 = vpop.trf.xlu0 }
 0x695   :  { %v1019_v35 = vpack.c.bf16 %v596_v34, %v596_v34 }
 0x697   :  { %6536 = vmatmul.mubr.msk.bf16.vlgmr.msra.gmra.mrb[28].mxu1 %vm876_vm6, %v1010_v38  ;;  %6913 = vmatprep.subr.msk.bf16.mxu1 %vm876_vm6, %v1019_v35  ;;  %v1142_v21 = vsel %vm876_vm6, %v1019_v35, 0 }
 0x698   :  { %6546 = vmatpush3.bf16.xpose.msra.mxu1 %v1142_v21  ;;  %6547 = vmatprep.mubr.msk.bf16.mxu1 %vm876_vm6, %v1013_v44  ;;  %v597_v4 = vpop.trf.xlu0 }
 0x699   :  { %v1020_v15 = vpack.c.bf16 %v597_v4, %v597_v4  ;;  %6915 = vmatprep.subr.msk.bf16.mxu1 %vm629_vm4, %v1257_v36 }
 0x69b   :  { %6542 = vmatmul.mubr.msk.bf16.vlgmr.msra.gmra.mrb[12].mxu0 %vm876_vm6, %v1012_v9  ;;  %6914 = vmatprep.subr.msk.bf16.mxu0 %vm876_vm6, %v1020_v15  ;;  %v1199_v32 = vsel %vm876_vm6, %v1020_v15, 0 }
 0x69c   :  { %6552 = vmatpush3.bf16.xpose.msra.mxu0 %v1199_v32  ;;  %6553 = vmatprep.mubr.msk.bf16.mxu0 %vm876_vm6, %v1015_v31 }
 0x69d   :  { %6916 = vmatprep.subr.msk.bf16.mxu0 %vm629_vm4, %v1258_v55 }
 0x69f   :  { %6548 = vmatmul.mubr.msk.bf16.vlgmr.msra.gmra.mrb[32].mxu1 %vm876_vm6, %v1014_v39 }
 0x6a0   :  { %6558 = vmatpush3.bf16.msra.mxu1 %v1268_v54 }
 0x6a1   :  { %6917 = vmatprep.subr.msk.bf16.mxu1 %vm629_vm4, %v1259_v57 }
 0x6a3   :  { %6554 = vmatmul.mubr.msk.bf16.vlgmr.msra.gmra.mrb[16].mxu0 %vm876_vm6, %v1016_v45 }
 0x6a4   :  { %v1536_v27 = vpop.trf.xlu1  ;;  %6564 = vmatpush3.bf16.msra.mxu0 %v1325_v56 }
 0x6a5   :  { %6918 = vmatprep.subr.msk.bf16.mxu0 %vm629_vm4, %v1260_v60 }
 0x6a8   :  { %v1537_v50 = vpop.trf.xlu1 }
 0x6a9   :  { %v6999_v48 = vpack.i.bf16 %v1537_v50, %v1536_v27 }
 0x6ab   :  { %7000 = vxpose.xlu0.b32.start.end [1/1] (short) (narrow) %v6999_v48, 24 }
 0x6ac   :  { %v1538_v51 = vpop.trf.xlu1 }
 0x6b0   :  { %v1539_v52 = vpop.trf.xlu1 }
 0x6b1   :  { %v7016_v41 = vpack.i.bf16 %v1539_v52, %v1538_v51 }
 0x6b4   :  { %1692 = vxpose.xlu0.b32.start [1/3] (short) (narrow) %v1684_v24, 32  ;;  %v1382_v24 = vsel %vm629_vm4, %v1259_v57, 0 }
 0x6b8   :  { %1693 = vxpose.xlu0.b32.cont [2/3] (short) (narrow) %v1686_v17, 32 }
 0x6bc   :  { %1694 = vxpose.xlu0.b32.end [3/3] (short) (narrow) %v1688_v37, 32 }
 0x6c1   :  { %7017 = vxpose.xlu0.b32.start.end [1/1] (short) (narrow) %v7016_v41, 24 }
 0x72b   :  { %v7866_v61 = vpop.trf.xlu0 }
 0x72c   :  { %v7002_v21 = vunpack.i.l.bf16 %v7866_v61  ;;  %v7005_v39 = vunpack.i.h.bf16 %v7866_v61 }
 0x72f   :  { %v7868_v47 = vpop.trf.xlu0 }
 0x730   :  { %v7007_v4 = vunpack.i.l.bf16 %v7868_v47  ;;  %v7010_v37 = vunpack.i.h.bf16 %v7868_v47 }
 0x732   :  { %v1765_v27 = vpack.c.bf16 %v7007_v4, %v7002_v21  ;;  %v1767_v56 = vpack.c.bf16 %v7010_v37, %v7005_v39 }
 0x733   :  { %v7870_v46 = vpop.trf.xlu0 }
 0x734   :  { %v7012_v41 = vunpack.i.l.bf16 %v7870_v46  ;;  %v7015_v47 = vunpack.i.h.bf16 %v7870_v46 }
 0x737   :  { %v1708_v62 = vpop.trf.xlu0 }
 0x738   :  { %v1773_v16 = vpack.c.bf16 %v1708_v62, %v1708_v62  ;;  %v1766_v62 = vpack.c.bf16 %v7012_v41, %v7012_v41 }
 0x73a   :  { %v1784_v17 = vsel %vm629_vm4, %v1773_v16, 0 }
 0x73b   :  { %v1709_v1 = vpop.trf.xlu0 }
 0x73c   :  { %v1774_v44 = vpack.c.bf16 %v1709_v1, %v1709_v1 }
 0x73e   :  { %v1841_v55 = vsel %vm629_vm4, %v1774_v44, 0 }
 0x73f   :  { %v1710_v58 = vpop.trf.xlu0 }
 0x740   :  { %v1775_v32 = vpack.c.bf16 %v1710_v58, %v1710_v58 }
 0x742   :  { %v1898_v1 = vsel %vm629_vm4, %v1775_v32, 0 }
 0x743   :  { %v1711_v63 = vpop.trf.xlu0 }
 0x744   :  { %v1776_v54 = vpack.c.bf16 %v1711_v63, %v1711_v63 }
 0x747   :  { %v7872_v3 = vpop.trf.xlu0 }
 0x748   :  { %v7019_v51 = vunpack.i.l.bf16 %v7872_v3  ;;  %v7022_v57 = vunpack.i.h.bf16 %v7872_v3  ;;  %v1768_v3 = vpack.c.bf16 %v7015_v47, %v7015_v47 }
 0x74b   :  { %v7874_v5 = vpop.trf.xlu0 }
 0x74c   :  { %v7024_v52 = vunpack.i.l.bf16 %v7874_v5  ;;  %v7027_v60 = vunpack.i.h.bf16 %v7874_v5 }
 0x74e   :  { %v1769_v61 = vpack.c.bf16 %v7024_v52, %v7019_v51  ;;  %v1771_v63 = vpack.c.bf16 %v7027_v60, %v7022_v57 }
 0x74f   :  { %v7876_v6 = vpop.trf.xlu0 }
 0x750   :  { %v7029_v58 = vunpack.i.l.bf16 %v7876_v6  ;;  %v7032_v5 = vunpack.i.h.bf16 %v7876_v6 }
 0x752   :  { %v1772_v46 = vpack.c.bf16 %v7032_v5, %v7032_v5 }
 0x76a   :  { %v6537_v10 = vpop.f32.mrb[28].mxu1 }
 0x76b   :  { %v1064_v12 = vpop.f32.mrb[29].mxu1  ;;  %v1250_v26 = vpack.c.bf16 %v6537_v10, %v6537_v10  ;;  %v1955_v10 = vsel %vm629_vm4, %v1776_v54, 0 }
 0x76c   :  { %v6538_v8 = vpop.f32.mrb[30].mxu1 }
 0x76d   :  { %v1067_v14 = vpop.f32.mrb[31].mxu1 }
 0x76e   :  { %v1249_v18 = vpack.c.bf16 %v1067_v14, %v1064_v12  ;;  %v6543_v22 = vpop.f32.mrb[12].mxu0  ;;  %v1770_v12 = vpack.c.bf16 %v7029_v58, %v7029_v58 }
 0x76f   :  { %v1121_v30 = vpop.f32.mrb[13].mxu0  ;;  %v1252_v13 = vpack.c.bf16 %v6543_v22, %v6543_v22 }
 0x770   :  { %v6544_v34 = vpop.f32.mrb[14].mxu0  ;;  %6559 = vmatprep.mubr.msk.bf16.mxu1 %vm622_vm3, %v1249_v18 }
 0x771   :  { %v1124_v35 = vpop.f32.mrb[15].mxu0  ;;  %6560 = vmatmul.mubr.msk.bf16.vlgmr.msra.gmra.mrb[36].mxu1 %vm622_vm3, %v1250_v26 }
 0x772   :  { %v1251_v38 = vpack.c.bf16 %v1124_v35, %v1121_v30  ;;  %v6549_v43 = vpop.f32.mrb[32].mxu1  ;;  %6570 = vmatpush3.bf16.msra.mxu1 %v1382_v24 }
 0x773   :  { %v1178_v7 = vpop.f32.mrb[33].mxu1  ;;  %6919 = vmatprep.subr.msk.bf16.mxu1 %vm629_vm4, %v1773_v16  ;;  %v1254_v31 = vpack.c.bf16 %v6549_v43, %v6549_v43 }
 0x774   :  { %v6550_v15 = vpop.f32.mrb[34].mxu1  ;;  %6565 = vmatprep.mubr.msk.bf16.mxu0 %vm622_vm3, %v1251_v38 }
 0x775   :  { %v1181_v9 = vpop.f32.mrb[35].mxu1  ;;  %6566 = vmatmul.mubr.msk.bf16.vlgmr.msra.gmra.mrb[20].mxu0 %vm622_vm3, %v1252_v13 }
 0x776   :  { %v1253_v49 = vpack.c.bf16 %v1181_v9, %v1178_v7  ;;  %v6555_v2 = vpop.f32.mrb[16].mxu0  ;;  %6576 = vmatpush3.bf16.msra.mxu0 %v1439_v29 }
 0x777   :  { %v1235_v33 = vpop.f32.mrb[17].mxu0  ;;  %6920 = vmatprep.subr.msk.bf16.mxu0 %vm629_vm4, %v1774_v44  ;;  %v1256_v36 = vpack.c.bf16 %v6555_v2, %v6555_v2 }
 0x778   :  { %v6556_v45 = vpop.f32.mrb[18].mxu0  ;;  %6571 = vmatprep.mubr.msk.bf16.mxu1 %vm622_vm3, %v1253_v49 }
 0x779   :  { %v1238_v50 = vpop.f32.mrb[19].mxu0  ;;  %6572 = vmatmul.mubr.msk.bf16.vlgmr.msra.gmra.mrb[40].mxu1 %vm622_vm3, %v1254_v31 }
 0x77a   :  { %v1255_v48 = vpack.c.bf16 %v1238_v50, %v1235_v33  ;;  %6583 = vmatprep.mubr.msk.bf16.mxu1 %vm622_vm3, %v1765_v27  ;;  %6582 = vmatpush3.bf16.msra.mxu1 %v1784_v17 }
 0x77b   :  { %6921 = vmatprep.subr.msk.bf16.mxu1 %vm629_vm4, %v1775_v32 }
 0x77c   :  { %6577 = vmatprep.mubr.msk.bf16.mxu0 %vm622_vm3, %v1255_v48 }
 0x77d   :  { %6578 = vmatmul.mubr.msk.bf16.vlgmr.msra.gmra.mrb[24].mxu0 %vm622_vm3, %v1256_v36 }
 0x77e   :  { %6589 = vmatprep.mubr.msk.bf16.mxu0 %vm622_vm3, %v1767_v56  ;;  %6588 = vmatpush3.bf16.msra.mxu0 %v1841_v55 }
 0x77f   :  { %6922 = vmatprep.subr.msk.bf16.mxu0 %vm629_vm4, %v1776_v54 }
 0x781   :  { %6584 = vmatmul.mubr.msk.bf16.vlgmr.msra.gmra.mrb[44].mxu1 %vm622_vm3, %v1766_v62 }
 0x782   :  { %6594 = vmatpush3.bf16.msra.mxu1 %v1898_v1  ;;  %6595 = vmatprep.mubr.msk.bf16.mxu1 %vm622_vm3, %v1769_v61 }
 0x785   :  { %6590 = vmatmul.mubr.msk.bf16.vlgmr.msra.gmra.mrb[28].mxu0 %vm622_vm3, %v1768_v3 }
 0x786   :  { %6600 = vmatpush3.bf16.msra.mxu0 %v1955_v10  ;;  %6601 = vmatprep.mubr.msk.bf16.mxu0 %vm622_vm3, %v1771_v63 }
 0x789   :  { %6596 = vmatmul.mubr.msk.bf16.vlgmr.msra.gmra.mrb[48].mxu1 %vm622_vm3, %v1770_v12 }
 0x78d   :  { %6602 = vmatmul.mubr.msk.bf16.vlgmr.msra.gmra.mrb[32].mxu0 %vm622_vm3, %v1772_v46 }
 0x844   :  { %v6561_v8 = vpop.f32.mrb[36].mxu1 }
 0x845   :  { %v1304_v14 = vpop.f32.mrb[37].mxu1  ;;  %v1503_v16 = vsel %vm169_vm2, %v6561_v8, 0.0 }
 0x846   :  { %v6562_v18 = vpop.f32.mrb[38].mxu1  ;;  %v1489_v24 = vsel %vm169_vm2, %v1304_v14, 0.0 }
 0x847   :  { %v1307_v22 = vpop.f32.mrb[39].mxu1 }
 0x848   :  { %v6567_v26 = vpop.f32.mrb[20].mxu0  ;;  %v1496_v44 = vsel %vm169_vm2, %v1307_v22, 0.0 }
 0x849   :  { %v1504_v6 = vsel %vm169_vm2, %v6567_v26, 0.0  ;;  %v1361_v30 = vpop.f32.mrb[21].mxu0 }
 0x84a   :  { %v1505_v34 = vadd.f32 %v1504_v6, %v1503_v16  ;;  %v1490_v35 = vsel %vm169_vm2, %v1361_v30, 0.0  ;;  %v6568_v38 = vpop.f32.mrb[22].mxu0 }
 0x84b   :  { %v1491_v43 = vadd.f32 %v1490_v35, %v1489_v24  ;;  %v1364_v13 = vpop.f32.mrb[23].mxu0 }
 0x84c   :  { %v1497_v7 = vsel %vm169_vm2, %v1364_v13, 0.0  ;;  %v6573_v29 = vpop.f32.mrb[40].mxu1 }
 0x84d   :  { %v1498_v21 = vadd.f32 %v1497_v7, %v1496_v44  ;;  %v1506_v4 = vsel %vm169_vm2, %v6573_v29, 0.0  ;;  %v1418_v15 = vpop.f32.mrb[41].mxu1 }
 0x84e   :  { %v1507_v9 = vadd.f32 %v1506_v4, %v1505_v34  ;;  %v1492_v49 = vsel %vm169_vm2, %v1418_v15, 0.0  ;;  %v6574_v2 = vpop.f32.mrb[42].mxu1 }
 0x84f   :  { %v1493_v17 = vadd.f32 %v1492_v49, %v1491_v43  ;;  %v1421_v31 = vpop.f32.mrb[43].mxu1 }
 0x850   :  { %v1499_v32 = vsel %vm169_vm2, %v1421_v31, 0.0  ;;  %v6579_v33 = vpop.f32.mrb[24].mxu0 }
 0x851   :  { %v1500_v39 = vadd.f32 %v1499_v32, %v1498_v21  ;;  %v1508_v37 = vsel %vm169_vm2, %v6579_v33, 0.0  ;;  %v1475_v45 = vpop.f32.mrb[25].mxu0 }
 0x852   :  { %v7926_v27 = vadd.f32 %v1508_v37, %v1507_v9  ;;  %v1494_v50 = vsel %vm169_vm2, %v1475_v45, 0.0  ;;  %v6580_v48 = vpop.f32.mrb[26].mxu0 }
 0x853   :  { %v7929_v51 = vadd.f32 %v1494_v50, %v1493_v17  ;;  %v1478_v52 = vpop.f32.mrb[27].mxu0 }
 0x854   :  { %v1501_v41 = vsel %vm169_vm2, %v1478_v52, 0.0  ;;  %v6585_v36 = vpop.f32.mrb[44].mxu1 }
 0x855   :  { %v7932_v54 = vadd.f32 %v1501_v41, %v1500_v39  ;;  %v2007_v55 = vmul.f32 0.35355338, %v6585_v36  ;;  %v1820_v56 = vpop.f32.mrb[45].mxu1 }
 0x856   :  { %v2005_v57 = vmul.f32 0.35355338, %v1820_v56  ;;  %v6586_v60 = vpop.f32.mrb[46].mxu1  ;;  %v7033_v56 = vpack.i.bf16 %v7807_v42, %v7801_v40 }
 0x857   :  { %v1823_v61 = vpop.f32.mrb[47].mxu1  ;;  %v7935_v47 = vadd.f32 %v2007_v55, %v7687_v23 }
 0x858   :  { %v2006_v62 = vmul.f32 0.35355338, %v1823_v61  ;;  %v6591_v1 = vpop.f32.mrb[28].mxu0  ;;  %v7940_v10 = vadd.f32 %v2005_v57, %v7687_v23 }
 0x859   :  { %v2010_v58 = vmul.f32 0.35355338, %v6591_v1  ;;  %v1877_v63 = vpop.f32.mrb[29].mxu0  ;;  %v2035_v3 = vsel %vm876_vm6, %v7935_v47, -inf }
 0x85a   :  { %v6592_v5 = vpop.f32.mrb[30].mxu0  ;;  %2036 = vmax.xlane.f32.xlu1 %v2035_v3  ;;  %v2018_v12 = vadd.f32 %v2006_v62, %v7687_v23  ;;  %v2008_v18 = vmul.f32 0.35355338, %v1877_v63  ;;  %v2029_v26 = vsel %vm876_vm6, %v7940_v10, -inf }
 0x85b   :  { %v1880_v46 = vpop.f32.mrb[31].mxu0  ;;  %v2022_v6 = vadd.f32 %v2010_v58, %v7687_v23 }
 0x85c   :  { %v6597_v8 = vpop.f32.mrb[48].mxu1  ;;  %v2032_v14 = vsel %vm876_vm6, %v2018_v12, -inf  ;;  %v2009_v13 = vmul.f32 0.35355338, %v1880_v46  ;;  %v2020_v21 = vadd.f32 %v2008_v18, %v7687_v23 }
 0x85d   :  { %v2013_v22 = vmul.f32 0.35355338, %v6597_v8  ;;  %2033 = vmax.xlane.f32.xlu0 %v2032_v14  ;;  %v1934_v16 = vpop.f32.mrb[49].mxu1  ;;  %v2044_v7 = vsel %vm876_vm6, %v2022_v6, -inf }
 0x85e   :  { %2030 = vmax.xlane.f32.xlu1 %v2029_v26  ;;  %v2011_v30 = vmul.f32 0.35355338, %v1934_v16  ;;  %v6598_v24 = vpop.f32.mrb[50].mxu1  ;;  %v2038_v17 = vsel %vm876_vm6, %v2020_v21, -inf  ;;  %v2021_v31 = vadd.f32 %v2009_v13, %v7687_v23 }
 0x85f   :  { %v7948_v34 = vadd.f32 %v2013_v22, %v7687_v23  ;;  %v1937_v35 = vpop.f32.mrb[51].mxu1 }
 0x860   :  { %v6603_v38 = vpop.f32.mrb[32].mxu0  ;;  %v7951_v43 = vadd.f32 %v2011_v30, %v7687_v23  ;;  %v2012_v49 = vmul.f32 0.35355338, %v1937_v35  ;;  %v2041_v45 = vsel %vm876_vm6, %v2021_v31, -inf }
 0x861   :  { %v1991_v44 = vpop.f32.mrb[33].mxu0  ;;  %v2053_v29 = vsel %vm876_vm6, %v7948_v34, -inf  ;;  %v2016_v48 = vmul.f32 0.35355338, %v6603_v38 }
 0x862   :  { %2045 = vmax.xlane.f32.xlu1 %v2044_v7  ;;  %2054 = vmax.xlane.f32.xlu0 %v2053_v29  ;;  %v6604_v4 = vpop.f32.mrb[34].mxu0  ;;  %v2047_v9 = vsel %vm876_vm6, %v7951_v43, -inf  ;;  %v7965_v33 = vadd.f32 %v2012_v49, %v7687_v23  ;;  %v2014_v37 = vmul.f32 0.35355338, %v1991_v44 }
 0x863   :  { %v1994_v15 = vpop.f32.mrb[35].mxu0  ;;  %v7978_v36 = vadd.f32 %v2016_v48, %v7687_v23 }
 0x864   :  { %v2015_v2 = vmul.f32 0.35355338, %v1994_v15  ;;  %v2050_v50 = vsel %vm876_vm6, %v7965_v33, -inf  ;;  %v7973_v52 = vadd.f32 %v2014_v37, %v7687_v23 }
 0x865   :  { %v2062_v55 = vsel %vm876_vm6, %v7978_v36, -inf }
 0x866   :  { %2039 = vmax.xlane.f32.xlu1 %v2038_v17  ;;  %2048 = vmax.xlane.f32.xlu0 %v2047_v9  ;;  %v7962_v32 = vadd.f32 %v2015_v2, %v7687_v23  ;;  %v2056_v41 = vsel %vm876_vm6, %v7973_v52, -inf }
 0x868   :  { %v2059_v39 = vsel %vm876_vm6, %v7962_v32, -inf }
 0x86a   :  { %2042 = vmax.xlane.f32.xlu1 %v2041_v45  ;;  %2060 = vmax.xlane.f32.xlu0 %v2059_v39 }
 0x86e   :  { %2051 = vmax.xlane.f32.xlu1 %v2050_v50 }
 0x872   :  { %2057 = vmax.xlane.f32.xlu1 %v2056_v41 }
 0x876   :  { %2063 = vmax.xlane.f32.xlu1 %v2062_v55 }
 0x880   :  { %7034 = vrot.lane.b32.xlu0 %v7033_v56, %s7423_s21 }
 0x887   :  { %1728 = vrot.lane.b32.xlu1 %v7813_v11, %s7423_s21 }
 0x8e7   :  { %v2037_v57 = vpop.xlane.xlu1 %2036 }
 0x8e8   :  { %v2067_v60 = vsub.f32 %v7935_v47, %v2037_v57  ;;  %v8032_v57 = vld [vmem:[%s9008_s8] ss:$0 sm:$0xff] }
 0x8ea   :  { %v2081_v61 = vmul.f32 1.442695, %v2067_v60  ;;  %v2034_v62 = vpop.xlane.xlu0 %2033 }
 0x8eb   :  { %v2066_v1 = vsub.f32 %v2018_v12, %v2034_v62  ;;  %v2031_v58 = vpop.xlane.xlu1 %2030 }
 0x8ec   :  { %7203 = vpow2.f32 %v2081_v61  ;;  %v2065_v63 = vsub.f32 %v7940_v10, %v2031_v58  ;;  %v1517_v61 = vadd.f32 %v8032_v57, %v7929_v51 }
 0x8ed   :  { %v2079_v3 = vmul.f32 1.442695, %v2066_v1 }
 0x8ee   :  { %v2077_v5 = vmul.f32 1.442695, %v2065_v63 }
 0x8ef   :  { %7205 = vpow2.f32 %v2079_v3  ;;  %v2046_v46 = vpop.xlane.xlu1 %2045  ;;  %v2055_v40 = vpop.xlane.xlu0 %2054  ;;  %v8047_v3 = vadd.f32 %v1517_v61, %v7568_v19 }
 0x8f0   :  { %7207 = vpow2.f32 %v2077_v5  ;;  %v2070_v42 = vsub.f32 %v2022_v6, %v2046_v46  ;;  %v2073_v12 = vsub.f32 %v7948_v34, %v2055_v40  ;;  %v1518_v5 = vadd.f32 %v8032_v57, %v7932_v54 }
 0x8f1   :  { %v1519_v40 = vadd.f32 %v8032_v57, %v7926_v27  ;;  %v2680_v19 = vsel %vm169_vm2, %v8047_v3, 0.0 }
 0x8f2   :  { %v2087_v8 = vmul.f32 1.442695, %v2070_v42  ;;  %v2093_v24 = vmul.f32 1.442695, %v2073_v12  ;;  %v8058_v42 = vadd.f32 %v1518_v5, %v7572_v25 }
 0x8f3   :  { %v2040_v14 = vpop.xlane.xlu1 %2039  ;;  %v2049_v18 = vpop.xlane.xlu0 %2048  ;;  %v8063_v54 = vadd.f32 %v1519_v40, %v7570_v20 }
 0x8f4   :  { %7209 = vpow2.f32 %v2087_v8  ;;  %v2068_v11 = vsub.f32 %v2020_v21, %v2040_v14  ;;  %v2071_v35 = vsub.f32 %v7951_v43, %v2049_v18  ;;  %v2683_v8 = vsel %vm169_vm2, %v8058_v42, 0.0 }
 0x8f5   :  { %v2686_v14 = vsel %vm169_vm2, %v8063_v54, 0.0 }
 0x8f6   :  { %v7989_v47 = vpop.eup %7203  ;;  %v2083_v22 = vmul.f32 1.442695, %v2068_v11  ;;  %v2089_v4 = vmul.f32 1.442695, %v2071_v35 }
 0x8f7   :  { %v2043_v26 = vpop.xlane.xlu1 %2042  ;;  %v2107_v10 = vsel %vm876_vm6, %v7989_v47, 0.0  ;;  %v2061_v34 = vpop.xlane.xlu0 %2060 }
 0x8f8   :  { %7211 = vpow2.f32 %v2083_v22  ;;  %v2069_v16 = vsub.f32 %v2021_v31, %v2043_v26  ;;  %2108 = vadd.xlane.f32.xlu0 %v2107_v10  ;;  %v2075_v43 = vsub.f32 %v7962_v32, %v2061_v34 }
 0x8f9   :  { %v7994_v30 = vpop.eup %7205 }
 0x8fa   :  { %v7996_v6 = vpop.eup %7207  ;;  %v2085_v38 = vmul.f32 1.442695, %v2069_v16  ;;  %v2104_v13 = vsel %vm876_vm6, %v7994_v30, 0.0  ;;  %v2097_v31 = vmul.f32 1.442695, %v2075_v43 }
 0x8fb   :  { %v2052_v44 = vpop.xlane.xlu1 %2051  ;;  %v2101_v7 = vsel %vm876_vm6, %v7996_v6, 0.0  ;;  %v7035_v11 = vpop.permute.xlu0 %7034 }
 0x8fc   :  { %7213 = vpow2.f32 %v2085_v38  ;;  %v2072_v29 = vsub.f32 %v7965_v33, %v2052_v44  ;;  %2105 = vadd.xlane.f32.xlu0 %v2104_v13  ;;  %2102 = vadd.xlane.f32.xlu1 %v2101_v7  ;;  %v7036_v27 = vunpack.i.l.bf16 %v7035_v11  ;;  %v7037_v25 = vunpack.i.h.bf16 %v7035_v11 }
 0x8fd   :  { %7215 = vpow2.f32 %v2093_v24 }
 0x8fe   :  { %v8004_v21 = vpop.eup %7209  ;;  %v2091_v15 = vmul.f32 1.442695, %v2072_v29 }
 0x8ff   :  { %v2058_v9 = vpop.xlane.xlu1 %2057  ;;  %v2116_v49 = vsel %vm876_vm6, %v8004_v21, 0.0 }
 0x900   :  { %7217 = vpow2.f32 %v2091_v15  ;;  %v2074_v2 = vsub.f32 %v7973_v52, %v2058_v9  ;;  %2117 = vadd.xlane.f32.xlu1 %v2116_v49 }
 0x901   :  { %7219 = vpow2.f32 %v2089_v4 }
 0x902   :  { %v8010_v17 = vpop.eup %7211  ;;  %v2095_v33 = vmul.f32 1.442695, %v2074_v2 }
 0x903   :  { %v2064_v39 = vpop.xlane.xlu1 %2063  ;;  %v2110_v37 = vsel %vm876_vm6, %v8010_v17, 0.0 }
 0x904   :  { %7221 = vpow2.f32 %v2095_v33  ;;  %v2076_v32 = vsub.f32 %v7978_v36, %v2064_v39  ;;  %2111 = vadd.xlane.f32.xlu1 %v2110_v37 }
 0x905   :  { %7223 = vpow2.f32 %v2097_v31 }
 0x906   :  { %v8015_v45 = vpop.eup %7213  ;;  %v2099_v50 = vmul.f32 1.442695, %v2076_v32 }
 0x907   :  { %v2113_v48 = vsel %vm876_vm6, %v8015_v45, 0.0  ;;  %v8019_v52 = vpop.eup %7215  ;;  %v1729_v18 = vpop.permute.xlu1 %1728 }
 0x908   :  { %7225 = vpow2.f32 %v2099_v50  ;;  %2114 = vadd.xlane.f32.xlu0 %v2113_v48  ;;  %v2125_v55 = vsel %vm876_vm6, %v8019_v52, 0.0 }
 0x90a   :  { %v8021_v41 = vpop.eup %7217 }
 0x90b   :  { %v2122_v36 = vsel %vm876_vm6, %v8021_v41, 0.0  ;;  %v8027_v56 = vpop.eup %7219 }
 0x90c   :  { %2126 = vadd.xlane.f32.xlu0 %v2125_v55  ;;  %2123 = vadd.xlane.f32.xlu1 %v2122_v36  ;;  %v2119_v62 = vsel %vm876_vm6, %v8027_v56, 0.0 }
 0x90e   :  { %v8034_v60 = vpop.eup %7221 }
 0x90f   :  { %v2128_v1 = vsel %vm876_vm6, %v8034_v60, 0.0  ;;  %v8042_v58 = vpop.eup %7223 }
 0x910   :  { %2120 = vadd.xlane.f32.xlu0 %v2119_v62  ;;  %2129 = vadd.xlane.f32.xlu1 %v2128_v1  ;;  %v2131_v51 = vsel %vm876_vm6, %v8042_v58, 0.0 }
 0x912   :  { %v8044_v63 = vpop.eup %7225 }
 0x913   :  { %v2134_v46 = vsel %vm876_vm6, %v8044_v63, 0.0 }
 0x914   :  { %2132 = vadd.xlane.f32.xlu0 %v2131_v51  ;;  %2135 = vadd.xlane.f32.xlu1 %v2134_v46 }
 0x918   :  { %2681 = vadd.xlane.f32.xlu1 %v2680_v19 }
 0x91c   :  { %2684 = vadd.xlane.f32.xlu1 %v2683_v8 }
 0x920   :  { %2687 = vadd.xlane.f32.xlu1 %v2686_v14 }
 0x941   :  { %1733 = vxpose.xlu0.b32.start [1/3] (short) (narrow) %v7036_v27, 32 }
 0x945   :  { %1734 = vxpose.xlu0.b32.cont [2/3] (short) (narrow) %v7037_v25, 32 }
 0x949   :  { %1735 = vxpose.xlu0.b32.end [3/3] (short) (narrow) %v1729_v18, 32 }
 0x985   :  { %v2109_v12 = vpop.xlane.xlu0 %2108 }
 0x989   :  { %v2106_v22 = vpop.xlane.xlu0 %2105  ;;  %v2103_v26 = vpop.xlane.xlu1 %2102 }
 0x98a   :  { %7227 = vrcp.f32 %v2106_v22 }
 0x98b   :  { %7229 = vrcp.f32 %v2103_v26 }
 0x98d   :  { %v2118_v20 = vpop.xlane.xlu1 %2117 }
 0x991   :  { %v2112_v10 = vpop.xlane.xlu1 %2111 }
 0x992   :  { %7231 = vrcp.f32 %v2112_v10  ;;  %v2410_v10 = vld [vmem:[%s9007_s7 + $0x4] sm:$0xf] }
 0x994   :  { %v7228_v16 = vpop.eup %7227 }
 0x995   :  { %v7230_v24 = vpop.eup %7229  ;;  %v2115_v35 = vpop.xlane.xlu0 %2114  ;;  %v2150_v38 = vmul.f32 %v7228_v16, %v7994_v30  ;;  %v2411_v16 = vld [vmem:[%s9007_s7 + $0x8] sm:$0xf] }
 0x996   :  { %7233 = vrcp.f32 %v2115_v35  ;;  %v2149_v13 = vmul.f32 %v7230_v24, %v7996_v6  ;;  %v2412_v24 = vld [vmem:[%s9007_s7 + $0xc] sm:$0xf] }
 0x997   :  { %7235 = vrcp.f32 %v2109_v12 }
 0x998   :  { %v2161_v34 = vpack.c.bf16 %v2150_v38, %v2149_v13 }
 0x999   :  { %v2127_v15 = vpop.xlane.xlu0 %2126  ;;  %v2124_v49 = vpop.xlane.xlu1 %2123 }
 0x99a   :  { %6607 = vmatprep.mubr.msk.bf16.mxu1 %vm876_vm6, %v2161_v34 }
 0x99c   :  { %v7232_v44 = vpop.eup %7231 }
 0x99d   :  { %v2152_v29 = vmul.f32 %v7232_v44, %v8010_v17  ;;  %v2121_v9 = vpop.xlane.xlu0 %2120  ;;  %v2130_v6 = vpop.xlane.xlu1 %2129 }
 0x99e   :  { %7237 = vrcp.f32 %v2121_v9 }
 0x99f   :  { %7239 = vrcp.f32 %v2124_v49 }
 0x9a0   :  { %v7234_v7 = vpop.eup %7233  ;;  %7241 = vrcp.f32 %v2118_v20 }
 0x9a1   :  { %v2153_v4 = vmul.f32 %v7234_v7, %v8015_v45  ;;  %v2133_v30 = vpop.xlane.xlu0 %2132  ;;  %v2136_v31 = vpop.xlane.xlu1 %2135 }
 0x9a2   :  { %7243 = vrcp.f32 %v2133_v30  ;;  %v7236_v33 = vpop.eup %7235 }
 0x9a3   :  { %v2163_v43 = vpack.c.bf16 %v2153_v4, %v2152_v29  ;;  %7245 = vrcp.f32 %v2130_v6  ;;  %v2151_v48 = vmul.f32 %v7236_v33, %v7989_v47 }
 0x9a4   :  { %7247 = vrcp.f32 %v2127_v15 }
 0x9a5   :  { %6613 = vmatprep.mubr.msk.bf16.mxu0 %vm876_vm6, %v2163_v43  ;;  %7249 = vrcp.f32 %v2136_v31  ;;  %v2162_v40 = vpack.c.bf16 %v2151_v48, %v2151_v48  ;;  %v2534_v43 = vsel %vm629_vm4, %v2411_v16, 0  ;;  %v2591_v31 = vsel %vm629_vm4, %v2412_v24, 0 }
 0x9a8   :  { %v7238_v39 = vpop.eup %7237 }
 0x9a9   :  { %v7240_v45 = vpop.eup %7239  ;;  %v2155_v36 = vmul.f32 %v7238_v39, %v8027_v56 }
 0x9aa   :  { %v7242_v55 = vpop.eup %7241  ;;  %v2156_v5 = vmul.f32 %v7240_v45, %v8021_v41 }
 0x9ab   :  { %v2154_v19 = vmul.f32 %v7242_v55, %v8004_v21 }
 0x9ac   :  { %v7244_v61 = vpop.eup %7243  ;;  %v2165_v14 = vpack.c.bf16 %v2156_v5, %v2155_v36 }
 0x9ad   :  { %v7246_v51 = vpop.eup %7245  ;;  %v2159_v47 = vmul.f32 %v7244_v61, %v8042_v58  ;;  %v2164_v25 = vpack.c.bf16 %v2154_v19, %v2154_v19 }
 0x9ae   :  { %v7248_v8 = vpop.eup %7247  ;;  %v2158_v41 = vmul.f32 %v7246_v51, %v8034_v60 }
 0x9af   :  { %v2157_v21 = vmul.f32 %v7248_v8, %v8019_v52  ;;  %v7250_v18 = vpop.eup %7249  ;;  %v2409_v52 = vld [vmem:[%s9007_s7] sm:$0xf]  ;;  %v2682_v8 = vpop.xlane.xlu1 %2681 }
 0x9b0   :  { %v2167_v12 = vpack.c.bf16 %v2159_v47, %v2158_v41  ;;  %v2160_v26 = vmul.f32 %v7250_v18, %v8044_v63  ;;  %v2420_v20 = vsel %vm629_vm4, %v2409_v52, 0  ;;  %v2477_v63 = vsel %vm629_vm4, %v2410_v10, 0 }
 0x9b1   :  { %v2166_v22 = vpack.c.bf16 %v2157_v21, %v2157_v21 }
 0x9b2   :  { %v2168_v60 = vpack.c.bf16 %v2160_v26, %v2160_v26 }
 0x9c1   :  { %v1749_v2 = vpop.trf.xlu0 }
 0x9c2   :  { %v2169_v17 = vpack.c.bf16 %v1749_v2, %v1749_v2 }
 0x9c4   :  { %v2180_v37 = vsel %vm876_vm6, %v2169_v17, 0  ;;  %6923 = vmatprep.subr.msk.bf16.mxu1 %vm876_vm6, %v2169_v17 }
 0x9c5   :  { %6606 = vmatpush3.bf16.xpose.msra.mxu1 %v2180_v37  ;;  %v1750_v32 = vpop.trf.xlu0 }
 0x9c6   :  { %v2170_v50 = vpack.c.bf16 %v1750_v32, %v1750_v32 }
 0x9c8   :  { %v2237_v62 = vsel %vm876_vm6, %v2170_v50, 0  ;;  %6924 = vmatprep.subr.msk.bf16.mxu0 %vm876_vm6, %v2170_v50 }
 0x9c9   :  { %6612 = vmatpush3.bf16.xpose.msra.mxu0 %v2237_v62  ;;  %v1751_v1 = vpop.trf.xlu0 }
 0x9ca   :  { %v2171_v46 = vpack.c.bf16 %v1751_v1, %v1751_v1 }
 0x9cc   :  { %6608 = vmatmul.mubr.msk.bf16.vlgmr.msra.gmra.mrb[52].mxu1 %vm876_vm6, %v2162_v40  ;;  %6925 = vmatprep.subr.msk.bf16.mxu1 %vm876_vm6, %v2171_v46  ;;  %v2294_v56 = vsel %vm876_vm6, %v2171_v46, 0 }
 0x9cd   :  { %v1752_v11 = vpop.trf.xlu0  ;;  %6618 = vmatpush3.bf16.xpose.msra.mxu1 %v2294_v56  ;;  %6619 = vmatprep.mubr.msk.bf16.mxu1 %vm876_vm6, %v2165_v14 }
 0x9ce   :  { %v2172_v27 = vpack.c.bf16 %v1752_v11, %v1752_v11  ;;  %6927 = vmatprep.subr.msk.bf16.mxu1 %vm629_vm4, %v2409_v52 }
 0x9d0   :  { %6614 = vmatmul.mubr.msk.bf16.vlgmr.msra.gmra.mrb[36].mxu0 %vm876_vm6, %v2164_v25  ;;  %6926 = vmatprep.subr.msk.bf16.mxu0 %vm876_vm6, %v2172_v27  ;;  %v2351_v58 = vsel %vm876_vm6, %v2172_v27, 0 }
 0x9d1   :  { %6624 = vmatpush3.bf16.xpose.msra.mxu0 %v2351_v58  ;;  %6625 = vmatprep.mubr.msk.bf16.mxu0 %vm876_vm6, %v2167_v12 }
 0x9d2   :  { %6928 = vmatprep.subr.msk.bf16.mxu0 %vm629_vm4, %v2410_v10 }
 0x9d4   :  { %6620 = vmatmul.mubr.msk.bf16.vlgmr.msra.gmra.mrb[56].mxu1 %vm876_vm6, %v2166_v22 }
 0x9d5   :  { %6630 = vmatpush3.bf16.msra.mxu1 %v2420_v20 }
 0x9d6   :  { %6929 = vmatprep.subr.msk.bf16.mxu1 %vm629_vm4, %v2411_v16 }
 0x9d8   :  { %6626 = vmatmul.mubr.msk.bf16.vlgmr.msra.gmra.mrb[40].mxu0 %vm876_vm6, %v2168_v60 }
 0x9d9   :  { %6636 = vmatpush3.bf16.msra.mxu0 %v2477_v63  ;;  %v2685_v63 = vpop.xlane.xlu1 %2684 }
 0x9da   :  { %6930 = vmatprep.subr.msk.bf16.mxu0 %vm629_vm4, %v2412_v24 }
 0xa9f   :  { %v6609_v35 = vpop.f32.mrb[52].mxu1 }
 0xaa0   :  { %v2216_v38 = vpop.f32.mrb[53].mxu1  ;;  %v2402_v29 = vpack.c.bf16 %v6609_v35, %v6609_v35  ;;  %v2698_v35 = vmul.f32 0.03125, %v2682_v8 }
 0xaa1   :  { %v6610_v13 = vpop.f32.mrb[54].mxu1 }
 0xaa2   :  { %v2219_v34 = vpop.f32.mrb[55].mxu1 }
 0xaa3   :  { %v2401_v44 = vpack.c.bf16 %v2219_v34, %v2216_v38  ;;  %v6615_v7 = vpop.f32.mrb[36].mxu0 }
 0xaa4   :  { %v2273_v4 = vpop.f32.mrb[37].mxu0  ;;  %v2404_v6 = vpack.c.bf16 %v6615_v7, %v6615_v7 }
 0xaa5   :  { %v6616_v15 = vpop.f32.mrb[38].mxu0  ;;  %6631 = vmatprep.mubr.msk.bf16.mxu1 %vm622_vm3, %v2401_v44 }
 0xaa6   :  { %v2276_v9 = vpop.f32.mrb[39].mxu0  ;;  %6632 = vmatmul.mubr.msk.bf16.vlgmr.msra.gmra.mrb[60].mxu1 %vm622_vm3, %v2402_v29 }
 0xaa7   :  { %v2403_v49 = vpack.c.bf16 %v2276_v9, %v2273_v4  ;;  %v6621_v30 = vpop.f32.mrb[56].mxu1  ;;  %6642 = vmatpush3.bf16.msra.mxu1 %v2534_v43  ;;  %v2704_v9 = vsub.f32 %v8047_v3, %v2698_v35  ;;  %v7126_v35 = vld [vmem:[%s9012_s13 + $0x18] sm:$0xff]  }
 0xaa8   :  { %v2330_v2 = vpop.f32.mrb[57].mxu1  ;;  %6653 = vmatprep.subr.bf16.mxu1 %v7419_v0  ;;  %v2406_v32 = vpack.c.bf16 %v6621_v30, %v6621_v30 }
 0xaa9   :  { %v6622_v17 = vpop.f32.mrb[58].mxu1  ;;  %6637 = vmatprep.mubr.msk.bf16.mxu0 %vm622_vm3, %v2403_v49  ;;  %v2699_v49 = vmul.f32 0.03125, %v2685_v63  ;;  %v7123_v63 = vld [vmem:[%s9012_s13] sm:$0xff]  }
 0xaaa   :  { %v2333_v33 = vpop.f32.mrb[59].mxu1  ;;  %6638 = vmatmul.mubr.msk.bf16.vlgmr.msra.gmra.mrb[44].mxu0 %vm622_vm3, %v2404_v6 }
 0xaab   :  { %v2405_v39 = vpack.c.bf16 %v2333_v33, %v2330_v2  ;;  %v6627_v37 = vpop.f32.mrb[40].mxu0  ;;  %6648 = vmatpush3.bf16.msra.mxu0 %v2591_v31  ;;  %v2688_v2 = vpop.xlane.xlu1 %2687  ;;  %v2705_v17 = vsub.f32 %v8058_v42, %v2699_v49 }
 0xaac   :  { %v2387_v45 = vpop.f32.mrb[41].mxu0  ;;  %6669 = vmatprep.subr.bf16.mxu0 %v7419_v0  ;;  %v2408_v36 = vpack.c.bf16 %v6627_v37, %v6627_v37  ;;  %v2700_v33 = vmul.f32 0.03125, %v2688_v2  ;;  %v2710_v37 = vmul.f32 %v2704_v9, %v2704_v9 }
 0xaad   :  { %v6628_v50 = vpop.f32.mrb[42].mxu0  ;;  %6643 = vmatprep.mubr.msk.bf16.mxu1 %vm622_vm3, %v2405_v39 }
 0xaae   :  { %v2390_v48 = vpop.f32.mrb[43].mxu0  ;;  %6644 = vmatmul.mubr.msk.bf16.vlgmr.msra.gmra.mrb[64].mxu1 %vm622_vm3, %v2406_v32  ;;  %v8152_v32 = vsub.f32 %v8063_v54, %v2700_v33  ;;  %v2711_v50 = vmul.f32 %v2705_v17, %v2705_v17 }
 0xaaf   :  { %v2407_v55 = vpack.c.bf16 %v2390_v48, %v2387_v45  ;;  %6657 = vmatprep.mubr.msk.bf16.mxu1 %vm7420_vm0, %v7419_v0  ;;  %v2716_v45 = vsel %vm169_vm2, %v2710_v37, 0.0 }
 0xab0   :  { %v2719_v48 = vsel %vm169_vm2, %v2711_v50, 0.0 }
 0xab1   :  { %6649 = vmatprep.mubr.msk.bf16.mxu0 %vm622_vm3, %v2407_v55 }
 0xab2   :  { %6650 = vmatmul.mubr.msk.bf16.vlgmr.msra.gmra.mrb[48].mxu0 %vm622_vm3, %v2408_v36  ;;  %v7121_v36 = vld [vmem:[%s9009_s11] sm:$0xff]  }
 0xab3   :  { %6685 = vmatprep.mubr.msk.bf16.mxu0 %vm7420_vm0, %v7419_v0  ;;  %6654 = vmatpush3.bf16.msra.mxu1 %v7121_v36 }
 0xab4   :  { %6655 = vmatprep.subr.bf16.mxu1 %v7419_v0  ;;  %6670 = vmatpush3.bf16.msra.mxu0 %v7123_v63 }
 0xab5   :  { %6671 = vmatprep.subr.bf16.mxu0 %v7419_v0 }
 0xb79   :  { %v6633_v61 = vpop.f32.mrb[60].mxu1 }
 0xb7a   :  { %v2456_v62 = vpop.f32.mrb[61].mxu1  ;;  %v2655_v46 = vsel %vm169_vm2, %v6633_v61, 0.0  ;;  %v7122_v61 = vld [vmem:[%s9009_s11 + $0x8] sm:$0xff]  }
 0xb7b   :  { %v6634_v1 = vpop.f32.mrb[62].mxu1  ;;  %v2641_v14 = vsel %vm169_vm2, %v2456_v62, 0.0  ;;  %6656 = vmatpush3.bf16.msra.mxu1 %v7122_v61 }
 0xb7c   :  { %v2459_v5 = vpop.f32.mrb[63].mxu1  ;;  %6697 = vmatprep.subr.bf16.mxu1 %v7419_v0 }
 0xb7d   :  { %v6639_v51 = vpop.f32.mrb[44].mxu0  ;;  %v2648_v25 = vsel %vm169_vm2, %v2459_v5, 0.0 }
 0xb7e   :  { %v2656_v40 = vsel %vm169_vm2, %v6639_v51, 0.0  ;;  %v2513_v19 = vpop.f32.mrb[45].mxu0 }
 0xb7f   :  { %v2657_v47 = vadd.f32 %v2656_v40, %v2655_v46  ;;  %v2642_v56 = vsel %vm169_vm2, %v2513_v19, 0.0  ;;  %v6640_v11 = vpop.f32.mrb[46].mxu0 }
 0xb80   :  { %v2643_v41 = vadd.f32 %v2642_v56, %v2641_v14  ;;  %v2516_v27 = vpop.f32.mrb[47].mxu0 }
 0xb81   :  { %v2649_v21 = vsel %vm169_vm2, %v2516_v27, 0.0  ;;  %v6645_v18 = vpop.f32.mrb[64].mxu1 }
 0xb82   :  { %v2650_v12 = vadd.f32 %v2649_v21, %v2648_v25  ;;  %v2658_v58 = vsel %vm169_vm2, %v6645_v18, 0.0  ;;  %v2570_v22 = vpop.f32.mrb[65].mxu1 }
 0xb83   :  { %v2659_v26 = vadd.f32 %v2658_v58, %v2657_v47  ;;  %v2644_v60 = vsel %vm169_vm2, %v2570_v22, 0.0  ;;  %v6646_v52 = vpop.f32.mrb[66].mxu1 }
 0xb84   :  { %v2645_v20 = vadd.f32 %v2644_v60, %v2643_v41  ;;  %v2573_v10 = vpop.f32.mrb[67].mxu1 }
 0xb85   :  { %v2651_v16 = vsel %vm169_vm2, %v2573_v10, 0.0  ;;  %v6651_v24 = vpop.f32.mrb[48].mxu0 }
 0xb86   :  { %v2652_v38 = vadd.f32 %v2651_v16, %v2650_v12  ;;  %v2660_v13 = vsel %vm169_vm2, %v6651_v24, 0.0  ;;  %v2627_v34 = vpop.f32.mrb[49].mxu0  ;;  %v8188_v12 = vld [vmem:[%s9010_s9] ss:$0 sm:$0xff]  ;;  %v7124_v16 = vld [vmem:[%s9012_s13 + $0x8] sm:$0xff]   ;;  %v7125_v24 = vld [vmem:[%s9012_s13 + $0x10] sm:$0xff]  }
 0xb87   :  { %v2661_v44 = vadd.f32 %v2660_v13, %v2659_v26  ;;  %v2646_v7 = vsel %vm169_vm2, %v2627_v34, 0.0  ;;  %v6652_v29 = vpop.f32.mrb[50].mxu0  ;;  %v8194_v26 = vld [vmem:[%s9011_s10] ss:$0 sm:$0xff]  ;;  %6672 = vmatpush3.bf16.msra.mxu0 %v7124_v16  ;;  %v7128_v34 = vld [vmem:[%s9012_s13 + $0x28] sm:$0xff]  }
 0xb88   :  { %v2647_v4 = vadd.f32 %v2646_v7, %v2645_v20  ;;  %v2630_v43 = vpop.f32.mrb[51].mxu0  ;;  %6673 = vmatprep.subr.bf16.mxu0 %v7419_v0  ;;  %v7129_v7 = vld [vmem:[%s9012_s13 + $0x30] sm:$0xff]  }
 0xb89   :  { %v2653_v15 = vsel %vm169_vm2, %v2630_v43, 0.0  ;;  %v2671_v8 = vadd.f32 %v8032_v57, %v2661_v44 }
 0xb8a   :  { %v2669_v30 = vadd.f32 %v8032_v57, %v2647_v4  ;;  %v2654_v6 = vadd.f32 %v2653_v15, %v2652_v38  ;;  %v7127_v38 = vld [vmem:[%s9012_s13 + $0x20] sm:$0xff]   ;;  %v7130_v4 = vld [vmem:[%s9012_s13 + $0x38] sm:$0xff]  }
 0xb8b   :  { %v8179_v27 = vadd.f32 %v2671_v8, %v7607_v59  ;;  %6674 = vmatpush3.bf16.msra.mxu0 %v7125_v24 }
 0xb8c   :  { %v8146_v31 = vadd.f32 %v2669_v30, %v7576_v28  ;;  %v2712_v28 = vmul.f32 %v8152_v32, %v8152_v32  ;;  %v2670_v5 = vadd.f32 %v8032_v57, %v2654_v6  ;;  %6675 = vmatprep.subr.bf16.mxu0 %v7419_v0 }
 0xb8e   :  { %v2689_v39 = vsel %vm169_vm2, %v8146_v31, 0.0  ;;  %v2722_v55 = vsel %vm169_vm2, %v2712_v28, 0.0  ;;  %v8175_v14 = vadd.f32 %v2670_v5, %v7598_v53  ;;  %v2695_v53 = vsel %vm169_vm2, %v8179_v27, 0.0 }
 0xb8f   :  { %2690 = vadd.xlane.f32.xlu1 %v2689_v39  ;;  %6676 = vmatpush3.bf16.msra.mxu0 %v7126_v35 }
 0xb90   :  { %v2692_v21 = vsel %vm169_vm2, %v8175_v14, 0.0  ;;  %6677 = vmatprep.subr.bf16.mxu0 %v7419_v0 }
 0xb93   :  { %2717 = vadd.xlane.f32.xlu1 %v2716_v45  ;;  %6678 = vmatpush3.bf16.msra.mxu0 %v7127_v38 }
 0xb94   :  { %6679 = vmatprep.subr.bf16.mxu0 %v7419_v0 }
 0xb97   :  { %2720 = vadd.xlane.f32.xlu1 %v2719_v48  ;;  %6680 = vmatpush3.bf16.msra.mxu0 %v7128_v34 }
 0xb98   :  { %6681 = vmatprep.subr.bf16.mxu0 %v7419_v0 }
 0xb9b   :  { %2723 = vadd.xlane.f32.xlu1 %v2722_v55  ;;  %6682 = vmatpush3.bf16.msra.mxu0 %v7129_v7 }
 0xb9c   :  { %6683 = vmatprep.subr.bf16.mxu0 %v7419_v0 }
 0xb9f   :  { %6684 = vmatpush3.bf16.msra.mxu0 %v7130_v4 }
 0xc1c   :  { %v2691_v62 = vpop.xlane.xlu1 %2690 }
 0xc1d   :  { %v2701_v1 = vmul.f32 0.03125, %v2691_v62 }
 0xc1f   :  { %v8169_v51 = vsub.f32 %v8146_v31, %v2701_v1 }
 0xc20   :  { %v2718_v46 = vpop.xlane.xlu1 %2717 }
 0xc21   :  { %v2734_v40 = vmul.f32 0.03125, %v2718_v46  ;;  %v2713_v19 = vmul.f32 %v8169_v51, %v8169_v51 }
 0xc23   :  { %v2740_v47 = vadd.f32 1e-06, %v2734_v40  ;;  %v2725_v56 = vsel %vm169_vm2, %v2713_v19, 0.0 }
 0xc24   :  { %2726 = vadd.xlane.f32.xlu1 %v2725_v56  ;;  %v2721_v11 = vpop.xlane.xlu1 %2720 }
 0xc25   :  { %7251 = vrsqrt.f32 %v2740_v47  ;;  %v2735_v41 = vmul.f32 0.03125, %v2721_v11 }
 0xc27   :  { %v2741_v25 = vadd.f32 1e-06, %v2735_v41 }
 0xc28   :  { %2693 = vadd.xlane.f32.xlu1 %v2692_v21  ;;  %v2724_v13 = vpop.xlane.xlu1 %2723 }
 0xc29   :  { %7253 = vrsqrt.f32 %v2741_v25  ;;  %v2736_v44 = vmul.f32 0.03125, %v2724_v13 }
 0xc2b   :  { %v2742_v29 = vadd.f32 1e-06, %v2736_v44 }
 0xc2c   :  { %2696 = vadd.xlane.f32.xlu1 %v2695_v53 }
 0xc2d   :  { %7255 = vrsqrt.f32 %v2742_v29 }
 0xc2f   :  { %v7252_v57 = vpop.eup %7251 }
 0xc30   :  { %v2752_v18 = vmul.f32 %v7252_v57, %v2704_v9 }
 0xc32   :  { %v2764_v59 = vmul.f32 %v8188_v12, %v2752_v18 }
 0xc33   :  { %v7254_v58 = vpop.eup %7253 }
 0xc34   :  { %v2753_v22 = vmul.f32 %v7254_v58, %v2705_v17  ;;  %v2776_v52 = vadd.f32 %v8194_v26, %v2764_v59 }
 0xc36   :  { %v2765_v60 = vmul.f32 %v8188_v12, %v2753_v22 }
 0xc37   :  { %v7256_v17 = vpop.eup %7255 }
 0xc38   :  { %v2777_v20 = vadd.f32 %v8194_v26, %v2765_v60  ;;  %v2754_v50 = vmul.f32 %v7256_v17, %v8152_v32  ;;  %v8249_v32 = vld [vmem:[%s9013_s12] ss:$0 sm:$0xff] }
 0xc3a   :  { %v2782_v10 = vpack.c.bf16 %v2777_v20, %v2776_v52  ;;  %v2766_v61 = vmul.f32 %v8188_v12, %v2754_v50 }
 0xc3c   :  { %6658 = vmatmul.mubr.msk.bf16.vlgmr.msra.gmra.mrb[68].mxu1 %vm169_vm2, %v2782_v10  ;;  %v2778_v1 = vadd.f32 %v8194_v26, %v2766_v61 }
 0xc3d   :  { %6661 = vmatprep.mubr.msk.bf16.mxu1 %vm7420_vm0, %v7419_v0 }
 0xcb1   :  { %v2727_v43 = vpop.xlane.xlu1 %2726 }
 0xcb2   :  { %v2737_v15 = vmul.f32 0.03125, %v2727_v43 }
 0xcb4   :  { %v2743_v9 = vadd.f32 1e-06, %v2737_v15 }
 0xcb5   :  { %v2694_v49 = vpop.xlane.xlu1 %2693 }
 0xcb6   :  { %7257 = vrsqrt.f32 %v2743_v9  ;;  %v2702_v30 = vmul.f32 0.03125, %v2694_v49 }
 0xcb8   :  { %v2708_v6 = vsub.f32 %v8175_v14, %v2702_v30 }
 0xcb9   :  { %v2697_v2 = vpop.xlane.xlu1 %2696 }
 0xcba   :  { %v2703_v33 = vmul.f32 0.03125, %v2697_v2  ;;  %v2714_v39 = vmul.f32 %v2708_v6, %v2708_v6 }
 0xcbc   :  { %v2709_v37 = vsub.f32 %v8179_v27, %v2703_v33  ;;  %v2728_v45 = vsel %vm169_vm2, %v2714_v39, 0.0 }
 0xcbd   :  { %2729 = vadd.xlane.f32.xlu1 %v2728_v45 }
 0xcbe   :  { %v2715_v48 = vmul.f32 %v2709_v37, %v2709_v37 }
 0xcc0   :  { %v7258_v28 = vpop.eup %7257  ;;  %v2731_v55 = vsel %vm169_vm2, %v2715_v48, 0.0 }
 0xcc1   :  { %2732 = vadd.xlane.f32.xlu1 %v2731_v55  ;;  %v2755_v36 = vmul.f32 %v7258_v28, %v8169_v51 }
 0xcc3   :  { %v2767_v62 = vmul.f32 %v8188_v12, %v2755_v36 }
 0xcc5   :  { %v2779_v5 = vadd.f32 %v8194_v26, %v2767_v62 }
 0xcc7   :  { %v2783_v46 = vpack.c.bf16 %v2779_v5, %v2778_v1 }
 0xcc9   :  { %6662 = vmatmul.mubr.msk.bf16.gmra.mrb[72].mxu1 %vm169_vm2, %v2783_v46 }
 0xcca   :  { %6665 = vmatprep.mubr.msk.bf16.mxu1 %vm7420_vm0, %v7419_v0 }
 0xd0f   :  { %v2851_v51 = vpop.f32.mrb[68].mxu1 }
 0xd10   :  { %v2852_v40 = vadd.f32 %v8249_v32, %v2851_v51  ;;  %v6659_v19 = vpop.f32.mrb[69].mxu1 }
 0xd11   :  { %v2854_v8 = vpop.f32.mrb[70].mxu1 }
 0xd12   :  { %v2874_v47 = vmul.f32 %v2852_v40, %v2852_v40  ;;  %v2855_v56 = vadd.f32 %v8249_v32, %v2854_v8  ;;  %v6660_v11 = vpop.f32.mrb[71].mxu1 }
 0xd14   :  { %v2880_v41 = vmul.f32 %v2874_v47, %v2852_v40  ;;  %v2875_v25 = vmul.f32 %v2855_v56, %v2855_v56 }
 0xd16   :  { %v2886_v21 = vmul.f32 0.044715, %v2880_v41  ;;  %v2881_v53 = vmul.f32 %v2875_v25, %v2855_v56 }
 0xd18   :  { %v2892_v57 = vadd.f32 %v2886_v21, %v2852_v40  ;;  %v2887_v18 = vmul.f32 0.044715, %v2881_v53  ;;  %v8269_v53 = vld [vmem:[%s9014_s14] ss:$0 sm:$0xff] }
 0xd1a   :  { %v2898_v58 = vmul.f32 0.7978846, %v2892_v57  ;;  %v2893_v59 = vadd.f32 %v2887_v18, %v2855_v56 }
 0xd1c   :  { %7259 = vtanh.f32 %v2898_v58  ;;  %v2899_v22 = vmul.f32 0.7978846, %v2893_v59 }
 0xd1e   :  { %7261 = vtanh.f32 %v2899_v22 }
 0xd26   :  { %v7260_v60 = vpop.eup %7259 }
 0xd27   :  { %v2910_v52 = vadd.f32 1.0, %v7260_v60 }
 0xd28   :  { %v7262_v20 = vpop.eup %7261 }
 0xd29   :  { %v2916_v10 = vmul.f32 0.5, %v2910_v52  ;;  %v2911_v63 = vadd.f32 1.0, %v7262_v20 }
 0xd2b   :  { %v2917_v16 = vmul.f32 0.5, %v2911_v63  ;;  %v2922_v24 = vmul.f32 %v2916_v10, %v2852_v40 }
 0xd2d   :  { %v2923_v35 = vmul.f32 %v2917_v16, %v2855_v56 }
 0xd2f   :  { %v2928_v38 = vpack.c.bf16 %v2923_v35, %v2922_v24 }
 0xd31   :  { %6686 = vmatmul.mubr.bf16.vlgmr.msra.gmra.mrb[52].mxu0 %v2928_v38 }
 0xd32   :  { %6689 = vmatprep.mubr.msk.bf16.mxu0 %vm7420_vm0, %v7419_v0 }
 0xd4a   :  { %v2730_v13 = vpop.xlane.xlu1 %2729 }
 0xd4b   :  { %v2738_v34 = vmul.f32 0.03125, %v2730_v13 }
 0xd4d   :  { %v2744_v44 = vadd.f32 1e-06, %v2738_v34 }
 0xd4e   :  { %v2733_v7 = vpop.xlane.xlu1 %2732 }
 0xd4f   :  { %7263 = vrsqrt.f32 %v2744_v44  ;;  %v2739_v29 = vmul.f32 0.03125, %v2733_v7 }
 0xd51   :  { %v2745_v4 = vadd.f32 1e-06, %v2739_v29 }
 0xd53   :  { %7265 = vrsqrt.f32 %v2745_v4 }
 0xd59   :  { %v7264_v43 = vpop.eup %7263 }
 0xd5a   :  { %v2756_v15 = vmul.f32 %v7264_v43, %v2708_v6 }
 0xd5c   :  { %v2768_v30 = vmul.f32 %v8188_v12, %v2756_v15 }
 0xd5d   :  { %v7266_v9 = vpop.eup %7265 }
 0xd5e   :  { %v2757_v49 = vmul.f32 %v7266_v9, %v2709_v37  ;;  %v2780_v17 = vadd.f32 %v8194_v26, %v2768_v30 }
 0xd60   :  { %v2769_v2 = vmul.f32 %v8188_v12, %v2757_v49 }
 0xd62   :  { %v2781_v33 = vadd.f32 %v8194_v26, %v2769_v2 }
 0xd64   :  { %v2784_v39 = vpack.c.bf16 %v2781_v33, %v2780_v17 }
 0xd66   :  { %6666 = vmatmul.mubr.msk.bf16.gmra.mrb[76].mxu1 %vm169_vm2, %v2784_v39 }
 0xd67   :  { %6701 = vmatprep.mubr.msk.bf16.mxu1 %vm7420_vm0, %v7419_v0 }
 0xd9c   :  { %v2859_v45 = vpop.f32.mrb[72].mxu1 }
 0xd9d   :  { %v2860_v50 = vadd.f32 %v8249_v32, %v2859_v45  ;;  %v6663_v6 = vpop.f32.mrb[73].mxu1 }
 0xd9e   :  { %v2862_v48 = vpop.f32.mrb[74].mxu1 }
 0xd9f   :  { %v2876_v37 = vmul.f32 %v2860_v50, %v2860_v50  ;;  %v2863_v28 = vadd.f32 %v8249_v32, %v2862_v48  ;;  %v6664_v55 = vpop.f32.mrb[75].mxu1 }
 0xda1   :  { %v2882_v12 = vmul.f32 %v2876_v37, %v2860_v50  ;;  %v2877_v36 = vmul.f32 %v2863_v28, %v2863_v28 }
 0xda3   :  { %v2888_v61 = vmul.f32 0.044715, %v2882_v12  ;;  %v2883_v62 = vmul.f32 %v2877_v36, %v2863_v28 }
 0xda5   :  { %v2894_v26 = vadd.f32 %v2888_v61, %v2860_v50  ;;  %v2889_v1 = vmul.f32 0.044715, %v2883_v62 }
 0xda7   :  { %v2900_v5 = vmul.f32 0.7978846, %v2894_v26  ;;  %v2895_v46 = vadd.f32 %v2889_v1, %v2863_v28 }
 0xda9   :  { %7267 = vtanh.f32 %v2900_v5  ;;  %v2901_v51 = vmul.f32 0.7978846, %v2895_v46 }
 0xdab   :  { %7269 = vtanh.f32 %v2901_v51 }
 0xdb3   :  { %v7268_v40 = vpop.eup %7267 }
 0xdb4   :  { %v2912_v19 = vadd.f32 1.0, %v7268_v40 }
 0xdb5   :  { %v7270_v8 = vpop.eup %7269 }
 0xdb6   :  { %v2913_v47 = vadd.f32 1.0, %v7270_v8  ;;  %v2918_v56 = vmul.f32 0.5, %v2912_v19 }
 0xdb8   :  { %v2919_v11 = vmul.f32 0.5, %v2913_v47  ;;  %v2924_v41 = vmul.f32 %v2918_v56, %v2860_v50 }
 0xdba   :  { %v2925_v25 = vmul.f32 %v2919_v11, %v2863_v28  ;;  %v7131_v11 = vld [vmem:[%s9003_s5 + $0x10] sm:$0xff]  }
 0xdbb   :  { %6698 = vmatpush3.bf16.msra.mxu1 %v7131_v11 }
 0xdbc   :  { %v2929_v21 = vpack.c.bf16 %v2925_v25, %v2924_v41  ;;  %6699 = vmatprep.subr.bf16.mxu1 %v7419_v0  ;;  %v7132_v41 = vld [vmem:[%s9003_s5 + $0x18] sm:$0xff]  }
 0xdbe   :  { %6690 = vmatmul.mubr.bf16.gmra.mrb[56].mxu0 %v2929_v21 }
 0xdbf   :  { %6693 = vmatprep.mubr.msk.bf16.mxu0 %vm7420_vm0, %v7419_v0  ;;  %6700 = vmatpush3.bf16.msra.mxu1 %v7132_v41 }
 0xe04   :  { %v3036_v57 = vpop.f32.mrb[52].mxu0 }
 0xe05   :  { %v3037_v18 = vadd.f32 %v8269_v53, %v3036_v57  ;;  %v6687_v58 = vpop.f32.mrb[53].mxu0 }
 0xe06   :  { %v3039_v59 = vpop.f32.mrb[54].mxu0 }
 0xe07   :  { %v8273_v22 = vadd.f32 %v3037_v18, %v8047_v3  ;;  %v3040_v60 = vadd.f32 %v8269_v53, %v3039_v59  ;;  %v6688_v52 = vpop.f32.mrb[55].mxu0 }
 0xe09   :  { %v8277_v20 = vadd.f32 %v3040_v60, %v8058_v42  ;;  %v3069_v10 = vsel %vm169_vm2, %v8273_v22, 0.0 }
 0xe0a   :  { %3070 = vadd.xlane.f32.xlu1 %v3069_v10 }
 0xe0b   :  { %v3072_v63 = vsel %vm169_vm2, %v8277_v20, 0.0 }
 0xe0c   :  { %3073 = vadd.xlane.f32.xlu0 %v3072_v63 }
 0xe39   :  { %v2867_v16 = vpop.f32.mrb[76].mxu1 }
 0xe3a   :  { %v2868_v24 = vadd.f32 %v8249_v32, %v2867_v16  ;;  %v6667_v35 = vpop.f32.mrb[77].mxu1 }
 0xe3b   :  { %v2870_v3 = vpop.f32.mrb[78].mxu1 }
 0xe3c   :  { %v2878_v38 = vmul.f32 %v2868_v24, %v2868_v24  ;;  %v2871_v13 = vadd.f32 %v8249_v32, %v2870_v3  ;;  %v6668_v34 = vpop.f32.mrb[79].mxu1 }
 0xe3e   :  { %v2884_v44 = vmul.f32 %v2878_v38, %v2868_v24  ;;  %v2879_v42 = vmul.f32 %v2871_v13, %v2871_v13 }
 0xe40   :  { %v2890_v7 = vmul.f32 0.044715, %v2884_v44  ;;  %v2885_v29 = vmul.f32 %v2879_v42, %v2871_v13 }
 0xe42   :  { %v2896_v4 = vadd.f32 %v2890_v7, %v2868_v24  ;;  %v2891_v43 = vmul.f32 0.044715, %v2885_v29 }
 0xe44   :  { %v2902_v15 = vmul.f32 0.7978846, %v2896_v4  ;;  %v2897_v9 = vadd.f32 %v2891_v43, %v2871_v13 }
 0xe46   :  { %7271 = vtanh.f32 %v2902_v15  ;;  %v2903_v49 = vmul.f32 0.7978846, %v2897_v9 }
 0xe48   :  { %7273 = vtanh.f32 %v2903_v49 }
 0xe50   :  { %v7272_v30 = vpop.eup %7271 }
 0xe51   :  { %v2914_v2 = vadd.f32 1.0, %v7272_v30 }
 0xe52   :  { %v7274_v17 = vpop.eup %7273 }
 0xe53   :  { %v2915_v33 = vadd.f32 1.0, %v7274_v17  ;;  %v2920_v39 = vmul.f32 0.5, %v2914_v2 }
 0xe55   :  { %v2921_v45 = vmul.f32 0.5, %v2915_v33  ;;  %v2926_v50 = vmul.f32 %v2920_v39, %v2868_v24  ;;  %v8333_v33 = vld [vmem:[%s9005_s4 + $0x1] ss:$0 sm:$0xff] }
 0xe57   :  { %v2927_v32 = vmul.f32 %v2921_v45, %v2871_v13 }
 0xe59   :  { %v2930_v6 = vpack.c.bf16 %v2927_v32, %v2926_v50 }
 0xe5b   :  { %6694 = vmatmul.mubr.bf16.gmra.mrb[60].mxu0 %v2930_v6 }
 0xe91   :  { %v3044_v48 = vpop.f32.mrb[56].mxu0 }
 0xe92   :  { %v3045_v37 = vadd.f32 %v8269_v53, %v3044_v48  ;;  %v6691_v28 = vpop.f32.mrb[57].mxu0 }
 0xe93   :  { %v3047_v55 = vpop.f32.mrb[58].mxu0 }
 0xe94   :  { %v8287_v12 = vadd.f32 %v3045_v37, %v8063_v54  ;;  %v3048_v36 = vadd.f32 %v8269_v53, %v3047_v55  ;;  %v6692_v61 = vpop.f32.mrb[59].mxu0 }
 0xe96   :  { %v8291_v62 = vadd.f32 %v3048_v36, %v8146_v31  ;;  %v3075_v26 = vsel %vm169_vm2, %v8287_v12, 0.0 }
 0xe97   :  { %3076 = vadd.xlane.f32.xlu1 %v3075_v26  ;;  %v3071_v1 = vpop.xlane.xlu1 %3070 }
 0xe98   :  { %v3087_v5 = vmul.f32 0.03125, %v3071_v1  ;;  %v3078_v54 = vsel %vm169_vm2, %v8291_v62, 0.0 }
 0xe99   :  { %v3074_v46 = vpop.xlane.xlu0 %3073 }
 0xe9a   :  { %v3093_v51 = vsub.f32 %v8273_v22, %v3087_v5  ;;  %v3088_v40 = vmul.f32 0.03125, %v3074_v46 }
 0xe9b   :  { %3079 = vadd.xlane.f32.xlu1 %v3078_v54 }
 0xe9c   :  { %v3094_v19 = vsub.f32 %v8277_v20, %v3088_v40  ;;  %v3099_v8 = vmul.f32 %v3093_v51, %v3093_v51 }
 0xe9e   :  { %v3105_v31 = vsel %vm169_vm2, %v3099_v8, 0.0  ;;  %v3100_v47 = vmul.f32 %v3094_v19, %v3094_v19  ;;  %v8351_v8 = vld [vmem:[%s9006_s6 + $0x1] ss:$0 sm:$0xff] }
 0xe9f   :  { %3106 = vadd.xlane.f32.xlu1 %v3105_v31 }
 0xea0   :  { %v3108_v56 = vsel %vm169_vm2, %v3100_v47, 0.0 }
 0xea3   :  { %3109 = vadd.xlane.f32.xlu1 %v3108_v56 }
 0xf24   :  { %v3077_v25 = vpop.xlane.xlu1 %3076 }
 0xf25   :  { %v3089_v21 = vmul.f32 0.03125, %v3077_v25 }
 0xf27   :  { %v3095_v57 = vsub.f32 %v8287_v12, %v3089_v21 }
 0xf28   :  { %v3080_v18 = vpop.xlane.xlu1 %3079 }
 0xf29   :  { %v3090_v58 = vmul.f32 0.03125, %v3080_v18  ;;  %v3101_v59 = vmul.f32 %v3095_v57, %v3095_v57 }
 0xf2b   :  { %v3096_v60 = vsub.f32 %v8291_v62, %v3090_v58  ;;  %v3111_v52 = vsel %vm169_vm2, %v3101_v59, 0.0 }
 0xf2c   :  { %3112 = vadd.xlane.f32.xlu1 %v3111_v52  ;;  %v3107_v10 = vpop.xlane.xlu1 %3106 }
 0xf2d   :  { %v3123_v63 = vmul.f32 0.03125, %v3107_v10  ;;  %v3102_v16 = vmul.f32 %v3096_v60, %v3096_v60 }
 0xf2e   :  { %v3052_v24 = vpop.f32.mrb[60].mxu0 }
 0xf2f   :  { %v3129_v35 = vadd.f32 1e-06, %v3123_v63  ;;  %v3053_v3 = vadd.f32 %v8269_v53, %v3052_v24  ;;  %v6695_v38 = vpop.f32.mrb[61].mxu0  ;;  %v3114_v13 = vsel %vm169_vm2, %v3102_v16, 0.0 }
 0xf30   :  { %v3055_v34 = vpop.f32.mrb[62].mxu0  ;;  %3115 = vadd.xlane.f32.xlu1 %v3114_v13  ;;  %v3110_v44 = vpop.xlane.xlu1 %3109 }
 0xf31   :  { %7275 = vrsqrt.f32 %v3129_v35  ;;  %v8314_v42 = vadd.f32 %v3053_v3, %v8175_v14  ;;  %v3056_v7 = vadd.f32 %v8269_v53, %v3055_v34  ;;  %v3124_v29 = vmul.f32 0.03125, %v3110_v44  ;;  %v6696_v4 = vpop.f32.mrb[63].mxu0  ;;  %v8327_v53 = vld [vmem:[%s9004_s3 + $0x1] ss:$0 sm:$0xff] }
 0xf33   :  { %v8318_v43 = vadd.f32 %v3056_v7, %v8179_v27  ;;  %v3130_v15 = vadd.f32 1e-06, %v3124_v29  ;;  %v3081_v9 = vsel %vm169_vm2, %v8314_v42, 0.0 }
 0xf34   :  { %3082 = vadd.xlane.f32.xlu1 %v3081_v9 }
 0xf35   :  { %7277 = vrsqrt.f32 %v3130_v15  ;;  %v3084_v49 = vsel %vm169_vm2, %v8318_v43, 0.0 }
 0xf38   :  { %3085 = vadd.xlane.f32.xlu1 %v3084_v49 }
 0xf3b   :  { %v7276_v30 = vpop.eup %7275 }
 0xf3c   :  { %v3141_v14 = vmul.f32 %v7276_v30, %v3093_v51 }
 0xf3e   :  { %v3153_v27 = vmul.f32 %v8327_v53, %v3141_v14 }
 0xf3f   :  { %v7278_v2 = vpop.eup %7277 }
 0xf40   :  { %v3142_v17 = vmul.f32 %v7278_v2, %v3094_v19  ;;  %v3165_v45 = vadd.f32 %v8333_v33, %v3153_v27 }
 0xf42   :  { %v3154_v39 = vmul.f32 %v8327_v53, %v3142_v17 }
 0xf44   :  { %v3166_v50 = vadd.f32 %v8333_v33, %v3154_v39 }
 0xf46   :  { %v3171_v32 = vpack.c.bf16 %v3166_v50, %v3165_v45 }
 0xf48   :  { %6702 = vmatmul.mubr.msk.bf16.vlgmr.msra.gmra.mrb[80].mxu1 %vm169_vm2, %v3171_v32 }
 0xf49   :  { %6705 = vmatprep.mubr.msk.bf16.mxu1 %vm7420_vm0, %v7419_v0 }
 0xfb9   :  { %v3113_v6 = vpop.xlane.xlu1 %3112 }
 0xfba   :  { %v3125_v48 = vmul.f32 0.03125, %v3113_v6 }
 0xfbc   :  { %v3131_v37 = vadd.f32 1e-06, %v3125_v48 }
 0xfbd   :  { %v3116_v28 = vpop.xlane.xlu1 %3115 }
 0xfbe   :  { %7279 = vrsqrt.f32 %v3131_v37  ;;  %v3126_v55 = vmul.f32 0.03125, %v3116_v28 }
 0xfc0   :  { %v3132_v36 = vadd.f32 1e-06, %v3126_v55 }
 0xfc1   :  { %v3083_v21 = vpop.xlane.xlu1 %3082 }
 0xfc2   :  { %7281 = vrsqrt.f32 %v3132_v36 }
 0xfc5   :  { %v3086_v18 = vpop.xlane.xlu1 %3085 }
 0xfc6   :  { %v3092_v59 = vmul.f32 0.03125, %v3086_v18 }
 0xfc8   :  { %v7280_v61 = vpop.eup %7279 }
 0xfc9   :  { %v3143_v26 = vmul.f32 %v7280_v61, %v3095_v57  ;;  %v3091_v57 = vmul.f32 0.03125, %v3083_v21 }
 0xfcb   :  { %v3155_v46 = vmul.f32 %v8327_v53, %v3143_v26  ;;  %v3097_v58 = vsub.f32 %v8314_v42, %v3091_v57 }
 0xfcc   :  { %v7282_v1 = vpop.eup %7281 }
 0xfcd   :  { %v3144_v5 = vmul.f32 %v7282_v1, %v3096_v60  ;;  %v3167_v40 = vadd.f32 %v8333_v33, %v3155_v46  ;;  %v3098_v60 = vsub.f32 %v8318_v43, %v3092_v59  ;;  %v3103_v52 = vmul.f32 %v3097_v58, %v3097_v58 }
 0xfcf   :  { %v3156_v51 = vmul.f32 %v8327_v53, %v3144_v5  ;;  %v3117_v10 = vsel %vm169_vm2, %v3103_v52, 0.0  ;;  %v3104_v63 = vmul.f32 %v3098_v60, %v3098_v60 }
 0xfd1   :  { %v3168_v54 = vadd.f32 %v8333_v33, %v3156_v51  ;;  %v3120_v16 = vsel %vm169_vm2, %v3104_v63, 0.0 }
 0xfd3   :  { %v3172_v19 = vpack.c.bf16 %v3168_v54, %v3167_v40 }
 0xfd5   :  { %6706 = vmatmul.mubr.msk.bf16.gmra.mrb[84].mxu1 %vm169_vm2, %v3172_v19 }
 0xfd6   :  { %6709 = vmatprep.mubr.msk.bf16.mxu1 %vm7420_vm0, %v7419_v0 }
0x101b   :  { %v3242_v31 = vpop.f32.mrb[80].mxu1 }
0x101c   :  { %v8354_v47 = vadd.f32 %v8351_v8, %v3242_v31  ;;  %v6703_v56 = vpop.f32.mrb[81].mxu1 }
0x101d   :  { %v3245_v11 = vpop.f32.mrb[82].mxu1 }
0x101e   :  { %v8357_v41 = vadd.f32 %v8351_v8, %v3245_v11  ;;  %3428 = vrot.lane.b32.xlu1 %v8354_v47, %s7421_s19  ;;  %v6704_v25 = vpop.f32.mrb[83].mxu1 }
0x1020   :  { %3430 = vrot.lane.b32.xlu0 %v8357_v41, %s7421_s19 }
0x1042   :  { %3118 = vadd.xlane.f32.xlu1 %v3117_v10 }
0x1046   :  { %3121 = vadd.xlane.f32.xlu1 %v3120_v16 }
0x1090   :  { %v3429_v34 = vpop.permute.xlu1 %3428 }
0x1092   :  { %v3431_v61 = vpop.permute.xlu0 %3430 }
0x10a8   :  { %v3250_v24 = vpop.f32.mrb[84].mxu1 }
0x10a9   :  { %v8368_v35 = vadd.f32 %v8351_v8, %v3250_v24  ;;  %v6707_v3 = vpop.f32.mrb[85].mxu1 }
0x10aa   :  { %v8370_v38 = vpop.f32.mrb[86].mxu1 }
0x10ab   :  { %v6708_v13 = vpop.f32.mrb[87].mxu1  ;;  %3432 = vrot.lane.b32.xlu1 %v8368_v35, %s7421_s19 }
0x10cf   :  { %v3119_v44 = vpop.xlane.xlu1 %3118 }
0x10d0   :  { %v3127_v7 = vmul.f32 0.03125, %v3119_v44 }
0x10d2   :  { %v3133_v29 = vadd.f32 1e-06, %v3127_v7 }
0x10d3   :  { %v3122_v4 = vpop.xlane.xlu1 %3121 }
0x10d4   :  { %7283 = vrsqrt.f32 %v3133_v29  ;;  %v3128_v15 = vmul.f32 0.03125, %v3122_v4  ;;  %3265 = vxpose.xlu1.b32.start [1/3] (short) (narrow) %v8354_v47, 32 }
0x10d6   :  { %v3134_v9 = vadd.f32 1e-06, %v3128_v15 }
0x10d8   :  { %7285 = vrsqrt.f32 %v3134_v9  ;;  %3266 = vxpose.xlu1.b32.cont [2/3] (short) (narrow) %v8357_v41, 32 }
0x10dc   :  { %3267 = vxpose.xlu1.b32.end [3/3] (short) (narrow) %v8368_v35, 32 }
0x10de   :  { %v7284_v49 = vpop.eup %7283 }
0x10df   :  { %v3145_v30 = vmul.f32 %v7284_v49, %v3097_v58 }
0x10e1   :  { %v3157_v27 = vmul.f32 %v8327_v53, %v3145_v30 }
0x10e2   :  { %v7286_v14 = vpop.eup %7285 }
0x10e3   :  { %v3146_v2 = vmul.f32 %v7286_v14, %v3098_v60  ;;  %v3169_v39 = vadd.f32 %v8333_v33, %v3157_v27 }
0x10e5   :  { %v3158_v17 = vmul.f32 %v8327_v53, %v3146_v2 }
0x10e7   :  { %v3170_v45 = vadd.f32 %v8333_v33, %v3158_v17 }
0x10e9   :  { %v3173_v50 = vpack.c.bf16 %v3170_v45, %v3169_v39 }
0x10eb   :  { %6710 = vmatmul.mubr.msk.bf16.gmra.mrb[88].mxu1 %vm169_vm2, %v3173_v50 }
0x111d   :  { %v3433_v32 = vpop.permute.xlu1 %3432 }
0x1154   :  { %v3281_v6 = vpop.trf.xlu1 }
0x1158   :  { %v3282_v48 = vpop.trf.xlu1 }
0x1159   :  { %v7038_v37 = vpack.i.bf16 %v3282_v48, %v3281_v6 }
0x115b   :  { %7039 = vxpose.xlu0.b32.start.end [1/1] (short) (narrow) %v7038_v37, 24 }
0x115c   :  { %v3283_v28 = vpop.trf.xlu1 }
0x1160   :  { %v3284_v55 = vpop.trf.xlu1 }
0x1161   :  { %v7055_v36 = vpack.i.bf16 %v3284_v55, %v3283_v28 }
0x1163   :  { %7056 = vxpose.xlu1.b32.start.end [1/1] (short) (narrow) %v7055_v36, 24 }
0x1164   :  { %3437 = vxpose.xlu0.b32.start [1/3] (short) (narrow) %v3429_v34, 32 }
0x1168   :  { %3438 = vxpose.xlu0.b32.cont [2/3] (short) (narrow) %v3431_v61, 32 }
0x116c   :  { %3439 = vxpose.xlu0.b32.end [3/3] (short) (narrow) %v3433_v32, 32 }
0x11be   :  { %v8382_v53 = vpop.f32.mrb[88].mxu1 }
0x11bf   :  { %v6711_v26 = vpop.f32.mrb[89].mxu1 }
0x11c0   :  { %v8384_v33 = vpop.f32.mrb[90].mxu1 }
0x11c1   :  { %v6712_v1 = vpop.f32.mrb[91].mxu1 }
0x11db   :  { %v7040_v5 = vpop.trf.xlu0 }
0x11dc   :  { %v7044_v46 = vunpack.i.h.bf16 %v7040_v5  ;;  %v7041_v51 = vunpack.i.l.bf16 %v7040_v5 }
0x11df   :  { %v7045_v40 = vpop.trf.xlu0 }
0x11e0   :  { %v7049_v54 = vunpack.i.h.bf16 %v7045_v40  ;;  %v7046_v19 = vunpack.i.l.bf16 %v7045_v40 }
0x11e2   :  { %v3510_v31 = vpack.c.bf16 %v7046_v19, %v7041_v51  ;;  %v3512_v56 = vpack.c.bf16 %v7049_v54, %v7044_v46 }
0x11e3   :  { %v7050_v11 = vpop.trf.xlu0  ;;  %v7057_v25 = vpop.trf.xlu1 }
0x11e4   :  { %6715 = vmatprep.mubr.msk.bf16.mxu1 %vm622_vm3, %v3510_v31  ;;  %6721 = vmatprep.mubr.msk.bf16.mxu0 %vm622_vm3, %v3512_v56  ;;  %v7058_v57 = vunpack.i.l.bf16 %v7057_v25  ;;  %v7051_v58 = vunpack.i.l.bf16 %v7050_v11  ;;  %v7054_v10 = vunpack.i.h.bf16 %v7050_v11  ;;  %v7061_v16 = vunpack.i.h.bf16 %v7057_v25 }
0x11e6   :  { %v3511_v34 = vpack.c.bf16 %v7051_v58, %v7051_v58  ;;  %v3513_v9 = vpack.c.bf16 %v7054_v10, %v7054_v10 }
0x11e7   :  { %v3453_v21 = vpop.trf.xlu0  ;;  %v7062_v18 = vpop.trf.xlu1 }
0x11e8   :  { %v3518_v59 = vpack.c.bf16 %v3453_v21, %v3453_v21  ;;  %v7063_v60 = vunpack.i.l.bf16 %v7062_v18  ;;  %v7066_v24 = vunpack.i.h.bf16 %v7062_v18 }
0x11ea   :  { %v3529_v52 = vsel %vm629_vm4, %v3518_v59, 0  ;;  %6931 = vmatprep.subr.msk.bf16.mxu1 %vm629_vm4, %v3518_v59  ;;  %v3514_v13 = vpack.c.bf16 %v7063_v60, %v7058_v57  ;;  %v3516_v15 = vpack.c.bf16 %v7066_v24, %v7061_v16 }
0x11eb   :  { %6714 = vmatpush3.bf16.msra.mxu1 %v3529_v52  ;;  %v3454_v63 = vpop.trf.xlu0  ;;  %v7067_v3 = vpop.trf.xlu1 }
0x11ec   :  { %v3519_v44 = vpack.c.bf16 %v3454_v63, %v3454_v63  ;;  %v7068_v29 = vunpack.i.l.bf16 %v7067_v3  ;;  %v7071_v14 = vunpack.i.h.bf16 %v7067_v3 }
0x11ee   :  { %v3586_v7 = vsel %vm629_vm4, %v3519_v44, 0  ;;  %6716 = vmatmul.mubr.msk.bf16.vlgmr.msra.gmra.mrb[92].mxu1 %vm622_vm3, %v3511_v34  ;;  %6932 = vmatprep.subr.msk.bf16.mxu0 %vm629_vm4, %v3519_v44  ;;  %v3515_v2 = vpack.c.bf16 %v7068_v29, %v7068_v29  ;;  %v3517_v39 = vpack.c.bf16 %v7071_v14, %v7071_v14 }
0x11ef   :  { %6720 = vmatpush3.bf16.msra.mxu0 %v3586_v7  ;;  %v3455_v4 = vpop.trf.xlu0  ;;  %6727 = vmatprep.mubr.msk.bf16.mxu1 %vm622_vm3, %v3514_v13 }
0x11f0   :  { %v3520_v49 = vpack.c.bf16 %v3455_v4, %v3455_v4 }
0x11f2   :  { %6722 = vmatmul.mubr.msk.bf16.vlgmr.msra.gmra.mrb[64].mxu0 %vm622_vm3, %v3513_v9  ;;  %v3643_v30 = vsel %vm629_vm4, %v3520_v49, 0  ;;  %6933 = vmatprep.subr.msk.bf16.mxu1 %vm629_vm4, %v3520_v49 }
0x11f3   :  { %6726 = vmatpush3.bf16.msra.mxu1 %v3643_v30  ;;  %v3456_v27 = vpop.trf.xlu0  ;;  %6733 = vmatprep.mubr.msk.bf16.mxu0 %vm622_vm3, %v3516_v15 }
0x11f4   :  { %v3521_v17 = vpack.c.bf16 %v3456_v27, %v3456_v27 }
0x11f6   :  { %v3700_v45 = vsel %vm629_vm4, %v3521_v17, 0  ;;  %6728 = vmatmul.mubr.msk.bf16.vlgmr.msra.gmra.mrb[96].mxu1 %vm622_vm3, %v3515_v2  ;;  %6934 = vmatprep.subr.msk.bf16.mxu0 %vm629_vm4, %v3521_v17 }
0x11f7   :  { %6732 = vmatpush3.bf16.msra.mxu0 %v3700_v45 }
0x11fa   :  { %6734 = vmatmul.mubr.msk.bf16.vlgmr.msra.gmra.mrb[68].mxu0 %vm622_vm3, %v3517_v39 }
0x12c1   :  { %v6717_v50 = vpop.f32.mrb[92].mxu1 }
0x12c2   :  { %v3752_v32 = vmul.f32 0.35355338, %v6717_v50  ;;  %v3565_v6 = vpop.f32.mrb[93].mxu1 }
0x12c3   :  { %v3750_v48 = vmul.f32 0.35355338, %v3565_v6  ;;  %v6718_v37 = vpop.f32.mrb[94].mxu1 }
0x12c4   :  { %v8403_v28 = vadd.f32 %v3752_v32, %v7687_v23  ;;  %v3568_v55 = vpop.f32.mrb[95].mxu1 }
0x12c5   :  { %v3751_v36 = vmul.f32 0.35355338, %v3568_v55  ;;  %v6723_v61 = vpop.f32.mrb[64].mxu0  ;;  %v8406_v26 = vadd.f32 %v3750_v48, %v7687_v23  ;;  %v7072_v48 = vpack.i.bf16 %v8357_v41, %v8354_v47 }
0x12c6   :  { %v3755_v1 = vmul.f32 0.35355338, %v6723_v61  ;;  %v3622_v5 = vpop.f32.mrb[65].mxu0  ;;  %v3780_v46 = vsel %vm876_vm6, %v8403_v28, -inf }
0x12c7   :  { %v3763_v51 = vadd.f32 %v3751_v36, %v7687_v23  ;;  %v6724_v40 = vpop.f32.mrb[66].mxu0  ;;  %3781 = vmax.xlane.f32.xlu1 %v3780_v46  ;;  %v3753_v31 = vmul.f32 0.35355338, %v3622_v5  ;;  %v3774_v21 = vsel %vm876_vm6, %v8406_v26, -inf }
0x12c8   :  { %v3625_v54 = vpop.f32.mrb[67].mxu0  ;;  %v8412_v19 = vadd.f32 %v3755_v1, %v7687_v23 }
0x12c9   :  { %v3754_v56 = vmul.f32 0.35355338, %v3625_v54  ;;  %v3777_v11 = vsel %vm876_vm6, %v3763_v51, -inf  ;;  %v6729_v25 = vpop.f32.mrb[96].mxu1  ;;  %v3765_v10 = vadd.f32 %v3753_v31, %v7687_v23 }
0x12ca   :  { %3778 = vmax.xlane.f32.xlu0 %v3777_v11  ;;  %v3758_v57 = vmul.f32 0.35355338, %v6729_v25  ;;  %v3679_v18 = vpop.f32.mrb[97].mxu1  ;;  %v3789_v63 = vsel %vm876_vm6, %v8412_v19, -inf }
0x12cb   :  { %v3766_v58 = vadd.f32 %v3754_v56, %v7687_v23  ;;  %3775 = vmax.xlane.f32.xlu1 %v3774_v21  ;;  %v6730_v59 = vpop.f32.mrb[98].mxu1  ;;  %v3756_v13 = vmul.f32 0.35355338, %v3679_v18  ;;  %v3783_v15 = vsel %vm876_vm6, %v3765_v10, -inf }
0x12cc   :  { %v8419_v60 = vadd.f32 %v3758_v57, %v7687_v23  ;;  %v3682_v52 = vpop.f32.mrb[99].mxu1 }
0x12cd   :  { %v3786_v16 = vsel %vm876_vm6, %v3766_v58, -inf  ;;  %v3757_v24 = vmul.f32 0.35355338, %v3682_v52  ;;  %v6735_v3 = vpop.f32.mrb[68].mxu0  ;;  %v3768_v49 = vadd.f32 %v3756_v13, %v7687_v23 }
0x12ce   :  { %3790 = vmax.xlane.f32.xlu0 %v3789_v63  ;;  %v3736_v34 = vpop.f32.mrb[69].mxu0  ;;  %v3798_v7 = vsel %vm876_vm6, %v8419_v60, -inf  ;;  %v3761_v14 = vmul.f32 0.35355338, %v6735_v3 }
0x12cf   :  { %3787 = vmax.xlane.f32.xlu1 %v3786_v16  ;;  %v6736_v44 = vpop.f32.mrb[70].mxu0  ;;  %v3769_v4 = vadd.f32 %v3757_v24, %v7687_v23  ;;  %v3759_v9 = vmul.f32 0.35355338, %v3736_v34  ;;  %v3792_v39 = vsel %vm876_vm6, %v3768_v49, -inf }
0x12d0   :  { %v3739_v29 = vpop.f32.mrb[71].mxu0  ;;  %v8439_v45 = vadd.f32 %v3761_v14, %v7687_v23 }
0x12d1   :  { %v3760_v30 = vmul.f32 0.35355338, %v3739_v29  ;;  %v8431_v2 = vadd.f32 %v3759_v9, %v7687_v23  ;;  %v3795_v27 = vsel %vm876_vm6, %v3769_v4, -inf }
0x12d2   :  { %3784 = vmax.xlane.f32.xlu0 %v3783_v15  ;;  %v3807_v6 = vsel %vm876_vm6, %v8439_v45, -inf }
0x12d3   :  { %3799 = vmax.xlane.f32.xlu1 %v3798_v7  ;;  %v8435_v17 = vadd.f32 %v3760_v30, %v7687_v23  ;;  %v3801_v50 = vsel %vm876_vm6, %v8431_v2, -inf }
0x12d5   :  { %v3804_v32 = vsel %vm876_vm6, %v8435_v17, -inf }
0x12d6   :  { %3796 = vmax.xlane.f32.xlu0 %v3795_v27 }
0x12d7   :  { %3793 = vmax.xlane.f32.xlu1 %v3792_v39 }
0x12da   :  { %3802 = vmax.xlane.f32.xlu0 %v3801_v50 }
0x12db   :  { %3805 = vmax.xlane.f32.xlu1 %v3804_v32 }
0x12de   :  { %3808 = vmax.xlane.f32.xlu0 %v3807_v6 }
0x12ec   :  { %7073 = vrot.lane.b32.xlu1 %v7072_v48, %s7423_s21 }
0x12f4   :  { %3473 = vrot.lane.b32.xlu0 %v8368_v35, %s7423_s21 }
0x1354   :  { %v3782_v37 = vpop.xlane.xlu1 %3781 }
0x1355   :  { %v3812_v55 = vsub.f32 %v8403_v28, %v3782_v37 }
0x1357   :  { %v3826_v36 = vmul.f32 1.442695, %v3812_v55  ;;  %v3779_v61 = vpop.xlane.xlu0 %3778 }
0x1358   :  { %v3811_v1 = vsub.f32 %v3763_v51, %v3779_v61  ;;  %v3776_v5 = vpop.xlane.xlu1 %3775 }
0x1359   :  { %7287 = vpow2.f32 %v3826_v36  ;;  %v3810_v46 = vsub.f32 %v8406_v26, %v3776_v5 }
0x135a   :  { %v3824_v40 = vmul.f32 1.442695, %v3811_v1 }
0x135b   :  { %v3822_v54 = vmul.f32 1.442695, %v3810_v46  ;;  %v3791_v31 = vpop.xlane.xlu0 %3790 }
0x135c   :  { %7289 = vpow2.f32 %v3824_v40  ;;  %v3815_v47 = vsub.f32 %v8412_v19, %v3791_v31  ;;  %v3788_v41 = vpop.xlane.xlu1 %3787  ;;  %v8512_v31 = vadd.f32 %v8351_v8, %v8382_v53 }
0x135d   :  { %7291 = vpow2.f32 %v3822_v54  ;;  %v3814_v56 = vsub.f32 %v3766_v58, %v3788_v41  ;;  %v8506_v54 = vadd.f32 %v8351_v8, %v8370_v38 }
0x135e   :  { %v3832_v35 = vmul.f32 1.442695, %v3815_v47  ;;  %v8518_v47 = vadd.f32 %v8351_v8, %v8384_v33 }
0x135f   :  { %v3830_v11 = vmul.f32 1.442695, %v3814_v56  ;;  %v3785_v25 = vpop.xlane.xlu0 %3784 }
0x1360   :  { %7293 = vpow2.f32 %v3832_v35  ;;  %v3813_v28 = vsub.f32 %v3765_v10, %v3785_v25  ;;  %v3800_v21 = vpop.xlane.xlu1 %3799 }
0x1361   :  { %7295 = vpow2.f32 %v3830_v11  ;;  %v3818_v51 = vsub.f32 %v8419_v60, %v3800_v21 }
0x1362   :  { %v3828_v57 = vmul.f32 1.442695, %v3813_v28 }
0x1363   :  { %v8456_v26 = vpop.eup %7287  ;;  %v3838_v18 = vmul.f32 1.442695, %v3818_v51  ;;  %v3797_v59 = vpop.xlane.xlu0 %3796 }
0x1364   :  { %7297 = vpow2.f32 %v3828_v57  ;;  %v3817_v52 = vsub.f32 %v3769_v4, %v3797_v59  ;;  %v3794_v19 = vpop.xlane.xlu1 %3793  ;;  %v3852_v58 = vsel %vm876_vm6, %v8456_v26, 0.0 }
0x1365   :  { %7299 = vpow2.f32 %v3838_v18  ;;  %v3816_v63 = vsub.f32 %v3768_v49, %v3794_v19  ;;  %3853 = vadd.xlane.f32.xlu1 %v3852_v58 }
0x1366   :  { %v8460_v16 = vpop.eup %7289  ;;  %v3836_v10 = vmul.f32 1.442695, %v3817_v52 }
0x1367   :  { %v8462_v24 = vpop.eup %7291  ;;  %v3834_v60 = vmul.f32 1.442695, %v3816_v63  ;;  %v3803_v3 = vpop.xlane.xlu0 %3802  ;;  %v3849_v13 = vsel %vm876_vm6, %v8460_v16, 0.0 }
0x1368   :  { %7301 = vpow2.f32 %v3836_v10  ;;  %v3819_v34 = vsub.f32 %v8431_v2, %v3803_v3  ;;  %v3806_v44 = vpop.xlane.xlu1 %3805  ;;  %3850 = vadd.xlane.f32.xlu0 %v3849_v13  ;;  %v3846_v7 = vsel %vm876_vm6, %v8462_v24, 0.0 }
0x1369   :  { %7303 = vpow2.f32 %v3834_v60  ;;  %v3820_v29 = vsub.f32 %v8435_v17, %v3806_v44  ;;  %3847 = vadd.xlane.f32.xlu1 %v3846_v7 }
0x136a   :  { %v8470_v4 = vpop.eup %7293  ;;  %v3840_v15 = vmul.f32 1.442695, %v3819_v34 }
0x136b   :  { %v8472_v9 = vpop.eup %7295  ;;  %v3842_v49 = vmul.f32 1.442695, %v3820_v29  ;;  %v3809_v30 = vpop.xlane.xlu0 %3808  ;;  %v3861_v14 = vsel %vm876_vm6, %v8470_v4, 0.0 }
0x136c   :  { %7305 = vpow2.f32 %v3840_v15  ;;  %v3821_v2 = vsub.f32 %v8439_v45, %v3809_v30  ;;  %3862 = vadd.xlane.f32.xlu0 %v3861_v14  ;;  %v3858_v27 = vsel %vm876_vm6, %v8472_v9, 0.0  ;;  %v7074_v41 = vpop.permute.xlu1 %7073 }
0x136d   :  { %7307 = vpow2.f32 %v3842_v49  ;;  %3859 = vadd.xlane.f32.xlu1 %v3858_v27  ;;  %v7075_v38 = vunpack.i.l.bf16 %v7074_v41  ;;  %v7076_v56 = vunpack.i.h.bf16 %v7074_v41 }
0x136e   :  { %v7298_v17 = vpop.eup %7297  ;;  %v3844_v39 = vmul.f32 1.442695, %v3821_v2 }
0x136f   :  { %v8479_v50 = vpop.eup %7299  ;;  %v3855_v32 = vsel %vm876_vm6, %v7298_v17, 0.0  ;;  %v3474_v35 = vpop.permute.xlu0 %3473 }
0x1370   :  { %7309 = vpow2.f32 %v3844_v39  ;;  %3856 = vadd.xlane.f32.xlu0 %v3855_v32  ;;  %v3870_v6 = vsel %vm876_vm6, %v8479_v50, 0.0 }
0x1371   :  { %3871 = vadd.xlane.f32.xlu1 %v3870_v6 }
0x1372   :  { %v8484_v48 = vpop.eup %7301 }
0x1373   :  { %v8486_v45 = vpop.eup %7303  ;;  %v3867_v37 = vsel %vm876_vm6, %v8484_v48, 0.0 }
0x1374   :  { %3868 = vadd.xlane.f32.xlu0 %v3867_v37  ;;  %v3864_v55 = vsel %vm876_vm6, %v8486_v45, 0.0 }
0x1375   :  { %3865 = vadd.xlane.f32.xlu1 %v3864_v55 }
0x1376   :  { %v8492_v36 = vpop.eup %7305 }
0x1377   :  { %v8494_v61 = vpop.eup %7307  ;;  %v3873_v1 = vsel %vm876_vm6, %v8492_v36, 0.0 }
0x1378   :  { %3874 = vadd.xlane.f32.xlu0 %v3873_v1  ;;  %v3876_v5 = vsel %vm876_vm6, %v8494_v61, 0.0 }
0x1379   :  { %3877 = vadd.xlane.f32.xlu1 %v3876_v5 }
0x137a   :  { %v8500_v46 = vpop.eup %7309 }
0x137b   :  { %v3879_v40 = vsel %vm876_vm6, %v8500_v46, 0.0 }
0x137c   :  { %3880 = vadd.xlane.f32.xlu0 %v3879_v40 }
0x1392   :  { %4582 = vrot.lane.b32.xlu0 %v8506_v54, %s7421_s19 }
0x1396   :  { %4584 = vrot.lane.b32.xlu0 %v8512_v31, %s7421_s19 }
0x139a   :  { %4586 = vrot.lane.b32.xlu0 %v8518_v47, %s7421_s19 }
0x13ac   :  { %3478 = vxpose.xlu1.b32.start [1/3] (short) (narrow) %v7075_v38, 32 }
0x13b0   :  { %3479 = vxpose.xlu1.b32.cont [2/3] (short) (narrow) %v7076_v56, 32 }
0x13b4   :  { %3480 = vxpose.xlu1.b32.end [3/3] (short) (narrow) %v3474_v35, 32 }
0x13b8   :  { %4419 = vxpose.xlu0.b32.start [1/3] (short) (narrow) %v8506_v54, 32 }
0x13bc   :  { %4420 = vxpose.xlu0.b32.cont [2/3] (short) (narrow) %v8512_v31, 32 }
0x13c0   :  { %4421 = vxpose.xlu0.b32.end [3/3] (short) (narrow) %v8518_v47, 32 }
0x13f2   :  { %v3854_v53 = vpop.xlane.xlu1 %3853 }
0x13f5   :  { %v3851_v11 = vpop.xlane.xlu0 %3850 }
0x13f6   :  { %7311 = vrcp.f32 %v3851_v11  ;;  %v3848_v8 = vpop.xlane.xlu1 %3847 }
0x13f7   :  { %7313 = vrcp.f32 %v3848_v8 }
0x13f9   :  { %v3863_v33 = vpop.xlane.xlu0 %3862 }
0x13fa   :  { %v3860_v25 = vpop.xlane.xlu1 %3859 }
0x13fb   :  { %7315 = vrcp.f32 %v3860_v25 }
0x13fd   :  { %v3857_v28 = vpop.xlane.xlu0 %3856 }
0x13fe   :  { %7317 = vrcp.f32 %v3857_v28  ;;  %v3872_v3 = vpop.xlane.xlu1 %3871 }
0x13ff   :  { %7319 = vrcp.f32 %v3854_v53 }
0x1400   :  { %v7312_v21 = vpop.eup %7311 }
0x1401   :  { %v7314_v51 = vpop.eup %7313  ;;  %v3895_v57 = vmul.f32 %v7312_v21, %v8460_v16  ;;  %v3869_v60 = vpop.xlane.xlu0 %3868 }
0x1402   :  { %v3894_v18 = vmul.f32 %v7314_v51, %v8462_v24  ;;  %v3866_v34 = vpop.xlane.xlu1 %3865  ;;  %7321 = vrcp.f32 %v3869_v60  ;;  %v6198_v60 = vld [vmem:[%s9007_s7 + $0x18] sm:$0xf] }
0x1403   :  { %7323 = vrcp.f32 %v3866_v34 }
0x1404   :  { %v3906_v59 = vpack.c.bf16 %v3895_v57, %v3894_v18  ;;  %7325 = vrcp.f32 %v3863_v33 }
0x1405   :  { %v7316_v52 = vpop.eup %7315  ;;  %v3875_v13 = vpop.xlane.xlu0 %3874 }
0x1406   :  { %6739 = vmatprep.mubr.msk.bf16.mxu1 %vm876_vm6, %v3906_v59  ;;  %v3898_v63 = vmul.f32 %v7316_v52, %v8472_v9  ;;  %v3878_v16 = vpop.xlane.xlu1 %3877  ;;  %7327 = vrcp.f32 %v3875_v13 }
0x1407   :  { %7329 = vrcp.f32 %v3878_v16 }
0x1408   :  { %v7318_v19 = vpop.eup %7317  ;;  %7331 = vrcp.f32 %v3872_v3  ;;  %v6199_v3 = vld [vmem:[%s9007_s7 + $0x1c] sm:$0xf] }
0x1409   :  { %v3897_v58 = vmul.f32 %v7318_v19, %v7298_v17  ;;  %v3881_v44 = vpop.xlane.xlu0 %3880  ;;  %v7320_v29 = vpop.eup %7319 }
0x140a   :  { %7333 = vrcp.f32 %v3881_v44  ;;  %v3896_v39 = vmul.f32 %v7320_v29, %v8456_v26 }
0x140b   :  { %v3908_v10 = vpack.c.bf16 %v3898_v63, %v3897_v58  ;;  %v6196_v58 = vld [vmem:[%s9007_s7 + $0x10] sm:$0xf]  ;;  %v6197_v63 = vld [vmem:[%s9007_s7 + $0x14] sm:$0xf] }
0x140c   :  { %v7322_v9 = vpop.eup %7321  ;;  %v3907_v56 = vpack.c.bf16 %v3896_v39, %v3896_v39 }
0x140d   :  { %6745 = vmatprep.mubr.msk.bf16.mxu0 %vm876_vm6, %v3908_v10  ;;  %v4583_v24 = vpop.permute.xlu0 %4582  ;;  %v7324_v30 = vpop.eup %7323  ;;  %v3901_v37 = vmul.f32 %v7322_v9, %v8484_v48  ;;  %v4223_v10 = vsel %vm629_vm4, %v6197_v63, 0 }
0x140e   :  { %v7326_v27 = vpop.eup %7325  ;;  %v3900_v6 = vmul.f32 %v7324_v30, %v8486_v45 }
0x140f   :  { %v3899_v41 = vmul.f32 %v7326_v27, %v8470_v4 }
0x1410   :  { %v7328_v32 = vpop.eup %7327  ;;  %v3910_v53 = vpack.c.bf16 %v3901_v37, %v3900_v6 }
0x1411   :  { %v4585_v49 = vpop.permute.xlu0 %4584  ;;  %v7330_v55 = vpop.eup %7329  ;;  %v3903_v26 = vmul.f32 %v7328_v32, %v8492_v36  ;;  %v3909_v33 = vpack.c.bf16 %v3899_v41, %v3899_v41 }
0x1412   :  { %v7332_v35 = vpop.eup %7331  ;;  %v3904_v45 = vmul.f32 %v7330_v55, %v8494_v61 }
0x1413   :  { %v3902_v25 = vmul.f32 %v7332_v35, %v8479_v50 }
0x1414   :  { %v7334_v28 = vpop.eup %7333  ;;  %v3912_v21 = vpack.c.bf16 %v3904_v45, %v3903_v26  ;;  %v4280_v26 = vsel %vm629_vm4, %v6198_v60, 0 }
0x1415   :  { %v4587_v5 = vpop.permute.xlu0 %4586  ;;  %v3905_v51 = vmul.f32 %v7334_v28, %v8500_v46  ;;  %v3911_v18 = vpack.c.bf16 %v3902_v25, %v3902_v25  ;;  %v4166_v46 = vsel %vm629_vm4, %v6196_v58, 0 }
0x1417   :  { %v3913_v59 = vpack.c.bf16 %v3905_v51, %v3905_v51 }
0x142c   :  { %v3494_v7 = vpop.trf.xlu1 }
0x142d   :  { %v3914_v15 = vpack.c.bf16 %v3494_v7, %v3494_v7 }
0x142f   :  { %v3925_v14 = vsel %vm876_vm6, %v3914_v15, 0  ;;  %6935 = vmatprep.subr.msk.bf16.mxu1 %vm876_vm6, %v3914_v15 }
0x1430   :  { %6738 = vmatpush3.bf16.xpose.msra.mxu1 %v3925_v14  ;;  %v3495_v2 = vpop.trf.xlu1 }
0x1431   :  { %v3915_v17 = vpack.c.bf16 %v3495_v2, %v3495_v2 }
0x1433   :  { %v3982_v1 = vsel %vm876_vm6, %v3915_v17, 0  ;;  %6936 = vmatprep.subr.msk.bf16.mxu0 %vm876_vm6, %v3915_v17 }
0x1434   :  { %6744 = vmatpush3.bf16.xpose.msra.mxu0 %v3982_v1  ;;  %v3496_v40 = vpop.trf.xlu1 }
0x1435   :  { %v3916_v38 = vpack.c.bf16 %v3496_v40, %v3496_v40 }
0x1437   :  { %v4039_v48 = vsel %vm876_vm6, %v3916_v38, 0  ;;  %6740 = vmatmul.mubr.msk.bf16.vlgmr.msra.gmra.mrb[100].mxu1 %vm876_vm6, %v3907_v56  ;;  %6937 = vmatprep.subr.msk.bf16.mxu1 %vm876_vm6, %v3916_v38 }
0x1438   :  { %v3497_v11 = vpop.trf.xlu1  ;;  %6750 = vmatpush3.bf16.xpose.msra.mxu1 %v4039_v48  ;;  %6751 = vmatprep.mubr.msk.bf16.mxu1 %vm876_vm6, %v3910_v53  ;;  %v4435_v8 = vpop.trf.xlu0 }
0x1439   :  { %v3917_v4 = vpack.c.bf16 %v3497_v11, %v3497_v11  ;;  %6939 = vmatprep.subr.msk.bf16.mxu1 %vm629_vm4, %v6196_v58 }
0x143b   :  { %v4096_v36 = vsel %vm876_vm6, %v3917_v4, 0  ;;  %6746 = vmatmul.mubr.msk.bf16.vlgmr.msra.gmra.mrb[72].mxu0 %vm876_vm6, %v3909_v33  ;;  %6938 = vmatprep.subr.msk.bf16.mxu0 %vm876_vm6, %v3917_v4 }
0x143c   :  { %6756 = vmatpush3.bf16.xpose.msra.mxu0 %v4096_v36  ;;  %6757 = vmatprep.mubr.msk.bf16.mxu0 %vm876_vm6, %v3912_v21  ;;  %v4436_v61 = vpop.trf.xlu0  ;;  %v4337_v21 = vsel %vm629_vm4, %v6199_v3, 0 }
0x143d   :  { %v7077_v57 = vpack.i.bf16 %v4436_v61, %v4435_v8  ;;  %6940 = vmatprep.subr.msk.bf16.mxu0 %vm629_vm4, %v6197_v63 }
0x143f   :  { %6752 = vmatmul.mubr.msk.bf16.vlgmr.msra.gmra.mrb[104].mxu1 %vm876_vm6, %v3911_v18  ;;  %7078 = vxpose.xlu1.b32.start.end [1/1] (short) (narrow) %v7077_v57, 24 }
0x1440   :  { %v4437_v50 = vpop.trf.xlu0  ;;  %6762 = vmatpush3.bf16.msra.mxu1 %v4166_v46 }
0x1441   :  { %6941 = vmatprep.subr.msk.bf16.mxu1 %vm629_vm4, %v6198_v60 }
0x1443   :  { %6758 = vmatmul.mubr.msk.bf16.vlgmr.msra.gmra.mrb[76].mxu0 %vm876_vm6, %v3913_v59 }
0x1444   :  { %v4438_v52 = vpop.trf.xlu0  ;;  %6768 = vmatpush3.bf16.msra.mxu0 %v4223_v10 }
0x1445   :  { %v7094_v19 = vpack.i.bf16 %v4438_v52, %v4437_v50  ;;  %6942 = vmatprep.subr.msk.bf16.mxu0 %vm629_vm4, %v6199_v3 }
0x1447   :  { %7095 = vxpose.xlu0.b32.start.end [1/1] (short) (narrow) %v7094_v19, 24 }
0x1448   :  { %4591 = vxpose.xlu1.b32.start [1/3] (short) (narrow) %v4583_v24, 32 }
0x144c   :  { %4592 = vxpose.xlu1.b32.cont [2/3] (short) (narrow) %v4585_v49, 32 }
0x1450   :  { %4593 = vxpose.xlu1.b32.end [3/3] (short) (narrow) %v4587_v5, 32 }
0x14bf   :  { %v7079_v13 = vpop.trf.xlu1 }
0x14c0   :  { %v7083_v34 = vunpack.i.h.bf16 %v7079_v13  ;;  %v7080_v44 = vunpack.i.l.bf16 %v7079_v13 }
0x14c3   :  { %v7084_v16 = vpop.trf.xlu1 }
0x14c4   :  { %v7088_v24 = vunpack.i.h.bf16 %v7084_v16  ;;  %v7085_v7 = vunpack.i.l.bf16 %v7084_v16 }
0x14c6   :  { %v4664_v29 = vpack.c.bf16 %v7085_v7, %v7080_v44  ;;  %v8570_v15 = vpack.c.bf16 %v7088_v24, %v7083_v34 }
0x14c7   :  { %v8572_v9 = vpop.trf.xlu1  ;;  %v7096_v49 = vpop.trf.xlu0 }
0x14c8   :  { %v7100_v30 = vunpack.i.h.bf16 %v7096_v49  ;;  %v7097_v14 = vunpack.i.l.bf16 %v7096_v49  ;;  %v7090_v3 = vunpack.i.l.bf16 %v8572_v9  ;;  %v7093_v44 = vunpack.i.h.bf16 %v8572_v9 }
0x14ca   :  { %v4665_v16 = vpack.c.bf16 %v7090_v3, %v7090_v3 }
0x14cb   :  { %v7101_v2 = vpop.trf.xlu0  ;;  %v4607_v37 = vpop.trf.xlu1 }
0x14cc   :  { %v7105_v27 = vunpack.i.h.bf16 %v7101_v2  ;;  %v7102_v17 = vunpack.i.l.bf16 %v7101_v2  ;;  %v4672_v45 = vpack.c.bf16 %v4607_v37, %v4607_v37 }
0x14ce   :  { %v8574_v39 = vpack.c.bf16 %v7105_v27, %v7100_v30  ;;  %v4668_v6 = vpack.c.bf16 %v7102_v17, %v7097_v14  ;;  %v4683_v52 = vsel %vm629_vm4, %v4672_v45, 0 }
0x14cf   :  { %v8576_v32 = vpop.trf.xlu0  ;;  %v4608_v40 = vpop.trf.xlu1 }
0x14d0   :  { %v4673_v36 = vpack.c.bf16 %v4608_v40, %v4608_v40  ;;  %v7107_v7 = vunpack.i.l.bf16 %v8576_v32 }
0x14d2   :  { %v4740_v13 = vsel %vm629_vm4, %v4673_v36, 0  ;;  %v4669_v9 = vpack.c.bf16 %v7107_v7, %v7107_v7 }
0x14d3   :  { %v4609_v33 = vpop.trf.xlu1 }
0x14d4   :  { %v4674_v19 = vpack.c.bf16 %v4609_v33, %v4609_v33 }
0x14d6   :  { %v4797_v24 = vsel %vm629_vm4, %v4674_v19, 0 }
0x14d7   :  { %v4610_v46 = vpop.trf.xlu1 }
0x14d8   :  { %v4675_v34 = vpack.c.bf16 %v4610_v46, %v4610_v46 }
0x14da   :  { %v4854_v49 = vsel %vm629_vm4, %v4675_v34, 0 }
0x150a   :  { %v6741_v55 = vpop.f32.mrb[100].mxu1 }
0x150b   :  { %v3961_v1 = vpop.f32.mrb[101].mxu1  ;;  %v4147_v35 = vpack.c.bf16 %v6741_v55, %v6741_v55 }
0x150c   :  { %v6742_v5 = vpop.f32.mrb[102].mxu1 }
0x150d   :  { %v3964_v41 = vpop.f32.mrb[103].mxu1 }
0x150e   :  { %v4146_v38 = vpack.c.bf16 %v3964_v41, %v3961_v1  ;;  %v6747_v56 = vpop.f32.mrb[72].mxu0 }
0x150f   :  { %v4018_v53 = vpop.f32.mrb[73].mxu0  ;;  %v4149_v25 = vpack.c.bf16 %v6747_v56, %v6747_v56 }
0x1510   :  { %v6748_v48 = vpop.f32.mrb[74].mxu0  ;;  %6763 = vmatprep.mubr.msk.bf16.mxu1 %vm622_vm3, %v4146_v38 }
0x1511   :  { %v4021_v11 = vpop.f32.mrb[75].mxu0  ;;  %6764 = vmatmul.mubr.msk.bf16.vlgmr.msra.gmra.mrb[108].mxu1 %vm622_vm3, %v4147_v35 }
0x1512   :  { %v4148_v8 = vpack.c.bf16 %v4021_v11, %v4018_v53  ;;  %v6753_v4 = vpop.f32.mrb[104].mxu1  ;;  %6774 = vmatpush3.bf16.msra.mxu1 %v4280_v26 }
0x1513   :  { %v4075_v28 = vpop.f32.mrb[105].mxu1  ;;  %6943 = vmatprep.subr.msk.bf16.mxu1 %vm629_vm4, %v4672_v45  ;;  %v4151_v50 = vpack.c.bf16 %v6753_v4, %v6753_v4 }
0x1514   :  { %v6754_v61 = vpop.f32.mrb[106].mxu1  ;;  %6769 = vmatprep.mubr.msk.bf16.mxu0 %vm622_vm3, %v4148_v8 }
0x1515   :  { %v4078_v51 = vpop.f32.mrb[107].mxu1  ;;  %6770 = vmatmul.mubr.msk.bf16.vlgmr.msra.gmra.mrb[80].mxu0 %vm622_vm3, %v4149_v25 }
0x1516   :  { %v4150_v57 = vpack.c.bf16 %v4078_v51, %v4075_v28  ;;  %v6759_v18 = vpop.f32.mrb[76].mxu0  ;;  %6780 = vmatpush3.bf16.msra.mxu0 %v4337_v21 }
0x1517   :  { %v4132_v59 = vpop.f32.mrb[77].mxu0  ;;  %6944 = vmatprep.subr.msk.bf16.mxu0 %vm629_vm4, %v4673_v36  ;;  %v4153_v60 = vpack.c.bf16 %v6759_v18, %v6759_v18 }
0x1518   :  { %v6760_v58 = vpop.f32.mrb[78].mxu0  ;;  %6775 = vmatprep.mubr.msk.bf16.mxu1 %vm622_vm3, %v4150_v57 }
0x1519   :  { %v4135_v63 = vpop.f32.mrb[79].mxu0  ;;  %6776 = vmatmul.mubr.msk.bf16.vlgmr.msra.gmra.mrb[112].mxu1 %vm622_vm3, %v4151_v50 }
0x151a   :  { %v4152_v10 = vpack.c.bf16 %v4135_v63, %v4132_v59  ;;  %6786 = vmatpush3.bf16.msra.mxu1 %v4683_v52  ;;  %6787 = vmatprep.mubr.msk.bf16.mxu1 %vm622_vm3, %v4664_v29  ;;  %v4667_v29 = vpack.c.bf16 %v7093_v44, %v7093_v44 }
0x151b   :  { %6945 = vmatprep.subr.msk.bf16.mxu1 %vm629_vm4, %v4674_v19 }
0x151c   :  { %6781 = vmatprep.mubr.msk.bf16.mxu0 %vm622_vm3, %v4152_v10 }
0x151d   :  { %6782 = vmatmul.mubr.msk.bf16.vlgmr.msra.gmra.mrb[84].mxu0 %vm622_vm3, %v4153_v60 }
0x151e   :  { %6792 = vmatpush3.bf16.msra.mxu0 %v4740_v13  ;;  %6793 = vmatprep.mubr.msk.bf16.mxu0 %vm622_vm3, %v8570_v15  ;;  %v7110_v15 = vunpack.i.h.bf16 %v8576_v32 }
0x151f   :  { %6946 = vmatprep.subr.msk.bf16.mxu0 %vm629_vm4, %v4675_v34 }
0x1520   :  { %v4671_v30 = vpack.c.bf16 %v7110_v15, %v7110_v15 }
0x1521   :  { %6788 = vmatmul.mubr.msk.bf16.vlgmr.msra.gmra.mrb[116].mxu1 %vm622_vm3, %v4665_v16 }
0x1522   :  { %6798 = vmatpush3.bf16.msra.mxu1 %v4797_v24  ;;  %6799 = vmatprep.mubr.msk.bf16.mxu1 %vm622_vm3, %v4668_v6 }
0x1525   :  { %6794 = vmatmul.mubr.msk.bf16.vlgmr.msra.gmra.mrb[88].mxu0 %vm622_vm3, %v4667_v29 }
0x1526   :  { %6804 = vmatpush3.bf16.msra.mxu0 %v4854_v49  ;;  %6805 = vmatprep.mubr.msk.bf16.mxu0 %vm622_vm3, %v8574_v39 }
0x1529   :  { %6800 = vmatmul.mubr.msk.bf16.vlgmr.msra.gmra.mrb[120].mxu1 %vm622_vm3, %v4669_v9 }
0x152d   :  { %6806 = vmatmul.mubr.msk.bf16.vlgmr.msra.gmra.mrb[92].mxu0 %vm622_vm3, %v4671_v30 }
0x15e4   :  { %v6765_v14 = vpop.f32.mrb[108].mxu1 }
0x15e5   :  { %v4202_v2 = vpop.f32.mrb[109].mxu1  ;;  %v4401_v37 = vsel %vm169_vm2, %v6765_v14, 0.0 }
0x15e6   :  { %v6766_v27 = vpop.f32.mrb[110].mxu1  ;;  %v4387_v1 = vsel %vm169_vm2, %v4202_v2, 0.0 }
0x15e7   :  { %v4205_v17 = vpop.f32.mrb[111].mxu1 }
0x15e8   :  { %v6771_v6 = vpop.f32.mrb[80].mxu0  ;;  %v4394_v56 = vsel %vm169_vm2, %v4205_v17, 0.0 }
0x15e9   :  { %v4402_v55 = vsel %vm169_vm2, %v6771_v6, 0.0  ;;  %v4259_v32 = vpop.f32.mrb[81].mxu0 }
0x15ea   :  { %v4403_v5 = vadd.f32 %v4402_v55, %v4401_v37  ;;  %v4388_v39 = vsel %vm169_vm2, %v4259_v32, 0.0  ;;  %v6772_v40 = vpop.f32.mrb[82].mxu0 }
0x15eb   :  { %v4389_v41 = vadd.f32 %v4388_v39, %v4387_v1  ;;  %v4262_v38 = vpop.f32.mrb[83].mxu0 }
0x15ec   :  { %v4395_v35 = vsel %vm169_vm2, %v4262_v38, 0.0  ;;  %v6777_v53 = vpop.f32.mrb[112].mxu1 }
0x15ed   :  { %v4396_v26 = vadd.f32 %v4395_v35, %v4394_v56  ;;  %v4404_v45 = vsel %vm169_vm2, %v6777_v53, 0.0  ;;  %v4316_v48 = vpop.f32.mrb[113].mxu1 }
0x15ee   :  { %v4405_v11 = vadd.f32 %v4404_v45, %v4403_v5  ;;  %v4390_v8 = vsel %vm169_vm2, %v4316_v48, 0.0  ;;  %v6778_v4 = vpop.f32.mrb[114].mxu1 }
0x15ef   :  { %v4391_v33 = vadd.f32 %v4390_v8, %v4389_v41  ;;  %v4319_v25 = vpop.f32.mrb[115].mxu1 }
0x15f0   :  { %v4397_v28 = vsel %vm169_vm2, %v4319_v25, 0.0  ;;  %v6783_v21 = vpop.f32.mrb[84].mxu0 }
0x15f1   :  { %v4398_v36 = vadd.f32 %v4397_v28, %v4396_v26  ;;  %v4406_v61 = vsel %vm169_vm2, %v6783_v21, 0.0  ;;  %v4373_v51 = vpop.f32.mrb[85].mxu0 }
0x15f2   :  { %v8620_v57 = vadd.f32 %v4406_v61, %v4405_v11  ;;  %v4392_v18 = vsel %vm169_vm2, %v4373_v51, 0.0  ;;  %v6784_v50 = vpop.f32.mrb[86].mxu0 }
0x15f3   :  { %v8623_v59 = vadd.f32 %v4392_v18, %v4391_v33  ;;  %v4376_v52 = vpop.f32.mrb[87].mxu0 }
0x15f4   :  { %v4399_v19 = vsel %vm169_vm2, %v4376_v52, 0.0  ;;  %v6789_v58 = vpop.f32.mrb[116].mxu1 }
0x15f5   :  { %v8626_v46 = vadd.f32 %v4399_v19, %v4398_v36  ;;  %v4906_v63 = vmul.f32 0.35355338, %v6789_v58  ;;  %v4719_v10 = vpop.f32.mrb[117].mxu1 }
0x15f6   :  { %v4904_v60 = vmul.f32 0.35355338, %v4719_v10  ;;  %v6790_v3 = vpop.f32.mrb[118].mxu1  ;;  %v7111_v10 = vpack.i.bf16 %v8512_v31, %v8506_v54 }
0x15f7   :  { %v8629_v13 = vadd.f32 %v4906_v63, %v7687_v23  ;;  %v4722_v34 = vpop.f32.mrb[119].mxu1 }
0x15f8   :  { %v8632_v44 = vadd.f32 %v4904_v60, %v7687_v23  ;;  %v4905_v16 = vmul.f32 0.35355338, %v4722_v34  ;;  %v6795_v24 = vpop.f32.mrb[88].mxu0 }
0x15f9   :  { %v4909_v7 = vmul.f32 0.35355338, %v6795_v24  ;;  %v4776_v29 = vpop.f32.mrb[89].mxu0  ;;  %v4934_v49 = vsel %vm876_vm6, %v8629_v13, -inf }
0x15fa   :  { %v8637_v15 = vadd.f32 %v4905_v16, %v7687_v23  ;;  %v6796_v9 = vpop.f32.mrb[90].mxu0  ;;  %4935 = vmax.xlane.f32.xlu1 %v4934_v49  ;;  %v4928_v30 = vsel %vm876_vm6, %v8632_v44, -inf  ;;  %v4907_v37 = vmul.f32 0.35355338, %v4776_v29 }
0x15fb   :  { %v4779_v14 = vpop.f32.mrb[91].mxu0  ;;  %4929 = vmax.xlane.f32.xlu0 %v4928_v30  ;;  %v4921_v6 = vadd.f32 %v4909_v7, %v7687_v23 }
0x15fc   :  { %v4908_v2 = vmul.f32 0.35355338, %v4779_v14  ;;  %v4931_v27 = vsel %vm876_vm6, %v8637_v15, -inf  ;;  %v6801_v17 = vpop.f32.mrb[120].mxu1  ;;  %v4919_v35 = vadd.f32 %v4907_v37, %v7687_v23 }
0x15fd   :  { %v4912_v55 = vmul.f32 0.35355338, %v6801_v17  ;;  %v4833_v32 = vpop.f32.mrb[121].mxu1  ;;  %v4943_v53 = vsel %vm876_vm6, %v4921_v6, -inf }
0x15fe   :  { %v4920_v1 = vadd.f32 %v4908_v2, %v7687_v23  ;;  %4932 = vmax.xlane.f32.xlu1 %v4931_v27  ;;  %v6802_v5 = vpop.f32.mrb[122].mxu1  ;;  %v4910_v38 = vmul.f32 0.35355338, %v4833_v32  ;;  %v4937_v21 = vsel %vm876_vm6, %v4919_v35, -inf }
0x15ff   :  { %v4924_v39 = vadd.f32 %v4912_v55, %v7687_v23  ;;  %v4836_v40 = vpop.f32.mrb[123].mxu1 }
0x1600   :  { %v4940_v41 = vsel %vm876_vm6, %v4920_v1, -inf  ;;  %v6807_v56 = vpop.f32.mrb[92].mxu0  ;;  %v4911_v26 = vmul.f32 0.35355338, %v4836_v40  ;;  %v4922_v4 = vadd.f32 %v4910_v38, %v7687_v23 }
0x1601   :  { %4941 = vmax.xlane.f32.xlu0 %v4940_v41  ;;  %v4890_v45 = vpop.f32.mrb[93].mxu0  ;;  %v4952_v48 = vsel %vm876_vm6, %v4924_v39, -inf  ;;  %v4915_v51 = vmul.f32 0.35355338, %v6807_v56 }
0x1602   :  { %4944 = vmax.xlane.f32.xlu1 %v4943_v53  ;;  %v6808_v11 = vpop.f32.mrb[94].mxu0  ;;  %v4923_v25 = vadd.f32 %v4911_v26, %v7687_v23  ;;  %v4913_v28 = vmul.f32 0.35355338, %v4890_v45  ;;  %v4946_v61 = vsel %vm876_vm6, %v4922_v4, -inf }
0x1603   :  { %v4893_v8 = vpop.f32.mrb[95].mxu0  ;;  %v8664_v19 = vadd.f32 %v4915_v51, %v7687_v23 }
0x1604   :  { %v4914_v33 = vmul.f32 0.35355338, %v4893_v8  ;;  %v8658_v18 = vadd.f32 %v4913_v28, %v7687_v23  ;;  %v4949_v50 = vsel %vm876_vm6, %v4923_v25, -inf }
0x1605   :  { %4953 = vmax.xlane.f32.xlu0 %v4952_v48  ;;  %v4961_v63 = vsel %vm876_vm6, %v8664_v19, -inf }
0x1606   :  { %4938 = vmax.xlane.f32.xlu1 %v4937_v21  ;;  %v8654_v36 = vadd.f32 %v4914_v33, %v7687_v23  ;;  %v4955_v58 = vsel %vm876_vm6, %v8658_v18, -inf }
0x1608   :  { %v4958_v52 = vsel %vm876_vm6, %v8654_v36, -inf }
0x1609   :  { %4947 = vmax.xlane.f32.xlu0 %v4946_v61 }
0x160a   :  { %4950 = vmax.xlane.f32.xlu1 %v4949_v50 }
0x160d   :  { %4959 = vmax.xlane.f32.xlu0 %v4958_v52 }
0x160e   :  { %4956 = vmax.xlane.f32.xlu1 %v4955_v58 }
0x1612   :  { %4962 = vmax.xlane.f32.xlu1 %v4961_v63 }
0x1623   :  { %7112 = vrot.lane.b32.xlu0 %v7111_v10, %s7423_s21  ;;  %4627 = vrot.lane.b32.xlu1 %v8518_v47, %s7423_s21 }
0x1687   :  { %v4936_v60 = vpop.xlane.xlu1 %4935 }
0x1688   :  { %v4966_v23 = vsub.f32 %v8629_v13, %v4936_v60  ;;  %v4930_v3 = vpop.xlane.xlu0 %4929  ;;  %v8717_v60 = vld [vmem:[%s9008_s8 + $0x1] ss:$0 sm:$0xff] }
0x1689   :  { %v4964_v34 = vsub.f32 %v8632_v44, %v4930_v3 }
0x168a   :  { %v4980_v16 = vmul.f32 1.442695, %v4966_v23 }
0x168b   :  { %v4976_v24 = vmul.f32 1.442695, %v4964_v34  ;;  %v4933_v7 = vpop.xlane.xlu1 %4932 }
0x168c   :  { %7335 = vpow2.f32 %v4980_v16  ;;  %v4965_v29 = vsub.f32 %v8637_v15, %v4933_v7  ;;  %v4416_v16 = vadd.f32 %v8717_v60, %v8623_v59  ;;  %v4418_v59 = vadd.f32 %v8717_v60, %v8620_v57 }
0x168d   :  { %7337 = vpow2.f32 %v4976_v24 }
0x168e   :  { %v4978_v49 = vmul.f32 1.442695, %v4965_v29  ;;  %v4942_v54 = vpop.xlane.xlu0 %4941  ;;  %v8732_v29 = vadd.f32 %v4416_v16, %v8273_v22  ;;  %v8746_v22 = vadd.f32 %v4418_v59, %v8287_v12 }
0x168f   :  { %v4968_v31 = vsub.f32 %v4920_v1, %v4942_v54  ;;  %v4945_v9 = vpop.xlane.xlu1 %4944 }
0x1690   :  { %7339 = vpow2.f32 %v4978_v49  ;;  %v4969_v30 = vsub.f32 %v4921_v6, %v4945_v9  ;;  %v4417_v49 = vadd.f32 %v8717_v60, %v8626_v46  ;;  %v5581_v9 = vsel %vm169_vm2, %v8732_v29, 0.0 }
0x1691   :  { %v4984_v47 = vmul.f32 1.442695, %v4968_v31 }
0x1692   :  { %v4986_v14 = vmul.f32 1.442695, %v4969_v30  ;;  %v4954_v2 = vpop.xlane.xlu0 %4953  ;;  %v8741_v31 = vadd.f32 %v4417_v49, %v8277_v20  ;;  %v5587_v30 = vsel %vm169_vm2, %v8746_v22, 0.0 }
0x1693   :  { %7341 = vpow2.f32 %v4984_v47  ;;  %v4972_v13 = vsub.f32 %v4924_v39, %v4954_v2  ;;  %v4939_v27 = vpop.xlane.xlu1 %4938 }
0x1694   :  { %7343 = vpow2.f32 %v4986_v14  ;;  %v4967_v44 = vsub.f32 %v4919_v35, %v4939_v27  ;;  %v5584_v46 = vsel %vm169_vm2, %v8741_v31, 0.0 }
0x1695   :  { %v4992_v17 = vmul.f32 1.442695, %v4972_v13 }
0x1696   :  { %v8678_v37 = vpop.eup %7335  ;;  %v4982_v55 = vmul.f32 1.442695, %v4967_v44  ;;  %v4948_v15 = vpop.xlane.xlu0 %4947 }
0x1697   :  { %v8680_v32 = vpop.eup %7337  ;;  %7345 = vpow2.f32 %v4992_v17  ;;  %v4970_v1 = vsub.f32 %v4922_v4, %v4948_v15  ;;  %v4951_v5 = vpop.xlane.xlu1 %4950  ;;  %v5006_v6 = vsel %vm876_vm6, %v8678_v37, 0.0 }
0x1698   :  { %7347 = vpow2.f32 %v4982_v55  ;;  %v4971_v40 = vsub.f32 %v4923_v25, %v4951_v5  ;;  %5007 = vadd.xlane.f32.xlu0 %v5006_v6  ;;  %v5000_v39 = vsel %vm876_vm6, %v8680_v32, 0.0 }
0x1699   :  { %v4988_v41 = vmul.f32 1.442695, %v4970_v1  ;;  %5001 = vadd.xlane.f32.xlu1 %v5000_v39 }
0x169a   :  { %v8686_v38 = vpop.eup %7339  ;;  %v4990_v56 = vmul.f32 1.442695, %v4971_v40  ;;  %v4960_v35 = vpop.xlane.xlu0 %4959 }
0x169b   :  { %7349 = vpow2.f32 %v4988_v41  ;;  %v4974_v53 = vsub.f32 %v8654_v36, %v4960_v35  ;;  %v4957_v26 = vpop.xlane.xlu1 %4956  ;;  %v5003_v45 = vsel %vm876_vm6, %v8686_v38, 0.0 }
0x169c   :  { %7351 = vpow2.f32 %v4990_v56  ;;  %v4973_v48 = vsub.f32 %v8658_v18, %v4957_v26  ;;  %5004 = vadd.xlane.f32.xlu0 %v5003_v45 }
0x169d   :  { %v8692_v11 = vpop.eup %7341  ;;  %v4996_v8 = vmul.f32 1.442695, %v4974_v53 }
0x169e   :  { %v8694_v4 = vpop.eup %7343  ;;  %v4994_v33 = vmul.f32 1.442695, %v4973_v48  ;;  %v5012_v25 = vsel %vm876_vm6, %v8692_v11, 0.0  ;;  %v7113_v47 = vpop.permute.xlu0 %7112 }
0x169f   :  { %7353 = vpow2.f32 %v4996_v8  ;;  %v4963_v28 = vpop.xlane.xlu1 %4962  ;;  %v5015_v21 = vsel %vm876_vm6, %v8694_v4, 0.0  ;;  %v7114_v57 = vunpack.i.l.bf16 %v7113_v47  ;;  %v7115_v20 = vunpack.i.h.bf16 %v7113_v47 }
0x16a0   :  { %7355 = vpow2.f32 %v4994_v33  ;;  %v4975_v36 = vsub.f32 %v8664_v19, %v4963_v28  ;;  %5013 = vadd.xlane.f32.xlu0 %v5012_v25  ;;  %5016 = vadd.xlane.f32.xlu1 %v5015_v21 }
0x16a1   :  { %v8701_v61 = vpop.eup %7345 }
0x16a2   :  { %v7348_v51 = vpop.eup %7347  ;;  %v4998_v18 = vmul.f32 1.442695, %v4975_v36  ;;  %v5024_v50 = vsel %vm876_vm6, %v8701_v61, 0.0 }
0x16a3   :  { %v5009_v52 = vsel %vm876_vm6, %v7348_v51, 0.0  ;;  %v4628_v14 = vpop.permute.xlu1 %4627 }
0x16a4   :  { %7357 = vpow2.f32 %v4998_v18  ;;  %5025 = vadd.xlane.f32.xlu0 %v5024_v50  ;;  %5010 = vadd.xlane.f32.xlu1 %v5009_v52 }
0x16a5   :  { %v8706_v58 = vpop.eup %7349 }
0x16a6   :  { %v8708_v63 = vpop.eup %7351  ;;  %v5018_v19 = vsel %vm876_vm6, %v8706_v58, 0.0 }
0x16a7   :  { %v5021_v10 = vsel %vm876_vm6, %v8708_v63, 0.0 }
0x16a8   :  { %5019 = vadd.xlane.f32.xlu0 %v5018_v19  ;;  %5022 = vadd.xlane.f32.xlu1 %v5021_v10 }
0x16a9   :  { %v8719_v23 = vpop.eup %7353 }
0x16aa   :  { %v8721_v3 = vpop.eup %7355  ;;  %v5030_v34 = vsel %vm876_vm6, %v8719_v23, 0.0 }
0x16ab   :  { %v5027_v24 = vsel %vm876_vm6, %v8721_v3, 0.0 }
0x16ac   :  { %5031 = vadd.xlane.f32.xlu0 %v5030_v34  ;;  %5028 = vadd.xlane.f32.xlu1 %v5027_v24 }
0x16ae   :  { %v8729_v7 = vpop.eup %7357 }
0x16af   :  { %v5033_v54 = vsel %vm876_vm6, %v8729_v7, 0.0 }
0x16b0   :  { %5034 = vadd.xlane.f32.xlu1 %v5033_v54 }
0x16b4   :  { %5582 = vadd.xlane.f32.xlu1 %v5581_v9 }
0x16b8   :  { %5585 = vadd.xlane.f32.xlu1 %v5584_v46 }
0x16bc   :  { %5588 = vadd.xlane.f32.xlu1 %v5587_v30 }
0x16d9   :  { %4632 = vxpose.xlu0.b32.start [1/3] (short) (narrow) %v7114_v57, 32 }
0x16dd   :  { %4633 = vxpose.xlu0.b32.cont [2/3] (short) (narrow) %v7115_v20, 32 }
0x16e1   :  { %4634 = vxpose.xlu0.b32.end [3/3] (short) (narrow) %v4628_v14, 32 }
0x1725   :  { %v5008_v2 = vpop.xlane.xlu0 %5007 }
0x1726   :  { %v5002_v13 = vpop.xlane.xlu1 %5001 }
0x1727   :  { %7359 = vrcp.f32 %v5002_v13 }
0x1729   :  { %v5005_v12 = vpop.xlane.xlu0 %5004 }
0x172a   :  { %7361 = vrcp.f32 %v5005_v12 }
0x172d   :  { %v5017_v27 = vpop.xlane.xlu1 %5016  ;;  %v5014_v44 = vpop.xlane.xlu0 %5013 }
0x172e   :  { %7363 = vrcp.f32 %v5014_v44  ;;  %v6228_v44 = vld [vmem:[%s9007_s7 + $0x18] sm:$0xf] }
0x1731   :  { %v5011_v17 = vpop.xlane.xlu1 %5010  ;;  %v7360_v55 = vpop.eup %7359 }
0x1732   :  { %7365 = vrcp.f32 %v5011_v17  ;;  %v5048_v1 = vmul.f32 %v7360_v55, %v8680_v32  ;;  %v5026_v53 = vpop.xlane.xlu0 %5025  ;;  %v6229_v17 = vld [vmem:[%s9007_s7 + $0x1c] sm:$0xf] }
0x1733   :  { %7367 = vrcp.f32 %v5008_v2 }
0x1734   :  { %v7362_v15 = vpop.eup %7361 }
0x1735   :  { %v5049_v5 = vmul.f32 %v7362_v15, %v8686_v38  ;;  %v5023_v45 = vpop.xlane.xlu1 %5022 }
0x1736   :  { %v5020_v26 = vpop.xlane.xlu0 %5019 }
0x1737   :  { %v5060_v6 = vpack.c.bf16 %v5049_v5, %v5048_v1  ;;  %7369 = vrcp.f32 %v5020_v26 }
0x1738   :  { %v7364_v40 = vpop.eup %7363  ;;  %7371 = vrcp.f32 %v5023_v45 }
0x1739   :  { %6811 = vmatprep.mubr.msk.bf16.mxu1 %vm876_vm6, %v5060_v6  ;;  %v5052_v56 = vmul.f32 %v7364_v40, %v8692_v11  ;;  %v5029_v48 = vpop.xlane.xlu1 %5028  ;;  %7373 = vrcp.f32 %v5017_v27  ;;  %v6227_v27 = vld [vmem:[%s9007_s7 + $0x14] sm:$0xf] }
0x173a   :  { %v5032_v32 = vpop.xlane.xlu0 %5031 }
0x173b   :  { %7375 = vrcp.f32 %v5032_v32 }
0x173c   :  { %v7366_v39 = vpop.eup %7365  ;;  %7377 = vrcp.f32 %v5029_v48 }
0x173d   :  { %v5051_v41 = vmul.f32 %v7366_v39, %v7348_v51  ;;  %7379 = vrcp.f32 %v5026_v53  ;;  %v7368_v8 = vpop.eup %7367  ;;  %v5035_v33 = vpop.xlane.xlu1 %5034 }
0x173e   :  { %7381 = vrcp.f32 %v5035_v33  ;;  %v5050_v18 = vmul.f32 %v7368_v8, %v8678_v37 }
0x173f   :  { %v5062_v35 = vpack.c.bf16 %v5052_v56, %v5051_v41  ;;  %v5433_v56 = vsel %vm629_vm4, %v6228_v44, 0 }
0x1740   :  { %v5061_v59 = vpack.c.bf16 %v5050_v18, %v5050_v18 }
0x1741   :  { %6817 = vmatprep.mubr.msk.bf16.mxu0 %vm876_vm6, %v5062_v35  ;;  %v7370_v11 = vpop.eup %7369 }
0x1742   :  { %v7372_v28 = vpop.eup %7371  ;;  %v5054_v19 = vmul.f32 %v7370_v11, %v8706_v58 }
0x1743   :  { %v7374_v51 = vpop.eup %7373  ;;  %v5055_v10 = vmul.f32 %v7372_v28, %v8708_v63 }
0x1744   :  { %v5053_v49 = vmul.f32 %v7374_v51, %v8694_v4 }
0x1745   :  { %v7376_v52 = vpop.eup %7375  ;;  %v5064_v46 = vpack.c.bf16 %v5055_v10, %v5054_v19 }
0x1746   :  { %v7378_v34 = vpop.eup %7377  ;;  %v5058_v30 = vmul.f32 %v7376_v52, %v8719_v23  ;;  %v5063_v57 = vpack.c.bf16 %v5053_v49, %v5053_v49 }
0x1747   :  { %v7380_v9 = vpop.eup %7379  ;;  %v5057_v37 = vmul.f32 %v7378_v34, %v8721_v3 }
0x1748   :  { %v5056_v4 = vmul.f32 %v7380_v9, %v8701_v61  ;;  %v7382_v20 = vpop.eup %7381  ;;  %v6226_v61 = vld [vmem:[%s9007_s7 + $0x10] sm:$0xf] }
0x1749   :  { %v5066_v14 = vpack.c.bf16 %v5058_v30, %v5057_v37  ;;  %v5059_v23 = vmul.f32 %v7382_v20, %v8729_v7  ;;  %v5319_v12 = vsel %vm629_vm4, %v6226_v61, 0  ;;  %v5376_v7 = vsel %vm629_vm4, %v6227_v27, 0 }
0x174a   :  { %v5065_v2 = vpack.c.bf16 %v5056_v4, %v5056_v4 }
0x174b   :  { %v5067_v13 = vpack.c.bf16 %v5059_v23, %v5059_v23 }
0x1759   :  { %v4648_v38 = vpop.trf.xlu0 }
0x175a   :  { %v5068_v25 = vpack.c.bf16 %v4648_v38, %v4648_v38  ;;  %v5490_v38 = vsel %vm629_vm4, %v6229_v17, 0 }
0x175c   :  { %v5079_v21 = vsel %vm876_vm6, %v5068_v25, 0  ;;  %6947 = vmatprep.subr.msk.bf16.mxu1 %vm876_vm6, %v5068_v25 }
0x175d   :  { %6810 = vmatpush3.bf16.xpose.msra.mxu1 %v5079_v21  ;;  %v4649_v36 = vpop.trf.xlu0 }
0x175e   :  { %v5069_v50 = vpack.c.bf16 %v4649_v36, %v4649_v36 }
0x1760   :  { %v5136_v16 = vsel %vm876_vm6, %v5069_v50, 0  ;;  %6948 = vmatprep.subr.msk.bf16.mxu0 %vm876_vm6, %v5069_v50 }
0x1761   :  { %6816 = vmatpush3.bf16.xpose.msra.mxu0 %v5136_v16  ;;  %v4650_v24 = vpop.trf.xlu0 }
0x1762   :  { %v5070_v54 = vpack.c.bf16 %v4650_v24, %v4650_v24 }
0x1764   :  { %v5193_v58 = vsel %vm876_vm6, %v5070_v54, 0  ;;  %6812 = vmatmul.mubr.msk.bf16.vlgmr.msra.gmra.mrb[124].mxu1 %vm876_vm6, %v5061_v59  ;;  %6949 = vmatprep.subr.msk.bf16.mxu1 %vm876_vm6, %v5070_v54 }
0x1765   :  { %v4651_v63 = vpop.trf.xlu0  ;;  %6822 = vmatpush3.bf16.xpose.msra.mxu1 %v5193_v58  ;;  %6823 = vmatprep.mubr.msk.bf16.mxu1 %vm876_vm6, %v5064_v46 }
0x1766   :  { %v5071_v47 = vpack.c.bf16 %v4651_v63, %v4651_v63  ;;  %6951 = vmatprep.subr.msk.bf16.mxu1 %vm629_vm4, %v6226_v61 }
0x1768   :  { %v5250_v3 = vsel %vm876_vm6, %v5071_v47, 0  ;;  %6818 = vmatmul.mubr.msk.bf16.vlgmr.msra.gmra.mrb[96].mxu0 %vm876_vm6, %v5063_v57  ;;  %6950 = vmatprep.subr.msk.bf16.mxu0 %vm876_vm6, %v5071_v47 }
0x1769   :  { %6828 = vmatpush3.bf16.xpose.msra.mxu0 %v5250_v3  ;;  %6829 = vmatprep.mubr.msk.bf16.mxu0 %vm876_vm6, %v5066_v14 }
0x176a   :  { %6952 = vmatprep.subr.msk.bf16.mxu0 %vm629_vm4, %v6227_v27 }
0x176c   :  { %6824 = vmatmul.mubr.msk.bf16.vlgmr.msra.gmra.mrb[128].mxu1 %vm876_vm6, %v5065_v2 }
0x176d   :  { %6834 = vmatpush3.bf16.msra.mxu1 %v5319_v12 }
0x176e   :  { %6953 = vmatprep.subr.msk.bf16.mxu1 %vm629_vm4, %v6228_v44 }
0x1770   :  { %6830 = vmatmul.mubr.msk.bf16.vlgmr.msra.gmra.mrb[100].mxu0 %vm876_vm6, %v5067_v13 }
0x1771   :  { %6840 = vmatpush3.bf16.msra.mxu0 %v5376_v7 }
0x1772   :  { %6954 = vmatprep.subr.msk.bf16.mxu0 %vm629_vm4, %v6229_v17 }
0x1837   :  { %v6813_v55 = vpop.f32.mrb[124].mxu1 }
0x1838   :  { %v5115_v15 = vpop.f32.mrb[125].mxu1  ;;  %v5301_v39 = vpack.c.bf16 %v6813_v55, %v6813_v55  ;;  %v5583_v55 = vpop.xlane.xlu1 %5582 }
0x1839   :  { %v6814_v1 = vpop.f32.mrb[126].mxu1 }
0x183a   :  { %v5118_v5 = vpop.f32.mrb[127].mxu1 }
0x183b   :  { %v5300_v6 = vpack.c.bf16 %v5118_v5, %v5115_v15  ;;  %v6819_v40 = vpop.f32.mrb[96].mxu0 }
0x183c   :  { %v5172_v41 = vpop.f32.mrb[97].mxu0  ;;  %v5303_v32 = vpack.c.bf16 %v6819_v40, %v6819_v40 }
0x183d   :  { %v6820_v35 = vpop.f32.mrb[98].mxu0  ;;  %6835 = vmatprep.mubr.msk.bf16.mxu1 %vm622_vm3, %v5300_v6 }
0x183e   :  { %v5175_v53 = vpop.f32.mrb[99].mxu0  ;;  %6836 = vmatmul.mubr.msk.bf16.vlgmr.msra.gmra.mrb[132].mxu1 %vm622_vm3, %v5301_v39 }
0x183f   :  { %v5302_v26 = vpack.c.bf16 %v5175_v53, %v5172_v41  ;;  %v6825_v45 = vpop.f32.mrb[128].mxu1  ;;  %6846 = vmatpush3.bf16.msra.mxu1 %v5433_v56 }
0x1840   :  { %v5229_v48 = vpop.f32.mrb[129].mxu1  ;;  %6857 = vmatprep.subr.bf16.mxu1 %v7419_v0  ;;  %v5305_v28 = vpack.c.bf16 %v6825_v45, %v6825_v45  ;;  %v5599_v45 = vmul.f32 0.03125, %v5583_v55  ;;  %v8887_v55 = vld [vmem:[%s9011_s10 + $0x1] ss:$0 sm:$0xff] }
0x1841   :  { %v6826_v8 = vpop.f32.mrb[130].mxu1  ;;  %6841 = vmatprep.mubr.msk.bf16.mxu0 %vm622_vm3, %v5302_v26  ;;  %v5586_v26 = vpop.xlane.xlu1 %5585 }
0x1842   :  { %v5232_v33 = vpop.f32.mrb[131].mxu1  ;;  %6842 = vmatmul.mubr.msk.bf16.vlgmr.msra.gmra.mrb[104].mxu0 %vm622_vm3, %v5303_v32  ;;  %v5605_v8 = vsub.f32 %v8732_v29, %v5599_v45  ;;  %v7139_v45 = vld [vmem:[%s9012_s13 + $0x60] sm:$0xff]  }
0x1843   :  { %v5304_v25 = vpack.c.bf16 %v5232_v33, %v5229_v48  ;;  %v6831_v11 = vpop.f32.mrb[100].mxu0  ;;  %6852 = vmatpush3.bf16.msra.mxu0 %v5490_v38  ;;  %v5600_v33 = vmul.f32 0.03125, %v5586_v26 }
0x1844   :  { %v5286_v21 = vpop.f32.mrb[101].mxu0  ;;  %6873 = vmatprep.subr.bf16.mxu0 %v7419_v0  ;;  %v5307_v50 = vpack.c.bf16 %v6831_v11, %v6831_v11 }
0x1845   :  { %v6832_v36 = vpop.f32.mrb[102].mxu0  ;;  %6847 = vmatprep.mubr.msk.bf16.mxu1 %vm622_vm3, %v5304_v25  ;;  %v5589_v11 = vpop.xlane.xlu1 %5588 }
0x1846   :  { %v5289_v51 = vpop.f32.mrb[103].mxu0  ;;  %6848 = vmatmul.mubr.msk.bf16.vlgmr.msra.gmra.mrb[136].mxu1 %vm622_vm3, %v5305_v28  ;;  %v5601_v28 = vmul.f32 0.03125, %v5589_v11 }
0x1847   :  { %v5306_v18 = vpack.c.bf16 %v5289_v51, %v5286_v21  ;;  %6861 = vmatprep.mubr.msk.bf16.mxu1 %vm7420_vm0, %v7419_v0  ;;  %v5611_v21 = vmul.f32 %v5605_v8, %v5605_v8 }
0x1848   :  { %v8846_v36 = vsub.f32 %v8746_v22, %v5601_v28  ;;  %v7142_v28 = vld [vmem:[%s9012_s13 + $0x78] sm:$0xff]  }
0x1849   :  { %6853 = vmatprep.mubr.msk.bf16.mxu0 %vm622_vm3, %v5306_v18  ;;  %v5617_v51 = vsel %vm169_vm2, %v5611_v21, 0.0 }
0x184a   :  { %6854 = vmatmul.mubr.msk.bf16.vlgmr.msra.gmra.mrb[108].mxu0 %vm622_vm3, %v5307_v50  ;;  %v5613_v50 = vmul.f32 %v8846_v36, %v8846_v36 }
0x184b   :  { %6889 = vmatprep.mubr.msk.bf16.mxu0 %vm7420_vm0, %v7419_v0 }
0x1911   :  { %v6837_v52 = vpop.f32.mrb[132].mxu1 }
0x1912   :  { %v5355_v19 = vpop.f32.mrb[133].mxu1  ;;  %v5554_v24 = vsel %vm169_vm2, %v6837_v52, 0.0  ;;  %v5623_v52 = vsel %vm169_vm2, %v5613_v50, 0.0 }
0x1913   :  { %v6838_v10 = vpop.f32.mrb[134].mxu1  ;;  %v5540_v59 = vsel %vm169_vm2, %v5355_v19, 0.0  ;;  %v7133_v19 = vld [vmem:[%s9009_s11 + $0x10] sm:$0xff]  }
0x1914   :  { %v5358_v34 = vpop.f32.mrb[135].mxu1  ;;  %6858 = vmatpush3.bf16.msra.mxu1 %v7133_v19  ;;  %v7134_v10 = vld [vmem:[%s9009_s11 + $0x18] sm:$0xff]  }
0x1915   :  { %v6843_v16 = vpop.f32.mrb[104].mxu0  ;;  %v5547_v63 = vsel %vm169_vm2, %v5358_v34, 0.0  ;;  %6859 = vmatprep.subr.bf16.mxu1 %v7419_v0 }
0x1916   :  { %v5555_v49 = vsel %vm169_vm2, %v6843_v16, 0.0  ;;  %v5412_v54 = vpop.f32.mrb[105].mxu0 }
0x1917   :  { %v5556_v9 = vadd.f32 %v5555_v49, %v5554_v24  ;;  %v5541_v46 = vsel %vm169_vm2, %v5412_v54, 0.0  ;;  %v6844_v37 = vpop.f32.mrb[106].mxu0 }
0x1918   :  { %v5542_v30 = vadd.f32 %v5541_v46, %v5540_v59  ;;  %v5415_v58 = vpop.f32.mrb[107].mxu0  ;;  %6860 = vmatpush3.bf16.msra.mxu1 %v7134_v10 }
0x1919   :  { %v5548_v4 = vsel %vm169_vm2, %v5415_v58, 0.0  ;;  %v6849_v47 = vpop.f32.mrb[136].mxu1 }
0x191a   :  { %v5549_v57 = vadd.f32 %v5548_v4, %v5547_v63  ;;  %v5557_v20 = vsel %vm169_vm2, %v6849_v47, 0.0  ;;  %v5469_v14 = vpop.f32.mrb[137].mxu1 }
0x191b   :  { %v5558_v3 = vadd.f32 %v5557_v20, %v5556_v9  ;;  %v5543_v23 = vsel %vm169_vm2, %v5469_v14, 0.0  ;;  %v6850_v2 = vpop.f32.mrb[138].mxu1 }
0x191c   :  { %v5544_v13 = vadd.f32 %v5543_v23, %v5542_v30  ;;  %v5472_v61 = vpop.f32.mrb[139].mxu1 }
0x191d   :  { %v5550_v12 = vsel %vm169_vm2, %v5472_v61, 0.0  ;;  %v6855_v27 = vpop.f32.mrb[108].mxu0 }
0x191e   :  { %v5551_v7 = vadd.f32 %v5550_v12, %v5549_v57  ;;  %v5559_v44 = vsel %vm169_vm2, %v6855_v27, 0.0  ;;  %v5526_v17 = vpop.f32.mrb[109].mxu0  ;;  %v8881_v27 = vld [vmem:[%s9010_s9 + $0x1] ss:$0 sm:$0xff] }
0x191f   :  { %v5560_v15 = vadd.f32 %v5559_v44, %v5558_v3  ;;  %v5545_v1 = vsel %vm169_vm2, %v5526_v17, 0.0  ;;  %v6856_v5 = vpop.f32.mrb[110].mxu0 }
0x1920   :  { %v5546_v6 = vadd.f32 %v5545_v1, %v5544_v13  ;;  %v5529_v40 = vpop.f32.mrb[111].mxu0 }
0x1921   :  { %v5552_v39 = vsel %vm169_vm2, %v5529_v40, 0.0  ;;  %v5570_v32 = vadd.f32 %v8717_v60, %v5560_v15  ;;  %v7135_v40 = vld [vmem:[%s9012_s13 + $0x40] sm:$0xff]  }
0x1922   :  { %v5568_v41 = vadd.f32 %v8717_v60, %v5546_v6  ;;  %v5553_v56 = vadd.f32 %v5552_v39, %v5551_v7  ;;  %6874 = vmatpush3.bf16.msra.mxu0 %v7135_v40  ;;  %v7136_v39 = vld [vmem:[%s9012_s13 + $0x48] sm:$0xff]  }
0x1923   :  { %v8838_v25 = vadd.f32 %v5570_v32, %v8318_v43  ;;  %6875 = vmatprep.subr.bf16.mxu0 %v7419_v0 }
0x1924   :  { %v8827_v35 = vadd.f32 %v5568_v41, %v8291_v62  ;;  %v5569_v53 = vadd.f32 %v8717_v60, %v5553_v56  ;;  %v5606_v60 = vsub.f32 %v8741_v31, %v5600_v33  ;;  %v7137_v41 = vld [vmem:[%s9012_s13 + $0x50] sm:$0xff]  }
0x1925   :  { %v7141_v33 = vld [vmem:[%s9012_s13 + $0x70] sm:$0xff]  }
0x1926   :  { %v8832_v48 = vadd.f32 %v5569_v53, %v8314_v42  ;;  %v5590_v38 = vsel %vm169_vm2, %v8827_v35, 0.0  ;;  %v5596_v42 = vsel %vm169_vm2, %v8838_v25, 0.0  ;;  %v5612_v43 = vmul.f32 %v5606_v60, %v5606_v60  ;;  %6876 = vmatpush3.bf16.msra.mxu0 %v7136_v39  ;;  %v7138_v53 = vld [vmem:[%s9012_s13 + $0x58] sm:$0xff]  }
0x1927   :  { %5591 = vadd.xlane.f32.xlu1 %v5590_v38  ;;  %6877 = vmatprep.subr.bf16.mxu0 %v7419_v0  ;;  %v7140_v38 = vld [vmem:[%s9012_s13 + $0x68] sm:$0xff]  }
0x1928   :  { %v5593_v62 = vsel %vm169_vm2, %v8832_v48, 0.0  ;;  %v5620_v18 = vsel %vm169_vm2, %v5612_v43, 0.0 }
0x192a   :  { %6878 = vmatpush3.bf16.msra.mxu0 %v7137_v41 }
0x192b   :  { %5594 = vadd.xlane.f32.xlu1 %v5593_v62  ;;  %6879 = vmatprep.subr.bf16.mxu0 %v7419_v0 }
0x192e   :  { %6880 = vmatpush3.bf16.msra.mxu0 %v7138_v53 }
0x192f   :  { %5597 = vadd.xlane.f32.xlu1 %v5596_v42  ;;  %6881 = vmatprep.subr.bf16.mxu0 %v7419_v0 }
0x1932   :  { %6882 = vmatpush3.bf16.msra.mxu0 %v7139_v45 }
0x1933   :  { %5618 = vadd.xlane.f32.xlu1 %v5617_v51  ;;  %6883 = vmatprep.subr.bf16.mxu0 %v7419_v0 }
0x1936   :  { %6884 = vmatpush3.bf16.msra.mxu0 %v7140_v38 }
0x1937   :  { %5621 = vadd.xlane.f32.xlu1 %v5620_v18  ;;  %6885 = vmatprep.subr.bf16.mxu0 %v7419_v0 }
0x193a   :  { %6886 = vmatpush3.bf16.msra.mxu0 %v7141_v33 }
0x193b   :  { %5624 = vadd.xlane.f32.xlu1 %v5623_v52  ;;  %6887 = vmatprep.subr.bf16.mxu0 %v7419_v0 }
0x193e   :  { %6888 = vmatpush3.bf16.msra.mxu0 %v7142_v28 }
0x19b4   :  { %v5592_v34 = vpop.xlane.xlu1 %5591 }
0x19b5   :  { %v5602_v16 = vmul.f32 0.03125, %v5592_v34 }
0x19b7   :  { %v8861_v24 = vsub.f32 %v8827_v35, %v5602_v16 }
0x19b8   :  { %v5595_v49 = vpop.xlane.xlu1 %5594 }
0x19b9   :  { %v5603_v54 = vmul.f32 0.03125, %v5595_v49  ;;  %v5614_v59 = vmul.f32 %v8861_v24, %v8861_v24 }
0x19bb   :  { %v8866_v9 = vsub.f32 %v8832_v48, %v5603_v54  ;;  %v5626_v46 = vsel %vm169_vm2, %v5614_v59, 0.0 }
0x19bc   :  { %5627 = vadd.xlane.f32.xlu1 %v5626_v46  ;;  %v5598_v37 = vpop.xlane.xlu1 %5597 }
0x19bd   :  { %v5604_v30 = vmul.f32 0.03125, %v5598_v37  ;;  %v5615_v58 = vmul.f32 %v8866_v9, %v8866_v9 }
0x19bf   :  { %v8872_v63 = vsub.f32 %v8838_v25, %v5604_v30  ;;  %v5629_v4 = vsel %vm169_vm2, %v5615_v58, 0.0 }
0x19c0   :  { %5630 = vadd.xlane.f32.xlu1 %v5629_v4  ;;  %v5619_v47 = vpop.xlane.xlu1 %5618 }
0x19c1   :  { %v5635_v57 = vmul.f32 0.03125, %v5619_v47  ;;  %v5616_v20 = vmul.f32 %v8872_v63, %v8872_v63 }
0x19c3   :  { %v5641_v14 = vadd.f32 1e-06, %v5635_v57  ;;  %v5632_v3 = vsel %vm169_vm2, %v5616_v20, 0.0 }
0x19c4   :  { %5633 = vadd.xlane.f32.xlu1 %v5632_v3  ;;  %v5622_v23 = vpop.xlane.xlu1 %5621 }
0x19c5   :  { %7383 = vrsqrt.f32 %v5641_v14  ;;  %v5636_v2 = vmul.f32 0.03125, %v5622_v23 }
0x19c7   :  { %v5642_v13 = vadd.f32 1e-06, %v5636_v2 }
0x19c8   :  { %v5625_v56 = vpop.xlane.xlu1 %5624 }
0x19c9   :  { %7385 = vrsqrt.f32 %v5642_v13  ;;  %v5637_v26 = vmul.f32 0.03125, %v5625_v56 }
0x19cb   :  { %v5643_v32 = vadd.f32 1e-06, %v5637_v26 }
0x19cd   :  { %7387 = vrsqrt.f32 %v5643_v32 }
0x19cf   :  { %v7384_v61 = vpop.eup %7383 }
0x19d0   :  { %v5653_v12 = vmul.f32 %v7384_v61, %v5605_v8 }
0x19d2   :  { %v5665_v44 = vmul.f32 %v8881_v27, %v5653_v12 }
0x19d3   :  { %v7386_v7 = vpop.eup %7385 }
0x19d4   :  { %v5654_v17 = vmul.f32 %v7386_v7, %v5606_v60  ;;  %v5677_v1 = vadd.f32 %v8887_v55, %v5665_v44 }
0x19d6   :  { %v5666_v15 = vmul.f32 %v8881_v27, %v5654_v17 }
0x19d7   :  { %v7388_v43 = vpop.eup %7387 }
0x19d8   :  { %v5678_v5 = vadd.f32 %v8887_v55, %v5666_v15  ;;  %v5655_v52 = vmul.f32 %v7388_v43, %v8846_v36 }
0x19da   :  { %v5683_v6 = vpack.c.bf16 %v5678_v5, %v5677_v1  ;;  %v5667_v34 = vmul.f32 %v8881_v27, %v5655_v52 }
0x19dc   :  { %6862 = vmatmul.mubr.msk.bf16.vlgmr.msra.gmra.mrb[140].mxu1 %vm169_vm2, %v5683_v6  ;;  %v5679_v59 = vadd.f32 %v8887_v55, %v5667_v34 }
0x19dd   :  { %6865 = vmatprep.mubr.msk.bf16.mxu1 %vm7420_vm0, %v7419_v0 }
0x1a49   :  { %v5628_v8 = vpop.xlane.xlu1 %5627 }
0x1a4a   :  { %v5638_v62 = vmul.f32 0.03125, %v5628_v8 }
0x1a4c   :  { %v5644_v11 = vadd.f32 1e-06, %v5638_v62 }
0x1a4d   :  { %v5631_v60 = vpop.xlane.xlu1 %5630 }
0x1a4e   :  { %7389 = vrsqrt.f32 %v5644_v11  ;;  %v5639_v42 = vmul.f32 0.03125, %v5631_v60 }
0x1a50   :  { %v5645_v21 = vadd.f32 1e-06, %v5639_v42 }
0x1a51   :  { %v5634_v51 = vpop.xlane.xlu1 %5633 }
0x1a52   :  { %7391 = vrsqrt.f32 %v5645_v21  ;;  %v5640_v18 = vmul.f32 0.03125, %v5634_v51 }
0x1a54   :  { %v5646_v50 = vadd.f32 1e-06, %v5640_v18 }
0x1a56   :  { %7393 = vrsqrt.f32 %v5646_v50 }
0x1a58   :  { %v7390_v19 = vpop.eup %7389 }
0x1a59   :  { %v5656_v10 = vmul.f32 %v7390_v19, %v8861_v24 }
0x1a5b   :  { %v5668_v16 = vmul.f32 %v8881_v27, %v5656_v10 }
0x1a5c   :  { %v7392_v49 = vpop.eup %7391 }
0x1a5d   :  { %v5657_v54 = vmul.f32 %v7392_v49, %v8866_v9  ;;  %v5680_v46 = vadd.f32 %v8887_v55, %v5668_v16 }
0x1a5f   :  { %v5684_v37 = vpack.c.bf16 %v5680_v46, %v5679_v59  ;;  %v5669_v36 = vmul.f32 %v8881_v27, %v5657_v54 }
0x1a60   :  { %v7394_v30 = vpop.eup %7393 }
0x1a61   :  { %v5658_v58 = vmul.f32 %v7394_v30, %v8872_v63  ;;  %6866 = vmatmul.mubr.msk.bf16.gmra.mrb[144].mxu1 %vm169_vm2, %v5684_v37  ;;  %v5681_v4 = vadd.f32 %v8887_v55, %v5669_v36  ;;  %v6249_v63 = vld [vmem:[%s9013_s12 + $0x1] ss:$0 sm:$0xff] }
0x1a62   :  { %6869 = vmatprep.mubr.msk.bf16.mxu1 %vm7420_vm0, %v7419_v0 }
0x1a63   :  { %v5670_v24 = vmul.f32 %v8881_v27, %v5658_v58 }
0x1a65   :  { %v5682_v9 = vadd.f32 %v8887_v55, %v5670_v24 }
0x1a67   :  { %v5685_v47 = vpack.c.bf16 %v5682_v9, %v5681_v4 }
0x1a69   :  { %6870 = vmatmul.mubr.msk.bf16.gmra.mrb[148].mxu1 %vm169_vm2, %v5685_v47 }
0x1aaf   :  { %v5754_v57 = vpop.f32.mrb[140].mxu1 }
0x1ab0   :  { %v5755_v20 = vadd.f32 %v6249_v63, %v5754_v57  ;;  %v6863_v14 = vpop.f32.mrb[141].mxu1 }
0x1ab1   :  { %v5757_v3 = vpop.f32.mrb[142].mxu1 }
0x1ab2   :  { %v5777_v23 = vmul.f32 %v5755_v20, %v5755_v20  ;;  %v5758_v2 = vadd.f32 %v6249_v63, %v5757_v3  ;;  %v6864_v13 = vpop.f32.mrb[143].mxu1 }
0x1ab4   :  { %v5783_v61 = vmul.f32 %v5777_v23, %v5755_v20  ;;  %v5778_v12 = vmul.f32 %v5758_v2, %v5758_v2 }
0x1ab6   :  { %v5789_v27 = vmul.f32 0.044715, %v5783_v61  ;;  %v5784_v7 = vmul.f32 %v5778_v12, %v5758_v2 }
0x1ab8   :  { %v5795_v44 = vadd.f32 %v5789_v27, %v5755_v20  ;;  %v5790_v17 = vmul.f32 0.044715, %v5784_v7 }
0x1aba   :  { %v5801_v55 = vmul.f32 0.7978846, %v5795_v44  ;;  %v5796_v15 = vadd.f32 %v5790_v17, %v5758_v2 }
0x1abc   :  { %7395 = vtanh.f32 %v5801_v55  ;;  %v5802_v1 = vmul.f32 0.7978846, %v5796_v15 }
0x1abe   :  { %7397 = vtanh.f32 %v5802_v1 }
0x1ac6   :  { %v7396_v5 = vpop.eup %7395 }
0x1ac7   :  { %v5813_v6 = vadd.f32 1.0, %v7396_v5 }
0x1ac8   :  { %v7398_v40 = vpop.eup %7397 }
0x1ac9   :  { %v5819_v39 = vmul.f32 0.5, %v5813_v6  ;;  %v5814_v41 = vadd.f32 1.0, %v7398_v40  ;;  %v6272_v40 = vld [vmem:[%s9014_s14 + $0x1] ss:$0 sm:$0xff] }
0x1acb   :  { %v5820_v56 = vmul.f32 0.5, %v5814_v41  ;;  %v5825_v53 = vmul.f32 %v5819_v39, %v5755_v20 }
0x1acd   :  { %v5826_v26 = vmul.f32 %v5820_v56, %v5758_v2 }
0x1acf   :  { %v5831_v45 = vpack.c.bf16 %v5826_v26, %v5825_v53 }
0x1ad1   :  { %6890 = vmatmul.mubr.bf16.vlgmr.msra.gmra.mrb[112].mxu0 %v5831_v45 }
0x1ad2   :  { %6893 = vmatprep.mubr.msk.bf16.mxu0 %vm7420_vm0, %v7419_v0 }
0x1b34   :  { %v5762_v32 = vpop.f32.mrb[144].mxu1 }
0x1b35   :  { %v5763_v38 = vadd.f32 %v6249_v63, %v5762_v32  ;;  %v6867_v8 = vpop.f32.mrb[145].mxu1 }
0x1b36   :  { %v5765_v33 = vpop.f32.mrb[146].mxu1 }
0x1b37   :  { %v5779_v62 = vmul.f32 %v5763_v38, %v5763_v38  ;;  %v5766_v11 = vadd.f32 %v6249_v63, %v5765_v33  ;;  %v6868_v60 = vpop.f32.mrb[147].mxu1 }
0x1b39   :  { %v5785_v28 = vmul.f32 %v5779_v62, %v5763_v38  ;;  %v5780_v42 = vmul.f32 %v5766_v11, %v5766_v11 }
0x1b3b   :  { %v5791_v21 = vmul.f32 0.044715, %v5785_v28  ;;  %v5786_v51 = vmul.f32 %v5780_v42, %v5766_v11 }
0x1b3c   :  { %v5770_v43 = vpop.f32.mrb[148].mxu1 }
0x1b3d   :  { %v5797_v18 = vadd.f32 %v5791_v21, %v5763_v38  ;;  %v5792_v50 = vmul.f32 0.044715, %v5786_v51  ;;  %v5771_v52 = vadd.f32 %v6249_v63, %v5770_v43  ;;  %v6871_v19 = vpop.f32.mrb[149].mxu1 }
0x1b3e   :  { %v5773_v10 = vpop.f32.mrb[150].mxu1 }
0x1b3f   :  { %v5803_v34 = vmul.f32 0.7978846, %v5797_v18  ;;  %v5798_v16 = vadd.f32 %v5792_v50, %v5766_v11  ;;  %v5781_v49 = vmul.f32 %v5771_v52, %v5771_v52  ;;  %v5774_v54 = vadd.f32 %v6249_v63, %v5773_v10  ;;  %v6872_v59 = vpop.f32.mrb[151].mxu1 }
0x1b41   :  { %7399 = vtanh.f32 %v5803_v34  ;;  %v5804_v46 = vmul.f32 0.7978846, %v5798_v16  ;;  %v5787_v37 = vmul.f32 %v5781_v49, %v5771_v52  ;;  %v5782_v30 = vmul.f32 %v5774_v54, %v5774_v54 }
0x1b43   :  { %7401 = vtanh.f32 %v5804_v46  ;;  %v5793_v58 = vmul.f32 0.044715, %v5787_v37  ;;  %v5788_v36 = vmul.f32 %v5782_v30, %v5774_v54 }
0x1b45   :  { %v5799_v24 = vadd.f32 %v5793_v58, %v5771_v52  ;;  %v5794_v4 = vmul.f32 0.044715, %v5788_v36 }
0x1b47   :  { %v5805_v9 = vmul.f32 0.7978846, %v5799_v24  ;;  %v5800_v47 = vadd.f32 %v5794_v4, %v5774_v54 }
0x1b49   :  { %7403 = vtanh.f32 %v5805_v9  ;;  %v5806_v57 = vmul.f32 0.7978846, %v5800_v47 }
0x1b4b   :  { %v7400_v20 = vpop.eup %7399  ;;  %7405 = vtanh.f32 %v5806_v57 }
0x1b4c   :  { %v5815_v14 = vadd.f32 1.0, %v7400_v20 }
0x1b4d   :  { %v7402_v3 = vpop.eup %7401 }
0x1b4e   :  { %v5816_v23 = vadd.f32 1.0, %v7402_v3  ;;  %v5821_v63 = vmul.f32 0.5, %v5815_v14 }
0x1b50   :  { %v5822_v2 = vmul.f32 0.5, %v5816_v23  ;;  %v5827_v13 = vmul.f32 %v5821_v63, %v5763_v38 }
0x1b52   :  { %v5828_v61 = vmul.f32 %v5822_v2, %v5766_v11 }
0x1b53   :  { %v7404_v12 = vpop.eup %7403 }
0x1b54   :  { %v5832_v27 = vpack.c.bf16 %v5828_v61, %v5827_v13  ;;  %v5817_v7 = vadd.f32 1.0, %v7404_v12 }
0x1b55   :  { %v7406_v44 = vpop.eup %7405 }
0x1b56   :  { %6894 = vmatmul.mubr.bf16.gmra.mrb[116].mxu0 %v5832_v27  ;;  %v5818_v17 = vadd.f32 1.0, %v7406_v44  ;;  %v5823_v55 = vmul.f32 0.5, %v5817_v7 }
0x1b57   :  { %6897 = vmatprep.mubr.msk.bf16.mxu0 %vm7420_vm0, %v7419_v0 }
0x1b58   :  { %v5824_v15 = vmul.f32 0.5, %v5818_v17  ;;  %v5829_v1 = vmul.f32 %v5823_v55, %v5771_v52 }
0x1b5a   :  { %v5830_v5 = vmul.f32 %v5824_v15, %v5774_v54 }
0x1b5c   :  { %v5833_v6 = vpack.c.bf16 %v5830_v5, %v5829_v1 }
0x1b5e   :  { %6898 = vmatmul.mubr.bf16.gmra.mrb[120].mxu0 %v5833_v6 }
0x1ba4   :  { %v5941_v39 = vpop.f32.mrb[112].mxu0 }
0x1ba5   :  { %v5942_v41 = vadd.f32 %v6272_v40, %v5941_v39  ;;  %v6891_v56 = vpop.f32.mrb[113].mxu0 }
0x1ba6   :  { %v5944_v53 = vpop.f32.mrb[114].mxu0 }
0x1ba7   :  { %v5964_v26 = vadd.f32 %v5942_v41, %v8732_v29  ;;  %v5945_v45 = vadd.f32 %v6272_v40, %v5944_v53  ;;  %v6892_v32 = vpop.f32.mrb[115].mxu0  ;;  %v6281_v53 = vld [vmem:[%s9015_s15] ss:$0 sm:$0xff] }
0x1ba9   :  { %v5965_v38 = vadd.f32 %v5945_v45, %v8741_v31  ;;  %v5972_v0 = vsel %vm169_vm2, %v5964_v26, 0.0  ;;  %v6282_v45 = vld [vmem:[%s9016_s16] ss:$0 sm:$0xff] }
0x1baa   :  { %5973 = vadd.xlane.f32.xlu1 %v5972_v0 }
0x1bab   :  { %v5975_v8 = vsel %vm169_vm2, %v5965_v38, 0.0 }
0x1bac   :  { %5976 = vadd.xlane.f32.xlu0 %v5975_v8 }
0x1c29   :  { %v5949_v33 = vpop.f32.mrb[116].mxu0 }
0x1c2a   :  { %v5950_v62 = vadd.f32 %v6272_v40, %v5949_v33  ;;  %v6895_v11 = vpop.f32.mrb[117].mxu0 }
0x1c2b   :  { %v5952_v60 = vpop.f32.mrb[118].mxu0 }
0x1c2c   :  { %v5966_v28 = vadd.f32 %v5950_v62, %v8746_v22  ;;  %v5953_v42 = vadd.f32 %v6272_v40, %v5952_v60  ;;  %v6896_v21 = vpop.f32.mrb[119].mxu0 }
0x1c2e   :  { %v5967_v29 = vadd.f32 %v5953_v42, %v8827_v35  ;;  %v5978_v51 = vsel %vm169_vm2, %v5966_v28, 0.0 }
0x1c2f   :  { %5979 = vadd.xlane.f32.xlu1 %v5978_v51 }
0x1c30   :  { %v5981_v50 = vsel %vm169_vm2, %v5967_v29, 0.0 }
0x1c31   :  { %v5957_v31 = vpop.f32.mrb[120].mxu0 }
0x1c32   :  { %v5958_v43 = vadd.f32 %v6272_v40, %v5957_v31  ;;  %v6899_v18 = vpop.f32.mrb[121].mxu0 }
0x1c33   :  { %5982 = vadd.xlane.f32.xlu1 %v5981_v50  ;;  %v5960_v52 = vpop.f32.mrb[122].mxu0 }
0x1c34   :  { %v5968_v19 = vadd.f32 %v5958_v43, %v8832_v48  ;;  %v5961_v10 = vadd.f32 %v6272_v40, %v5960_v52  ;;  %v6900_v34 = vpop.f32.mrb[123].mxu0 }
0x1c36   :  { %v5969_v22 = vadd.f32 %v5961_v10, %v8838_v25  ;;  %v5984_v16 = vsel %vm169_vm2, %v5968_v19, 0.0 }
0x1c37   :  { %5985 = vadd.xlane.f32.xlu1 %v5984_v16  ;;  %v5974_v35 = vpop.xlane.xlu1 %5973 }
0x1c38   :  { %v5990_v49 = vmul.f32 0.03125, %v5974_v35  ;;  %v5987_v37 = vsel %vm169_vm2, %v5969_v22, 0.0 }
0x1c39   :  { %v5977_v54 = vpop.xlane.xlu0 %5976 }
0x1c3a   :  { %v5996_v59 = vsub.f32 %v5964_v26, %v5990_v49  ;;  %v5991_v46 = vmul.f32 0.03125, %v5977_v54 }
0x1c3b   :  { %5988 = vadd.xlane.f32.xlu1 %v5987_v37 }
0x1c3c   :  { %v5997_v30 = vsub.f32 %v5965_v38, %v5991_v46  ;;  %v6002_v58 = vmul.f32 %v5996_v59, %v5996_v59 }
0x1c3e   :  { %v6008_v36 = vsel %vm169_vm2, %v6002_v58, 0.0  ;;  %v6003_v48 = vmul.f32 %v5997_v30, %v5997_v30 }
0x1c3f   :  { %6009 = vadd.xlane.f32.xlu1 %v6008_v36 }
0x1c40   :  { %v6011_v24 = vsel %vm169_vm2, %v6003_v48, 0.0 }
0x1c43   :  { %6012 = vadd.xlane.f32.xlu1 %v6011_v24 }
0x1cbc   :  { %v5980_v25 = vpop.xlane.xlu1 %5979 }
0x1cbd   :  { %v5992_v4 = vmul.f32 0.03125, %v5980_v25 }
0x1cbf   :  { %v5998_v9 = vsub.f32 %v5966_v28, %v5992_v4 }
0x1cc0   :  { %v5983_v47 = vpop.xlane.xlu1 %5982 }
0x1cc1   :  { %v5993_v57 = vmul.f32 0.03125, %v5983_v47  ;;  %v6004_v20 = vmul.f32 %v5998_v9, %v5998_v9 }
0x1cc3   :  { %v5999_v14 = vsub.f32 %v5967_v29, %v5993_v57  ;;  %v6014_v3 = vsel %vm169_vm2, %v6004_v20, 0.0 }
0x1cc4   :  { %6015 = vadd.xlane.f32.xlu1 %v6014_v3  ;;  %v5986_v23 = vpop.xlane.xlu1 %5985 }
0x1cc5   :  { %v5994_v63 = vmul.f32 0.03125, %v5986_v23  ;;  %v6005_v2 = vmul.f32 %v5999_v14, %v5999_v14 }
0x1cc7   :  { %v6000_v13 = vsub.f32 %v5968_v19, %v5994_v63  ;;  %v6017_v61 = vsel %vm169_vm2, %v6005_v2, 0.0 }
0x1cc8   :  { %6018 = vadd.xlane.f32.xlu1 %v6017_v61  ;;  %v5989_v12 = vpop.xlane.xlu1 %5988 }
0x1cc9   :  { %v5995_v27 = vmul.f32 0.03125, %v5989_v12  ;;  %v6006_v7 = vmul.f32 %v6000_v13, %v6000_v13 }
0x1ccb   :  { %v6001_v44 = vsub.f32 %v5969_v22, %v5995_v27  ;;  %v6020_v17 = vsel %vm169_vm2, %v6006_v7, 0.0 }
0x1ccc   :  { %6021 = vadd.xlane.f32.xlu1 %v6020_v17  ;;  %v6010_v55 = vpop.xlane.xlu1 %6009 }
0x1ccd   :  { %v6026_v15 = vmul.f32 0.03125, %v6010_v55  ;;  %v6007_v1 = vmul.f32 %v6001_v44, %v6001_v44 }
0x1ccf   :  { %v6032_v5 = vadd.f32 1e-06, %v6026_v15  ;;  %v6023_v6 = vsel %vm169_vm2, %v6007_v1, 0.0 }
0x1cd0   :  { %6024 = vadd.xlane.f32.xlu1 %v6023_v6  ;;  %v6013_v40 = vpop.xlane.xlu1 %6012 }
0x1cd1   :  { %7407 = vrsqrt.f32 %v6032_v5  ;;  %v6027_v39 = vmul.f32 0.03125, %v6013_v40 }
0x1cd3   :  { %v6033_v41 = vadd.f32 1e-06, %v6027_v39 }
0x1cd5   :  { %7409 = vrsqrt.f32 %v6033_v41 }
0x1cdb   :  { %v7408_v56 = vpop.eup %7407 }
0x1cdc   :  { %v6044_v26 = vmul.f32 %v7408_v56, %v5996_v59 }
0x1cde   :  { %v6056_v32 = vmul.f32 %v6281_v53, %v6044_v26 }
0x1cdf   :  { %v7410_v38 = vpop.eup %7409 }
0x1ce0   :  { %v6068_v0 = vadd.f32 %v6282_v45, %v6056_v32  ;;  %v6045_v8 = vmul.f32 %v7410_v38, %v5997_v30 }
0x1ce2   :  { %6074 = vst.msk [vmem:[%s9017_s17] sm:$0xff] %vm169_vm2, %v6068_v0  ;;  %v6057_v33 = vmul.f32 %v6281_v53, %v6045_v8 }
0x1ce4   :  { %v6069_v62 = vadd.f32 %v6282_v45, %v6057_v33 }
0x1ce6   :  { %6075 = vst.msk [vmem:[%s9017_s17 + $0x8] sm:$0xff] %vm169_vm2, %v6069_v62 }
0x1d51   :  { %v6016_v11 = vpop.xlane.xlu1 %6015 }
0x1d52   :  { %v6028_v60 = vmul.f32 0.03125, %v6016_v11 }
0x1d54   :  { %v6034_v28 = vadd.f32 1e-06, %v6028_v60 }
0x1d55   :  { %v6019_v42 = vpop.xlane.xlu1 %6018 }
0x1d56   :  { %7411 = vrsqrt.f32 %v6034_v28  ;;  %v6029_v21 = vmul.f32 0.03125, %v6019_v42 }
0x1d58   :  { %v6035_v29 = vadd.f32 1e-06, %v6029_v21 }
0x1d59   :  { %v6022_v51 = vpop.xlane.xlu1 %6021 }
0x1d5a   :  { %7413 = vrsqrt.f32 %v6035_v29  ;;  %v6030_v31 = vmul.f32 0.03125, %v6022_v51 }
0x1d5c   :  { %v6036_v43 = vadd.f32 1e-06, %v6030_v31 }
0x1d5d   :  { %v6025_v18 = vpop.xlane.xlu1 %6024 }
0x1d5e   :  { %7415 = vrsqrt.f32 %v6036_v43  ;;  %v6031_v50 = vmul.f32 0.03125, %v6025_v18 }
0x1d60   :  { %v7412_v52 = vpop.eup %7411  ;;  %v6037_v19 = vadd.f32 1e-06, %v6031_v50 }
0x1d61   :  { %v6046_v10 = vmul.f32 %v7412_v52, %v5998_v9 }
0x1d62   :  { %7417 = vrsqrt.f32 %v6037_v19 }
0x1d63   :  { %v6058_v34 = vmul.f32 %v6281_v53, %v6046_v10 }
0x1d64   :  { %v7414_v22 = vpop.eup %7413 }
0x1d65   :  { %v6070_v16 = vadd.f32 %v6282_v45, %v6058_v34  ;;  %v6047_v35 = vmul.f32 %v7414_v22, %v5999_v14 }
0x1d67   :  { %6076 = vst.msk [vmem:[%s9017_s17 + $0x10] sm:$0xff] %vm169_vm2, %v6070_v16  ;;  %v6059_v49 = vmul.f32 %v6281_v53, %v6047_v35 }
0x1d68   :  { %v7416_v54 = vpop.eup %7415 }
0x1d69   :  { %v6071_v59 = vadd.f32 %v6282_v45, %v6059_v49  ;;  %v6048_v46 = vmul.f32 %v7416_v54, %v6000_v13 }
0x1d6b   :  { %6077 = vst.msk [vmem:[%s9017_s17 + $0x18] sm:$0xff] %vm169_vm2, %v6071_v59  ;;  %v6060_v37 = vmul.f32 %v6281_v53, %v6048_v46 }
0x1d6c   :  { %v7418_v30 = vpop.eup %7417 }
0x1d6d   :  { %v6072_v58 = vadd.f32 %v6282_v45, %v6060_v37  ;;  %v6049_v36 = vmul.f32 %v7418_v30, %v6001_v44 }
0x1d6f   :  { %6078 = vst.msk [vmem:[%s9017_s17 + $0x20] sm:$0xff] %vm169_vm2, %v6072_v58  ;;  %v6061_v48 = vmul.f32 %v6281_v53, %v6049_v36 }
0x1d71   :  { %v6073_v24 = vadd.f32 %v6282_v45, %v6061_v48 }
0x1d73   :  { %6079 = vst.msk [vmem:[%s9017_s17 + $0x28] sm:$0xff] %vm169_vm2, %v6073_v24 }

</bundles_post_ra>
